<compile_context>
chip_gen: v7x
topology: tpu7x:2x2x1
jax: 0.10.0
libtpu: 0.0.40
codegen_flags: <defaults>
</compile_context>

<pallas_src>
import functools

import jax
import jax.numpy as jnp
from jax import lax
from jax.experimental import pallas as pl
from jax.experimental.pallas import tpu as pltpu

# ---------------- configuration (mirrors args of TaggerModel) ----------------
VOCAB = 50
VOCAB_PAD = ((VOCAB + 7) // 8) * 8   # pad vocab rows to a sublane multiple
BATCH = 2
SEQ = 8
HIDDEN = 32            # args.lm_hidden_size
NUM_HEADS = 4
HEAD_DIM = HIDDEN // NUM_HEADS
FFN = 64
NUM_LAYERS = 2
TAGGER_CLASSES = 5     # args.tagger_classes
MAX_GENERATE = 5
MAX_TOKEN = MAX_GENERATE + 1   # self.max_token
DROPOUT_P = 0.1        # dropout is identity at inference (eval mode)

HEAD_OUT = 128         # lane-dense fused-head output width (C + T <= 128, zero-padded)
LN_EPS = 1e-12

# f32 is correct/fast on all generations; flip to jnp.bfloat16 on v6e/v7x for
# 2x MXU issue rate and half the weight DMA/VMEM footprint (accumulation and
# all LayerNorm/softmax/residual math stays f32).
WEIGHT_DTYPE = jnp.float32


# ------------------------------ kernel helpers --------------------------------
def _layernorm(x, g, b):
    mu = jnp.mean(x, axis=-1, keepdims=True)
    var = jnp.mean((x - mu) ** 2, axis=-1, keepdims=True)
    return (x - mu) * lax.rsqrt(var + LN_EPS) * g + b


# --------------------- fully fused encoder + heads kernel ---------------------
def fused_forward_kernel(ids_ref, mask_ref, wemb_ref, pemb_ref,
                         wqkv_ref, wo_ref, wffn1_ref, wffn2_ref, vec_ref,
                         whead_ref, bhead_ref, out_ref, x_scratch):
    H, HD, S, B = HIDDEN, HEAD_DIM, SEQ, BATCH

    # ---- fused embedding lookup: B*S dynamic row gathers from the VMEM table ----
    for t in range(B * S):
        row = (wemb_ref[pl.ds(ids_ref[t], 1), :]
               + pemb_ref[pl.ds(t % S, 1), :])                  # (1, H)
        x_scratch[pl.ds(t, 1), :] = row
    x = x_scratch[...]                                          # (B*S, H)

    # Additive key mask per batch element (1.0 = attend, 0.0 = pad), computed once.
    neg_bias = [(1.0 - mask_ref[pl.ds(b, 1), :]) * (-1e9) for b in range(B)]  # (1, S)

    for l in range(NUM_LAYERS):                                 # static unroll
        # Row-aligned, lane-0 slices of the per-layer parameter slab
        # (plain sublane-offset loads, no lane-offset extracts).
        vec = vec_ref.at[l]                                     # (8, 128) view
        b_qkv = vec[0:1, 0:3 * H]                               # (1, 3H), q part pre-scaled
        b_o = vec[1:2, 0:H]
        ln1g = vec[2:3, 0:H]
        ln1b = vec[3:4, 0:H]
        ln2g = vec[4:5, 0:H]
        ln2b = vec[5:6, 0:H]
        b1 = vec[6:7, 0:FFN]
        b2 = vec[7:8, 0:H]

        # Single packed QKV projection over all B*S rows (scale folded into Wq).
        wqkv = wqkv_ref[l]                                      # (H, 3H)
        qkv = jnp.dot(x.astype(wqkv.dtype), wqkv,
                      preferred_element_type=jnp.float32) + b_qkv          # (B*S, 3H)

        # Per-batch, per-head attention.  Wo is applied as ACCUMULATED per-head
        # projections (no lane-axis concatenation of the context heads); Wo row
        # slices come straight from the ref and are sublane-aligned at lane 0.
        wo_l = wo_ref.at[l]                                     # (H, H) view
        attn_rows = []
        for b in range(B):
            qkv_b = qkv[b * S:(b + 1) * S, :]                   # (S, 3H), sublane-aligned
            acc = None
            for h in range(NUM_HEADS):
                qh = qkv_b[:, h * HD:(h + 1) * HD]
                kh = qkv_b[:, H + h * HD:H + (h + 1) * HD]
                vh = qkv_b[:, 2 * H + h * HD:2 * H + (h + 1) * HD]
                s = lax.dot_general(qh, kh, (((1,), (1,)), ((), ())),
                                    preferred_element_type=jnp.float32)    # (S, S)
                s = s + neg_bias[b]
                s = s - jnp.max(s, axis=-1, keepdims=True)
                p = jnp.exp(s)
                p = p * pl.reciprocal(jnp.sum(p, axis=-1, keepdims=True), approx=True)
                ctx = jnp.dot(p, vh, preferred_element_type=jnp.float32)   # (S, HD)
                wo_h = wo_l[h * HD:(h + 1) * HD, :]                        # (HD, H)
                proj = jnp.dot(ctx.astype(wo_h.dtype), wo_h,
                               preferred_element_type=jnp.float32)         # (S, H)
                acc = proj if acc is None else acc + proj
            attn_rows.append(acc)
        attn_out = jnp.concatenate(attn_rows, axis=0) + b_o                # (B*S, H)

        h1 = _layernorm(x + attn_out, ln1g, ln1b)

        w1 = wffn1_ref[l]
        w2 = wffn2_ref[l]
        ffn = jnp.dot(h1.astype(w1.dtype), w1,
                      preferred_element_type=jnp.float32) + b1
        # tanh-approx GELU; PyTorch nn.GELU default is exact erf (close numerically).
        ffn = jax.nn.gelu(ffn, approximate=True)
        ffn = jnp.dot(ffn.astype(w2.dtype), w2,
                      preferred_element_type=jnp.float32) + b2

        x = _layernorm(h1 + ffn, ln2g, ln2b)

    # Dropout is identity at inference (eval mode).
    # Fused, lane-dense heads: one (B*S,H)x(H,128) matmul; columns [0:C] are the
    # tagger logits, [C:C+T] the t logits, rest zero padding -> one unmasked
    # 128-wide store.  Logits are sliced out in the JAX wrapper.
    wh = whead_ref[...]
    out_ref[...] = (jnp.dot(x.astype(wh.dtype), wh,
                            preferred_element_type=jnp.float32) + bhead_ref[...])


def run_fused_forward(ids_flat, mask, params):
    """ids_flat: (B*S,) int32, mask: (B, S) f32 -> (B*S, HEAD_OUT) f32."""
    grid_spec = pltpu.PrefetchScalarGridSpec(
        num_scalar_prefetch=1,           # input_ids -> SMEM
        grid=(1,),                       # single step: B folded into M (v5e/v6e win)
        in_specs=[
            pl.BlockSpec((BATCH, SEQ), lambda i, ids: (0, 0)),                   # mask
            pl.BlockSpec((VOCAB_PAD, HIDDEN), lambda i, ids: (0, 0)),            # word emb
            pl.BlockSpec((SEQ, HIDDEN), lambda i, ids: (0, 0)),                  # pos emb
            pl.BlockSpec((NUM_LAYERS, HIDDEN, 3 * HIDDEN), lambda i, ids: (0, 0, 0)),  # W_qkv
            pl.BlockSpec((NUM_LAYERS, HIDDEN, HIDDEN), lambda i, ids: (0, 0, 0)),      # W_o
            pl.BlockSpec((NUM_LAYERS, HIDDEN, FFN), lambda i, ids: (0, 0, 0)),         # W_ffn1
            pl.BlockSpec((NUM_LAYERS, FFN, HIDDEN), lambda i, ids: (0, 0, 0)),         # W_ffn2
            pl.BlockSpec((NUM_LAYERS, 8, 128), lambda i, ids: (0, 0, 0)),              # Vec slab
            pl.BlockSpec((HIDDEN, HEAD_OUT), lambda i, ids: (0, 0)),                   # head W
            pl.BlockSpec((1, HEAD_OUT), lambda i, ids: (0, 0)),                        # head b
        ],
        out_specs=pl.BlockSpec((BATCH * SEQ, HEAD_OUT), lambda i, ids: (0, 0)),
        scratch_shapes=[pltpu.VMEM((BATCH * SEQ, HIDDEN), jnp.float32)],  # embedded x
    )
    # TODO(synk): for a real PLM (H=768+, 12+ layers) on v7x, stream per-layer
    # weight slabs over an 'arbitrary' layer grid axis instead of keeping all
    # layers VMEM-resident (64 MiB VMEM budget).
    return pl.pallas_call(
        fused_forward_kernel,
        out_shape=jax.ShapeDtypeStruct((BATCH * SEQ, HEAD_OUT), jnp.float32),
        grid_spec=grid_spec,
        compiler_params=pltpu.CompilerParams(
            dimension_semantics=("arbitrary",)),
    )(ids_flat, mask, params["word_emb"], params["pos_emb"],
      params["W_qkv"], params["W_o"], params["W_ffn1"], params["W_ffn2"],
      params["Vec"], params["W_heads"], params["b_heads"])


# ----------------------------- parameter setup --------------------------------
def init_params(key):
    keys = iter(jax.random.split(key, 4 + 6 * NUM_LAYERS))

    def nrm(shape, scale=0.02):
        return (scale * jax.random.normal(next(keys), shape)).astype(jnp.float32)

    H = HIDDEN
    inv_sqrt_d = 1.0 / (HEAD_DIM ** 0.5)

    word_emb = jnp.zeros((VOCAB_PAD, H), jnp.float32).at[:VOCAB].set(nrm((VOCAB, H)))
    pos_emb = nrm((SEQ, H))
    params = {"word_emb": word_emb, "pos_emb": pos_emb}

    wqkv_l, wo_l, wffn1_l, wffn2_l, vec_l = [], [], [], [], []
    for _ in range(NUM_LAYERS):
        wq, wk, wv, wo = nrm((H, H)), nrm((H, H)), nrm((H, H)), nrm((H, H))
        w1, w2 = nrm((H, FFN)), nrm((FFN, H))
        bq = jnp.zeros((H,), jnp.float32)
        bk = jnp.zeros((H,), jnp.float32)
        bv = jnp.zeros((H,), jnp.float32)
        bo = jnp.zeros((H,), jnp.float32)
        b1 = jnp.zeros((FFN,), jnp.float32)
        b2 = jnp.zeros((H,), jnp.float32)
        ln1g = jnp.ones((H,), jnp.float32)
        ln1b = jnp.zeros((H,), jnp.float32)
        ln2g = jnp.ones((H,), jnp.float32)
        ln2b = jnp.zeros((H,), jnp.float32)

        # [Wq*scale | Wk | Wv] packed into one (H, 3H) slab; Wo kept separate so
        # the in-kernel per-head row slices are sublane-aligned at lane 0.
        wqkv_l.append(jnp.concatenate([wq * inv_sqrt_d, wk, wv], axis=1))
        wo_l.append(wo)
        wffn1_l.append(w1)
        wffn2_l.append(w2)

        # One (8,128) vreg-sized slab per layer; ONE parameter per sublane row,
        # every slice starting at lane 0 (no lane-offset extracts in the kernel).
        vec = jnp.zeros((8, 128), jnp.float32)
        vec = vec.at[0, 0:3 * H].set(jnp.concatenate([bq * inv_sqrt_d, bk, bv]))
        vec = vec.at[1, 0:H].set(bo)
        vec = vec.at[2, 0:H].set(ln1g)
        vec = vec.at[3, 0:H].set(ln1b)
        vec = vec.at[4, 0:H].set(ln2g)
        vec = vec.at[5, 0:H].set(ln2b)
        vec = vec.at[6, 0:FFN].set(b1)
        vec = vec.at[7, 0:H].set(b2)
        vec_l.append(vec)

    params["W_qkv"] = jnp.stack(wqkv_l).astype(WEIGHT_DTYPE)    # (L, H, 3H)
    params["W_o"] = jnp.stack(wo_l).astype(WEIGHT_DTYPE)        # (L, H, H)
    params["W_ffn1"] = jnp.stack(wffn1_l).astype(WEIGHT_DTYPE)  # (L, H, FFN)
    params["W_ffn2"] = jnp.stack(wffn2_l).astype(WEIGHT_DTYPE)  # (L, FFN, H)
    params["Vec"] = jnp.stack(vec_l)                            # (L, 8, 128), f32

    # Fused, zero-padded head weights: cols [0:C] = hidden2tag, [C:C+T] = hidden2t.
    w_tag = nrm((H, TAGGER_CLASSES))
    w_t = nrm((H, MAX_TOKEN))
    w_heads = jnp.zeros((H, HEAD_OUT), jnp.float32)
    w_heads = w_heads.at[:, :TAGGER_CLASSES].set(w_tag)
    w_heads = w_heads.at[:, TAGGER_CLASSES:TAGGER_CLASSES + MAX_TOKEN].set(w_t)
    params["W_heads"] = w_heads.astype(WEIGHT_DTYPE)
    params["b_heads"] = jnp.zeros((1, HEAD_OUT), jnp.float32)
    return params


# ------------------------------ forward pass ----------------------------------
def tagger_model_forward(params, input_ids, attention_mask):
    """input_ids: (B, S) int32, attention_mask: (B, S) float32 (1 = keep)."""
    B, S = input_ids.shape
    ids_flat = input_ids.reshape(B * S).astype(jnp.int32)       # scalar-prefetch operand
    mask = attention_mask.astype(jnp.float32)

    logits = run_fused_forward(ids_flat, mask, params)          # (B*S, 128)
    logits = logits.reshape(B, S, HEAD_OUT)

    tagger_logits = logits[:, :, :TAGGER_CLASSES]
    t_logits = logits[:, :, TAGGER_CLASSES:TAGGER_CLASSES + MAX_TOKEN]
    return tagger_logits, t_logits


# ---------------------------------- main ---------------------------------------
if __name__ == "__main__":
    key = jax.random.PRNGKey(0)
    pkey, ikey = jax.random.split(key)

    params = init_params(pkey)

    input_ids = jax.random.randint(ikey, (BATCH, SEQ), 0, VOCAB, dtype=jnp.int32)
    attention_mask = jnp.ones((BATCH, SEQ), jnp.float32)
    attention_mask = attention_mask.at[1, SEQ - 2:].set(0.0)    # pad tail of example 1

    fwd = jax.jit(functools.partial(tagger_model_forward, params))
    tagger_logits, t_logits = fwd(input_ids, attention_mask)
    jax.block_until_ready((tagger_logits, t_logits))

    assert tagger_logits.shape == (BATCH, SEQ, TAGGER_CLASSES)
    assert t_logits.shape == (BATCH, SEQ, MAX_TOKEN)
    assert tagger_logits.dtype == jnp.float32 and t_logits.dtype == jnp.float32
    assert bool(jnp.all(jnp.isfinite(tagger_logits))) and bool(jnp.all(jnp.isfinite(t_logits)))

    print("KERNEL_OK")
</pallas_src>

<mosaic_0001>
module attributes {stable_mosaic.version = 11 : i64} {
  func.func @fused_forward_kernel(%arg0: i32, %arg1: memref<16xi32, #tpu.memory_space<smem>>, %arg2: memref<2x8xf32, #tpu.memory_space<vmem>>, %arg3: memref<56x32xf32, #tpu.memory_space<vmem>>, %arg4: memref<8x32xf32, #tpu.memory_space<vmem>>, %arg5: memref<2x32x96xf32, #tpu.memory_space<vmem>>, %arg6: memref<2x32x32xf32, #tpu.memory_space<vmem>>, %arg7: memref<2x32x64xf32, #tpu.memory_space<vmem>>, %arg8: memref<2x64x32xf32, #tpu.memory_space<vmem>>, %arg9: memref<2x8x128xf32, #tpu.memory_space<vmem>>, %arg10: memref<32x128xf32, #tpu.memory_space<vmem>>, %arg11: memref<1x128xf32, #tpu.memory_space<vmem>>, %arg12: memref<16x128xf32, #tpu.memory_space<vmem>>, %arg13: memref<16x32xf32, #tpu.memory_space<vmem>>) attributes {dimension_semantics = [#tpu.dimension_semantics<arbitrary>], iteration_bounds = array<i64: 1>, scalar_prefetch = 1 : i64, scratch_operands = 1 : i64, tpu.core_type = #tpu.core_type<tc>, window_params = [{pipeline_mode = #tpu.pipeline_mode<synchronous>, transform_indices = @transform_0, window_bounds = array<i64: 2, 8>}, {pipeline_mode = #tpu.pipeline_mode<synchronous>, transform_indices = @transform_1, window_bounds = array<i64: 56, 32>}, {pipeline_mode = #tpu.pipeline_mode<synchronous>, transform_indices = @transform_2, window_bounds = array<i64: 8, 32>}, {pipeline_mode = #tpu.pipeline_mode<synchronous>, transform_indices = @transform_3, window_bounds = array<i64: 2, 32, 96>}, {pipeline_mode = #tpu.pipeline_mode<synchronous>, transform_indices = @transform_4, window_bounds = array<i64: 2, 32, 32>}, {pipeline_mode = #tpu.pipeline_mode<synchronous>, transform_indices = @transform_5, window_bounds = array<i64: 2, 32, 64>}, {pipeline_mode = #tpu.pipeline_mode<synchronous>, transform_indices = @transform_6, window_bounds = array<i64: 2, 64, 32>}, {pipeline_mode = #tpu.pipeline_mode<synchronous>, transform_indices = @transform_7, window_bounds = array<i64: 2, 8, 128>}, {pipeline_mode = #tpu.pipeline_mode<synchronous>, transform_indices = @transform_8, window_bounds = array<i64: 32, 128>}, {pipeline_mode = #tpu.pipeline_mode<synchronous>, transform_indices = @transform_9, window_bounds = array<i64: 1, 128>}, {pipeline_mode = #tpu.pipeline_mode<synchronous>, transform_indices = @transform_10, window_bounds = array<i64: 16, 128>}]} {
    %c0 = arith.constant 0 : index
    %0 = memref.load %arg1[%c0] : memref<16xi32, #tpu.memory_space<smem>>
    %1 = arith.index_cast %0 : i32 to index
    %c0_0 = arith.constant 0 : index
    %2 = vector.load %arg3[%1, %c0_0] : memref<56x32xf32, #tpu.memory_space<vmem>>, vector<1x32xf32>
    %c0_1 = arith.constant 0 : index
    %c0_2 = arith.constant 0 : index
    %3 = vector.load %arg4[%c0_1, %c0_2] : memref<8x32xf32, #tpu.memory_space<vmem>>, vector<1x32xf32>
    %4 = arith.addf %2, %3 : vector<1x32xf32>
    %c0_3 = arith.constant 0 : index
    %c0_4 = arith.constant 0 : index
    %5 = vector.load %arg13[%c0_3, %c0_4] : memref<16x32xf32, #tpu.memory_space<vmem>>, vector<1x32xf32>
    tpu.vector_store %arg13[%c0_3, %c0_4], %4 {strides = array<i32>} : memref<16x32xf32, #tpu.memory_space<vmem>>, vector<1x32xf32>,
    %c1 = arith.constant 1 : index
    %6 = memref.load %arg1[%c1] : memref<16xi32, #tpu.memory_space<smem>>
    %7 = arith.index_cast %6 : i32 to index
    %c0_5 = arith.constant 0 : index
    %8 = vector.load %arg3[%7, %c0_5] : memref<56x32xf32, #tpu.memory_space<vmem>>, vector<1x32xf32>
    %c1_6 = arith.constant 1 : index
    %c0_7 = arith.constant 0 : index
    %9 = vector.load %arg4[%c1_6, %c0_7] : memref<8x32xf32, #tpu.memory_space<vmem>>, vector<1x32xf32>
    %10 = arith.addf %8, %9 : vector<1x32xf32>
    %c1_8 = arith.constant 1 : index
    %c0_9 = arith.constant 0 : index
    %11 = vector.load %arg13[%c1_8, %c0_9] : memref<16x32xf32, #tpu.memory_space<vmem>>, vector<1x32xf32>
    tpu.vector_store %arg13[%c1_8, %c0_9], %10 {strides = array<i32>} : memref<16x32xf32, #tpu.memory_space<vmem>>, vector<1x32xf32>,
    %c2 = arith.constant 2 : index
    %12 = memref.load %arg1[%c2] : memref<16xi32, #tpu.memory_space<smem>>
    %13 = arith.index_cast %12 : i32 to index
    %c0_10 = arith.constant 0 : index
    %14 = vector.load %arg3[%13, %c0_10] : memref<56x32xf32, #tpu.memory_space<vmem>>, vector<1x32xf32>
    %c2_11 = arith.constant 2 : index
    %c0_12 = arith.constant 0 : index
    %15 = vector.load %arg4[%c2_11, %c0_12] : memref<8x32xf32, #tpu.memory_space<vmem>>, vector<1x32xf32>
    %16 = arith.addf %14, %15 : vector<1x32xf32>
    %c2_13 = arith.constant 2 : index
    %c0_14 = arith.constant 0 : index
    %17 = vector.load %arg13[%c2_13, %c0_14] : memref<16x32xf32, #tpu.memory_space<vmem>>, vector<1x32xf32>
    tpu.vector_store %arg13[%c2_13, %c0_14], %16 {strides = array<i32>} : memref<16x32xf32, #tpu.memory_space<vmem>>, vector<1x32xf32>,
    %c3 = arith.constant 3 : index
    %18 = memref.load %arg1[%c3] : memref<16xi32, #tpu.memory_space<smem>>
    %19 = arith.index_cast %18 : i32 to index
    %c0_15 = arith.constant 0 : index
    %20 = vector.load %arg3[%19, %c0_15] : memref<56x32xf32, #tpu.memory_space<vmem>>, vector<1x32xf32>
    %c3_16 = arith.constant 3 : index
    %c0_17 = arith.constant 0 : index
    %21 = vector.load %arg4[%c3_16, %c0_17] : memref<8x32xf32, #tpu.memory_space<vmem>>, vector<1x32xf32>
    %22 = arith.addf %20, %21 : vector<1x32xf32>
    %c3_18 = arith.constant 3 : index
    %c0_19 = arith.constant 0 : index
    %23 = vector.load %arg13[%c3_18, %c0_19] : memref<16x32xf32, #tpu.memory_space<vmem>>, vector<1x32xf32>
    tpu.vector_store %arg13[%c3_18, %c0_19], %22 {strides = array<i32>} : memref<16x32xf32, #tpu.memory_space<vmem>>, vector<1x32xf32>,
    %c4 = arith.constant 4 : index
    %24 = memref.load %arg1[%c4] : memref<16xi32, #tpu.memory_space<smem>>
    %25 = arith.index_cast %24 : i32 to index
    %c0_20 = arith.constant 0 : index
    %26 = vector.load %arg3[%25, %c0_20] : memref<56x32xf32, #tpu.memory_space<vmem>>, vector<1x32xf32>
    %c4_21 = arith.constant 4 : index
    %c0_22 = arith.constant 0 : index
    %27 = vector.load %arg4[%c4_21, %c0_22] : memref<8x32xf32, #tpu.memory_space<vmem>>, vector<1x32xf32>
    %28 = arith.addf %26, %27 : vector<1x32xf32>
    %c4_23 = arith.constant 4 : index
    %c0_24 = arith.constant 0 : index
    %29 = vector.load %arg13[%c4_23, %c0_24] : memref<16x32xf32, #tpu.memory_space<vmem>>, vector<1x32xf32>
    tpu.vector_store %arg13[%c4_23, %c0_24], %28 {strides = array<i32>} : memref<16x32xf32, #tpu.memory_space<vmem>>, vector<1x32xf32>,
    %c5 = arith.constant 5 : index
    %30 = memref.load %arg1[%c5] : memref<16xi32, #tpu.memory_space<smem>>
    %31 = arith.index_cast %30 : i32 to index
    %c0_25 = arith.constant 0 : index
    %32 = vector.load %arg3[%31, %c0_25] : memref<56x32xf32, #tpu.memory_space<vmem>>, vector<1x32xf32>
    %c5_26 = arith.constant 5 : index
    %c0_27 = arith.constant 0 : index
    %33 = vector.load %arg4[%c5_26, %c0_27] : memref<8x32xf32, #tpu.memory_space<vmem>>, vector<1x32xf32>
    %34 = arith.addf %32, %33 : vector<1x32xf32>
    %c5_28 = arith.constant 5 : index
    %c0_29 = arith.constant 0 : index
    %35 = vector.load %arg13[%c5_28, %c0_29] : memref<16x32xf32, #tpu.memory_space<vmem>>, vector<1x32xf32>
    tpu.vector_store %arg13[%c5_28, %c0_29], %34 {strides = array<i32>} : memref<16x32xf32, #tpu.memory_space<vmem>>, vector<1x32xf32>,
    %c6 = arith.constant 6 : index
    %36 = memref.load %arg1[%c6] : memref<16xi32, #tpu.memory_space<smem>>
    %37 = arith.index_cast %36 : i32 to index
    %c0_30 = arith.constant 0 : index
    %38 = vector.load %arg3[%37, %c0_30] : memref<56x32xf32, #tpu.memory_space<vmem>>, vector<1x32xf32>
    %c6_31 = arith.constant 6 : index
    %c0_32 = arith.constant 0 : index
    %39 = vector.load %arg4[%c6_31, %c0_32] : memref<8x32xf32, #tpu.memory_space<vmem>>, vector<1x32xf32>
    %40 = arith.addf %38, %39 : vector<1x32xf32>
    %c6_33 = arith.constant 6 : index
    %c0_34 = arith.constant 0 : index
    %41 = vector.load %arg13[%c6_33, %c0_34] : memref<16x32xf32, #tpu.memory_space<vmem>>, vector<1x32xf32>
    tpu.vector_store %arg13[%c6_33, %c0_34], %40 {strides = array<i32>} : memref<16x32xf32, #tpu.memory_space<vmem>>, vector<1x32xf32>,
    %c7 = arith.constant 7 : index
    %42 = memref.load %arg1[%c7] : memref<16xi32, #tpu.memory_space<smem>>
    %43 = arith.index_cast %42 : i32 to index
    %c0_35 = arith.constant 0 : index
    %44 = vector.load %arg3[%43, %c0_35] : memref<56x32xf32, #tpu.memory_space<vmem>>, vector<1x32xf32>
    %c7_36 = arith.constant 7 : index
    %c0_37 = arith.constant 0 : index
    %45 = vector.load %arg4[%c7_36, %c0_37] : memref<8x32xf32, #tpu.memory_space<vmem>>, vector<1x32xf32>
    %46 = arith.addf %44, %45 : vector<1x32xf32>
    %c7_38 = arith.constant 7 : index
    %c0_39 = arith.constant 0 : index
    %47 = vector.load %arg13[%c7_38, %c0_39] : memref<16x32xf32, #tpu.memory_space<vmem>>, vector<1x32xf32>
    tpu.vector_store %arg13[%c7_38, %c0_39], %46 {strides = array<i32>} : memref<16x32xf32, #tpu.memory_space<vmem>>, vector<1x32xf32>,
    %c8 = arith.constant 8 : index
    %48 = memref.load %arg1[%c8] : memref<16xi32, #tpu.memory_space<smem>>
    %49 = arith.index_cast %48 : i32 to index
    %c0_40 = arith.constant 0 : index
    %50 = vector.load %arg3[%49, %c0_40] : memref<56x32xf32, #tpu.memory_space<vmem>>, vector<1x32xf32>
    %c0_41 = arith.constant 0 : index
    %c0_42 = arith.constant 0 : index
    %51 = vector.load %arg4[%c0_41, %c0_42] : memref<8x32xf32, #tpu.memory_space<vmem>>, vector<1x32xf32>
    %52 = arith.addf %50, %51 : vector<1x32xf32>
    %c8_43 = arith.constant 8 : index
    %c0_44 = arith.constant 0 : index
    %53 = vector.load %arg13[%c8_43, %c0_44] : memref<16x32xf32, #tpu.memory_space<vmem>>, vector<1x32xf32>
    tpu.vector_store %arg13[%c8_43, %c0_44], %52 {strides = array<i32>} : memref<16x32xf32, #tpu.memory_space<vmem>>, vector<1x32xf32>,
    %c9 = arith.constant 9 : index
    %54 = memref.load %arg1[%c9] : memref<16xi32, #tpu.memory_space<smem>>
    %55 = arith.index_cast %54 : i32 to index
    %c0_45 = arith.constant 0 : index
    %56 = vector.load %arg3[%55, %c0_45] : memref<56x32xf32, #tpu.memory_space<vmem>>, vector<1x32xf32>
    %c1_46 = arith.constant 1 : index
    %c0_47 = arith.constant 0 : index
    %57 = vector.load %arg4[%c1_46, %c0_47] : memref<8x32xf32, #tpu.memory_space<vmem>>, vector<1x32xf32>
    %58 = arith.addf %56, %57 : vector<1x32xf32>
    %c9_48 = arith.constant 9 : index
    %c0_49 = arith.constant 0 : index
    %59 = vector.load %arg13[%c9_48, %c0_49] : memref<16x32xf32, #tpu.memory_space<vmem>>, vector<1x32xf32>
    tpu.vector_store %arg13[%c9_48, %c0_49], %58 {strides = array<i32>} : memref<16x32xf32, #tpu.memory_space<vmem>>, vector<1x32xf32>,
    %c10 = arith.constant 10 : index
    %60 = memref.load %arg1[%c10] : memref<16xi32, #tpu.memory_space<smem>>
    %61 = arith.index_cast %60 : i32 to index
    %c0_50 = arith.constant 0 : index
    %62 = vector.load %arg3[%61, %c0_50] : memref<56x32xf32, #tpu.memory_space<vmem>>, vector<1x32xf32>
    %c2_51 = arith.constant 2 : index
    %c0_52 = arith.constant 0 : index
    %63 = vector.load %arg4[%c2_51, %c0_52] : memref<8x32xf32, #tpu.memory_space<vmem>>, vector<1x32xf32>
    %64 = arith.addf %62, %63 : vector<1x32xf32>
    %c10_53 = arith.constant 10 : index
    %c0_54 = arith.constant 0 : index
    %65 = vector.load %arg13[%c10_53, %c0_54] : memref<16x32xf32, #tpu.memory_space<vmem>>, vector<1x32xf32>
    tpu.vector_store %arg13[%c10_53, %c0_54], %64 {strides = array<i32>} : memref<16x32xf32, #tpu.memory_space<vmem>>, vector<1x32xf32>,
    %c11 = arith.constant 11 : index
    %66 = memref.load %arg1[%c11] : memref<16xi32, #tpu.memory_space<smem>>
    %67 = arith.index_cast %66 : i32 to index
    %c0_55 = arith.constant 0 : index
    %68 = vector.load %arg3[%67, %c0_55] : memref<56x32xf32, #tpu.memory_space<vmem>>, vector<1x32xf32>
    %c3_56 = arith.constant 3 : index
    %c0_57 = arith.constant 0 : index
    %69 = vector.load %arg4[%c3_56, %c0_57] : memref<8x32xf32, #tpu.memory_space<vmem>>, vector<1x32xf32>
    %70 = arith.addf %68, %69 : vector<1x32xf32>
    %c11_58 = arith.constant 11 : index
    %c0_59 = arith.constant 0 : index
    %71 = vector.load %arg13[%c11_58, %c0_59] : memref<16x32xf32, #tpu.memory_space<vmem>>, vector<1x32xf32>
    tpu.vector_store %arg13[%c11_58, %c0_59], %70 {strides = array<i32>} : memref<16x32xf32, #tpu.memory_space<vmem>>, vector<1x32xf32>,
    %c12 = arith.constant 12 : index
    %72 = memref.load %arg1[%c12] : memref<16xi32, #tpu.memory_space<smem>>
    %73 = arith.index_cast %72 : i32 to index
    %c0_60 = arith.constant 0 : index
    %74 = vector.load %arg3[%73, %c0_60] : memref<56x32xf32, #tpu.memory_space<vmem>>, vector<1x32xf32>
    %c4_61 = arith.constant 4 : index
    %c0_62 = arith.constant 0 : index
    %75 = vector.load %arg4[%c4_61, %c0_62] : memref<8x32xf32, #tpu.memory_space<vmem>>, vector<1x32xf32>
    %76 = arith.addf %74, %75 : vector<1x32xf32>
    %c12_63 = arith.constant 12 : index
    %c0_64 = arith.constant 0 : index
    %77 = vector.load %arg13[%c12_63, %c0_64] : memref<16x32xf32, #tpu.memory_space<vmem>>, vector<1x32xf32>
    tpu.vector_store %arg13[%c12_63, %c0_64], %76 {strides = array<i32>} : memref<16x32xf32, #tpu.memory_space<vmem>>, vector<1x32xf32>,
    %c13 = arith.constant 13 : index
    %78 = memref.load %arg1[%c13] : memref<16xi32, #tpu.memory_space<smem>>
    %79 = arith.index_cast %78 : i32 to index
    %c0_65 = arith.constant 0 : index
    %80 = vector.load %arg3[%79, %c0_65] : memref<56x32xf32, #tpu.memory_space<vmem>>, vector<1x32xf32>
    %c5_66 = arith.constant 5 : index
    %c0_67 = arith.constant 0 : index
    %81 = vector.load %arg4[%c5_66, %c0_67] : memref<8x32xf32, #tpu.memory_space<vmem>>, vector<1x32xf32>
    %82 = arith.addf %80, %81 : vector<1x32xf32>
    %c13_68 = arith.constant 13 : index
    %c0_69 = arith.constant 0 : index
    %83 = vector.load %arg13[%c13_68, %c0_69] : memref<16x32xf32, #tpu.memory_space<vmem>>, vector<1x32xf32>
    tpu.vector_store %arg13[%c13_68, %c0_69], %82 {strides = array<i32>} : memref<16x32xf32, #tpu.memory_space<vmem>>, vector<1x32xf32>,
    %c14 = arith.constant 14 : index
    %84 = memref.load %arg1[%c14] : memref<16xi32, #tpu.memory_space<smem>>
    %85 = arith.index_cast %84 : i32 to index
    %c0_70 = arith.constant 0 : index
    %86 = vector.load %arg3[%85, %c0_70] : memref<56x32xf32, #tpu.memory_space<vmem>>, vector<1x32xf32>
    %c6_71 = arith.constant 6 : index
    %c0_72 = arith.constant 0 : index
    %87 = vector.load %arg4[%c6_71, %c0_72] : memref<8x32xf32, #tpu.memory_space<vmem>>, vector<1x32xf32>
    %88 = arith.addf %86, %87 : vector<1x32xf32>
    %c14_73 = arith.constant 14 : index
    %c0_74 = arith.constant 0 : index
    %89 = vector.load %arg13[%c14_73, %c0_74] : memref<16x32xf32, #tpu.memory_space<vmem>>, vector<1x32xf32>
    tpu.vector_store %arg13[%c14_73, %c0_74], %88 {strides = array<i32>} : memref<16x32xf32, #tpu.memory_space<vmem>>, vector<1x32xf32>,
    %c15 = arith.constant 15 : index
    %90 = memref.load %arg1[%c15] : memref<16xi32, #tpu.memory_space<smem>>
    %91 = arith.index_cast %90 : i32 to index
    %c0_75 = arith.constant 0 : index
    %92 = vector.load %arg3[%91, %c0_75] : memref<56x32xf32, #tpu.memory_space<vmem>>, vector<1x32xf32>
    %c7_76 = arith.constant 7 : index
    %c0_77 = arith.constant 0 : index
    %93 = vector.load %arg4[%c7_76, %c0_77] : memref<8x32xf32, #tpu.memory_space<vmem>>, vector<1x32xf32>
    %94 = arith.addf %92, %93 : vector<1x32xf32>
    %c15_78 = arith.constant 15 : index
    %c0_79 = arith.constant 0 : index
    %95 = vector.load %arg13[%c15_78, %c0_79] : memref<16x32xf32, #tpu.memory_space<vmem>>, vector<1x32xf32>
    tpu.vector_store %arg13[%c15_78, %c0_79], %94 {strides = array<i32>} : memref<16x32xf32, #tpu.memory_space<vmem>>, vector<1x32xf32>,
    %c0_80 = arith.constant 0 : index
    %c0_81 = arith.constant 0 : index
    %96 = vector.load %arg13[%c0_80, %c0_81] : memref<16x32xf32, #tpu.memory_space<vmem>>, vector<16x32xf32>
    %c0_82 = arith.constant 0 : index
    %c0_83 = arith.constant 0 : index
    %97 = vector.load %arg2[%c0_82, %c0_83] : memref<2x8xf32, #tpu.memory_space<vmem>>, vector<1x8xf32>
    %cst = arith.constant 1.000000e+00 : f32
    %98 = vector.broadcast %cst : f32 to vector<1x8xf32>
    %99 = arith.subf %98, %97 : vector<1x8xf32>
    %cst_84 = arith.constant -1.000000e+09 : f32
    %100 = vector.broadcast %cst_84 : f32 to vector<1x8xf32>
    %101 = arith.mulf %99, %100 : vector<1x8xf32>
    %c1_85 = arith.constant 1 : index
    %c0_86 = arith.constant 0 : index
    %102 = vector.load %arg2[%c1_85, %c0_86] : memref<2x8xf32, #tpu.memory_space<vmem>>, vector<1x8xf32>
    %cst_87 = arith.constant 1.000000e+00 : f32
    %103 = vector.broadcast %cst_87 : f32 to vector<1x8xf32>
    %104 = arith.subf %103, %102 : vector<1x8xf32>
    %cst_88 = arith.constant -1.000000e+09 : f32
    %105 = vector.broadcast %cst_88 : f32 to vector<1x8xf32>
    %106 = arith.mulf %104, %105 : vector<1x8xf32>
    %c0_i32 = arith.constant 0 : i32
    %c0_i32_89 = arith.constant 0 : i32
    %c0_i32_90 = arith.constant 0 : i32
    %107 = tpu.memref_slice %arg9[%c0_i32, %c0_i32_89, %c0_i32_90] : memref<2x8x128xf32, #tpu.memory_space<vmem>> -> memref<1x8x128xf32, #tpu.memory_space<vmem>>
    %108 = tpu.memref_squeeze %107 : memref<1x8x128xf32, #tpu.memory_space<vmem>> -> memref<8x128xf32, #tpu.memory_space<vmem>>
    %c0_91 = arith.constant 0 : index
    %c0_92 = arith.constant 0 : index
    %109 = vector.load %108[%c0_91, %c0_92] : memref<8x128xf32, #tpu.memory_space<vmem>>, vector<1x96xf32>
    %c0_i32_93 = arith.constant 0 : i32
    %c0_i32_94 = arith.constant 0 : i32
    %c0_i32_95 = arith.constant 0 : i32
    %110 = tpu.memref_slice %arg9[%c0_i32_93, %c0_i32_94, %c0_i32_95] : memref<2x8x128xf32, #tpu.memory_space<vmem>> -> memref<1x8x128xf32, #tpu.memory_space<vmem>>
    %111 = tpu.memref_squeeze %110 : memref<1x8x128xf32, #tpu.memory_space<vmem>> -> memref<8x128xf32, #tpu.memory_space<vmem>>
    %c1_96 = arith.constant 1 : index
    %c0_97 = arith.constant 0 : index
    %112 = vector.load %111[%c1_96, %c0_97] : memref<8x128xf32, #tpu.memory_space<vmem>>, vector<1x32xf32>
    %c0_i32_98 = arith.constant 0 : i32
    %c0_i32_99 = arith.constant 0 : i32
    %c0_i32_100 = arith.constant 0 : i32
    %113 = tpu.memref_slice %arg9[%c0_i32_98, %c0_i32_99, %c0_i32_100] : memref<2x8x128xf32, #tpu.memory_space<vmem>> -> memref<1x8x128xf32, #tpu.memory_space<vmem>>
    %114 = tpu.memref_squeeze %113 : memref<1x8x128xf32, #tpu.memory_space<vmem>> -> memref<8x128xf32, #tpu.memory_space<vmem>>
    %c2_101 = arith.constant 2 : index
    %c0_102 = arith.constant 0 : index
    %115 = vector.load %114[%c2_101, %c0_102] : memref<8x128xf32, #tpu.memory_space<vmem>>, vector<1x32xf32>
    %c0_i32_103 = arith.constant 0 : i32
    %c0_i32_104 = arith.constant 0 : i32
    %c0_i32_105 = arith.constant 0 : i32
    %116 = tpu.memref_slice %arg9[%c0_i32_103, %c0_i32_104, %c0_i32_105] : memref<2x8x128xf32, #tpu.memory_space<vmem>> -> memref<1x8x128xf32, #tpu.memory_space<vmem>>
    %117 = tpu.memref_squeeze %116 : memref<1x8x128xf32, #tpu.memory_space<vmem>> -> memref<8x128xf32, #tpu.memory_space<vmem>>
    %c3_106 = arith.constant 3 : index
    %c0_107 = arith.constant 0 : index
    %118 = vector.load %117[%c3_106, %c0_107] : memref<8x128xf32, #tpu.memory_space<vmem>>, vector<1x32xf32>
    %c0_i32_108 = arith.constant 0 : i32
    %c0_i32_109 = arith.constant 0 : i32
    %c0_i32_110 = arith.constant 0 : i32
    %119 = tpu.memref_slice %arg9[%c0_i32_108, %c0_i32_109, %c0_i32_110] : memref<2x8x128xf32, #tpu.memory_space<vmem>> -> memref<1x8x128xf32, #tpu.memory_space<vmem>>
    %120 = tpu.memref_squeeze %119 : memref<1x8x128xf32, #tpu.memory_space<vmem>> -> memref<8x128xf32, #tpu.memory_space<vmem>>
    %c4_111 = arith.constant 4 : index
    %c0_112 = arith.constant 0 : index
    %121 = vector.load %120[%c4_111, %c0_112] : memref<8x128xf32, #tpu.memory_space<vmem>>, vector<1x32xf32>
    %c0_i32_113 = arith.constant 0 : i32
    %c0_i32_114 = arith.constant 0 : i32
    %c0_i32_115 = arith.constant 0 : i32
    %122 = tpu.memref_slice %arg9[%c0_i32_113, %c0_i32_114, %c0_i32_115] : memref<2x8x128xf32, #tpu.memory_space<vmem>> -> memref<1x8x128xf32, #tpu.memory_space<vmem>>
    %123 = tpu.memref_squeeze %122 : memref<1x8x128xf32, #tpu.memory_space<vmem>> -> memref<8x128xf32, #tpu.memory_space<vmem>>
    %c5_116 = arith.constant 5 : index
    %c0_117 = arith.constant 0 : index
    %124 = vector.load %123[%c5_116, %c0_117] : memref<8x128xf32, #tpu.memory_space<vmem>>, vector<1x32xf32>
    %c0_i32_118 = arith.constant 0 : i32
    %c0_i32_119 = arith.constant 0 : i32
    %c0_i32_120 = arith.constant 0 : i32
    %125 = tpu.memref_slice %arg9[%c0_i32_118, %c0_i32_119, %c0_i32_120] : memref<2x8x128xf32, #tpu.memory_space<vmem>> -> memref<1x8x128xf32, #tpu.memory_space<vmem>>
    %126 = tpu.memref_squeeze %125 : memref<1x8x128xf32, #tpu.memory_space<vmem>> -> memref<8x128xf32, #tpu.memory_space<vmem>>
    %c6_121 = arith.constant 6 : index
    %c0_122 = arith.constant 0 : index
    %127 = vector.load %126[%c6_121, %c0_122] : memref<8x128xf32, #tpu.memory_space<vmem>>, vector<1x64xf32>
    %c0_i32_123 = arith.constant 0 : i32
    %c0_i32_124 = arith.constant 0 : i32
    %c0_i32_125 = arith.constant 0 : i32
    %128 = tpu.memref_slice %arg9[%c0_i32_123, %c0_i32_124, %c0_i32_125] : memref<2x8x128xf32, #tpu.memory_space<vmem>> -> memref<1x8x128xf32, #tpu.memory_space<vmem>>
    %129 = tpu.memref_squeeze %128 : memref<1x8x128xf32, #tpu.memory_space<vmem>> -> memref<8x128xf32, #tpu.memory_space<vmem>>
    %c7_126 = arith.constant 7 : index
    %c0_127 = arith.constant 0 : index
    %130 = vector.load %129[%c7_126, %c0_127] : memref<8x128xf32, #tpu.memory_space<vmem>>, vector<1x32xf32>
    %c0_128 = arith.constant 0 : index
    %c0_129 = arith.constant 0 : index
    %c0_130 = arith.constant 0 : index
    %131 = vector.load %arg5[%c0_128, %c0_129, %c0_130] : memref<2x32x96xf32, #tpu.memory_space<vmem>>, vector<1x32x96xf32>
    %132 = vector.shape_cast %131 : vector<1x32x96xf32> to vector<32x96xf32>
    %cst_131 = arith.constant dense<0.000000e+00> : vector<16x96xf32>
    %133 = tpu.matmul %96, %132, %cst_131 {dimension_numbers = #tpu.dot_dimension_numbers<[1], [0], [0], [1], [0, 0, 1, 1], [], []>} : vector<16x32xf32>, vector<32x96xf32>, vector<16x96xf32> -> vector<16x96xf32>
    %134 = vector.broadcast %109 : vector<1x96xf32> to vector<16x96xf32>
    %135 = arith.addf %133, %134 : vector<16x96xf32>
    %136 = vector.extract_strided_slice %135 {offsets = [0, 0], sizes = [8, 96], strides = [1, 1]} : vector<16x96xf32> to vector<8x96xf32>
    %137 = vector.extract_strided_slice %136 {offsets = [0, 0], sizes = [8, 8], strides = [1, 1]} : vector<8x96xf32> to vector<8x8xf32>
    %138 = vector.extract_strided_slice %136 {offsets = [0, 32], sizes = [8, 8], strides = [1, 1]} : vector<8x96xf32> to vector<8x8xf32>
    %139 = vector.extract_strided_slice %136 {offsets = [0, 64], sizes = [8, 8], strides = [1, 1]} : vector<8x96xf32> to vector<8x8xf32>
    %cst_132 = arith.constant dense<0.000000e+00> : vector<8x8xf32>
    %140 = tpu.matmul %137, %138, %cst_132 {dimension_numbers = #tpu.dot_dimension_numbers<[1], [1], [0], [0], [0, 0, 1, 0], [], []>} : vector<8x8xf32>, vector<8x8xf32>, vector<8x8xf32> -> vector<8x8xf32>
    %141 = vector.broadcast %101 : vector<1x8xf32> to vector<8x8xf32>
    %142 = arith.addf %140, %141 : vector<8x8xf32>
    %cst_133 = arith.constant dense<0xFF800000> : vector<8xf32>
    %143 = vector.multi_reduction <maximumf>, %142, %cst_133 [1] : vector<8x8xf32> to vector<8xf32>
    %144 = vector.shape_cast %143 : vector<8xf32> to vector<8x1xf32>
    %145 = vector.broadcast %144 : vector<8x1xf32> to vector<8x8xf32>
    %146 = arith.subf %142, %145 : vector<8x8xf32>
    %147 = math.exp %146 : vector<8x8xf32>
    %cst_134 = arith.constant dense<0.000000e+00> : vector<8xf32>
    %148 = vector.multi_reduction <add>, %147, %cst_134 [1] : vector<8x8xf32> to vector<8xf32>
    %149 = vector.shape_cast %148 : vector<8xf32> to vector<8x1xf32>
    %150 = tpu.reciprocal %149 {approx = true} : vector<8x1xf32> -> vector<8x1xf32>
    %151 = vector.broadcast %150 : vector<8x1xf32> to vector<8x8xf32>
    %152 = arith.mulf %147, %151 : vector<8x8xf32>
    %cst_135 = arith.constant dense<0.000000e+00> : vector<8x8xf32>
    %153 = tpu.matmul %152, %139, %cst_135 {dimension_numbers = #tpu.dot_dimension_numbers<[1], [0], [0], [1], [0, 0, 1, 1], [], []>} : vector<8x8xf32>, vector<8x8xf32>, vector<8x8xf32> -> vector<8x8xf32>
    %c0_i32_136 = arith.constant 0 : i32
    %c0_i32_137 = arith.constant 0 : i32
    %c0_i32_138 = arith.constant 0 : i32
    %154 = tpu.memref_slice %arg6[%c0_i32_136, %c0_i32_137, %c0_i32_138] : memref<2x32x32xf32, #tpu.memory_space<vmem>> -> memref<1x32x32xf32, #tpu.memory_space<vmem>>
    %155 = tpu.memref_squeeze %154 : memref<1x32x32xf32, #tpu.memory_space<vmem>> -> memref<32x32xf32, #tpu.memory_space<vmem>>
    %c0_139 = arith.constant 0 : index
    %c0_140 = arith.constant 0 : index
    %156 = vector.load %155[%c0_139, %c0_140] : memref<32x32xf32, #tpu.memory_space<vmem>>, vector<8x32xf32>
    %cst_141 = arith.constant dense<0.000000e+00> : vector<8x32xf32>
    %157 = tpu.matmul %153, %156, %cst_141 {dimension_numbers = #tpu.dot_dimension_numbers<[1], [0], [0], [1], [0, 0, 1, 1], [], []>} : vector<8x8xf32>, vector<8x32xf32>, vector<8x32xf32> -> vector<8x32xf32>
    %158 = vector.extract_strided_slice %136 {offsets = [0, 8], sizes = [8, 8], strides = [1, 1]} : vector<8x96xf32> to vector<8x8xf32>
    %159 = vector.extract_strided_slice %136 {offsets = [0, 40], sizes = [8, 8], strides = [1, 1]} : vector<8x96xf32> to vector<8x8xf32>
    %160 = vector.extract_strided_slice %136 {offsets = [0, 72], sizes = [8, 8], strides = [1, 1]} : vector<8x96xf32> to vector<8x8xf32>
    %cst_142 = arith.constant dense<0.000000e+00> : vector<8x8xf32>
    %161 = tpu.matmul %158, %159, %cst_142 {dimension_numbers = #tpu.dot_dimension_numbers<[1], [1], [0], [0], [0, 0, 1, 0], [], []>} : vector<8x8xf32>, vector<8x8xf32>, vector<8x8xf32> -> vector<8x8xf32>
    %162 = vector.broadcast %101 : vector<1x8xf32> to vector<8x8xf32>
    %163 = arith.addf %161, %162 : vector<8x8xf32>
    %cst_143 = arith.constant dense<0xFF800000> : vector<8xf32>
    %164 = vector.multi_reduction <maximumf>, %163, %cst_143 [1] : vector<8x8xf32> to vector<8xf32>
    %165 = vector.shape_cast %164 : vector<8xf32> to vector<8x1xf32>
    %166 = vector.broadcast %165 : vector<8x1xf32> to vector<8x8xf32>
    %167 = arith.subf %163, %166 : vector<8x8xf32>
    %168 = math.exp %167 : vector<8x8xf32>
    %cst_144 = arith.constant dense<0.000000e+00> : vector<8xf32>
    %169 = vector.multi_reduction <add>, %168, %cst_144 [1] : vector<8x8xf32> to vector<8xf32>
    %170 = vector.shape_cast %169 : vector<8xf32> to vector<8x1xf32>
    %171 = tpu.reciprocal %170 {approx = true} : vector<8x1xf32> -> vector<8x1xf32>
    %172 = vector.broadcast %171 : vector<8x1xf32> to vector<8x8xf32>
    %173 = arith.mulf %168, %172 : vector<8x8xf32>
    %cst_145 = arith.constant dense<0.000000e+00> : vector<8x8xf32>
    %174 = tpu.matmul %173, %160, %cst_145 {dimension_numbers = #tpu.dot_dimension_numbers<[1], [0], [0], [1], [0, 0, 1, 1], [], []>} : vector<8x8xf32>, vector<8x8xf32>, vector<8x8xf32> -> vector<8x8xf32>
    %c0_i32_146 = arith.constant 0 : i32
    %c0_i32_147 = arith.constant 0 : i32
    %c0_i32_148 = arith.constant 0 : i32
    %175 = tpu.memref_slice %arg6[%c0_i32_146, %c0_i32_147, %c0_i32_148] : memref<2x32x32xf32, #tpu.memory_space<vmem>> -> memref<1x32x32xf32, #tpu.memory_space<vmem>>
    %176 = tpu.memref_squeeze %175 : memref<1x32x32xf32, #tpu.memory_space<vmem>> -> memref<32x32xf32, #tpu.memory_space<vmem>>
    %c8_149 = arith.constant 8 : index
    %c0_150 = arith.constant 0 : index
    %177 = vector.load %176[%c8_149, %c0_150] : memref<32x32xf32, #tpu.memory_space<vmem>>, vector<8x32xf32>
    %cst_151 = arith.constant dense<0.000000e+00> : vector<8x32xf32>
    %178 = tpu.matmul %174, %177, %cst_151 {dimension_numbers = #tpu.dot_dimension_numbers<[1], [0], [0], [1], [0, 0, 1, 1], [], []>} : vector<8x8xf32>, vector<8x32xf32>, vector<8x32xf32> -> vector<8x32xf32>
    %179 = arith.addf %157, %178 : vector<8x32xf32>
    %180 = vector.extract_strided_slice %136 {offsets = [0, 16], sizes = [8, 8], strides = [1, 1]} : vector<8x96xf32> to vector<8x8xf32>
    %181 = vector.extract_strided_slice %136 {offsets = [0, 48], sizes = [8, 8], strides = [1, 1]} : vector<8x96xf32> to vector<8x8xf32>
    %182 = vector.extract_strided_slice %136 {offsets = [0, 80], sizes = [8, 8], strides = [1, 1]} : vector<8x96xf32> to vector<8x8xf32>
    %cst_152 = arith.constant dense<0.000000e+00> : vector<8x8xf32>
    %183 = tpu.matmul %180, %181, %cst_152 {dimension_numbers = #tpu.dot_dimension_numbers<[1], [1], [0], [0], [0, 0, 1, 0], [], []>} : vector<8x8xf32>, vector<8x8xf32>, vector<8x8xf32> -> vector<8x8xf32>
    %184 = vector.broadcast %101 : vector<1x8xf32> to vector<8x8xf32>
    %185 = arith.addf %183, %184 : vector<8x8xf32>
    %cst_153 = arith.constant dense<0xFF800000> : vector<8xf32>
    %186 = vector.multi_reduction <maximumf>, %185, %cst_153 [1] : vector<8x8xf32> to vector<8xf32>
    %187 = vector.shape_cast %186 : vector<8xf32> to vector<8x1xf32>
    %188 = vector.broadcast %187 : vector<8x1xf32> to vector<8x8xf32>
    %189 = arith.subf %185, %188 : vector<8x8xf32>
    %190 = math.exp %189 : vector<8x8xf32>
    %cst_154 = arith.constant dense<0.000000e+00> : vector<8xf32>
    %191 = vector.multi_reduction <add>, %190, %cst_154 [1] : vector<8x8xf32> to vector<8xf32>
    %192 = vector.shape_cast %191 : vector<8xf32> to vector<8x1xf32>
    %193 = tpu.reciprocal %192 {approx = true} : vector<8x1xf32> -> vector<8x1xf32>
    %194 = vector.broadcast %193 : vector<8x1xf32> to vector<8x8xf32>
    %195 = arith.mulf %190, %194 : vector<8x8xf32>
    %cst_155 = arith.constant dense<0.000000e+00> : vector<8x8xf32>
    %196 = tpu.matmul %195, %182, %cst_155 {dimension_numbers = #tpu.dot_dimension_numbers<[1], [0], [0], [1], [0, 0, 1, 1], [], []>} : vector<8x8xf32>, vector<8x8xf32>, vector<8x8xf32> -> vector<8x8xf32>
    %c0_i32_156 = arith.constant 0 : i32
    %c0_i32_157 = arith.constant 0 : i32
    %c0_i32_158 = arith.constant 0 : i32
    %197 = tpu.memref_slice %arg6[%c0_i32_156, %c0_i32_157, %c0_i32_158] : memref<2x32x32xf32, #tpu.memory_space<vmem>> -> memref<1x32x32xf32, #tpu.memory_space<vmem>>
    %198 = tpu.memref_squeeze %197 : memref<1x32x32xf32, #tpu.memory_space<vmem>> -> memref<32x32xf32, #tpu.memory_space<vmem>>
    %c16 = arith.constant 16 : index
    %c0_159 = arith.constant 0 : index
    %199 = vector.load %198[%c16, %c0_159] : memref<32x32xf32, #tpu.memory_space<vmem>>, vector<8x32xf32>
    %cst_160 = arith.constant dense<0.000000e+00> : vector<8x32xf32>
    %200 = tpu.matmul %196, %199, %cst_160 {dimension_numbers = #tpu.dot_dimension_numbers<[1], [0], [0], [1], [0, 0, 1, 1], [], []>} : vector<8x8xf32>, vector<8x32xf32>, vector<8x32xf32> -> vector<8x32xf32>
    %201 = arith.addf %179, %200 : vector<8x32xf32>
    %202 = vector.extract_strided_slice %136 {offsets = [0, 24], sizes = [8, 8], strides = [1, 1]} : vector<8x96xf32> to vector<8x8xf32>
    %203 = vector.extract_strided_slice %136 {offsets = [0, 56], sizes = [8, 8], strides = [1, 1]} : vector<8x96xf32> to vector<8x8xf32>
    %204 = vector.extract_strided_slice %136 {offsets = [0, 88], sizes = [8, 8], strides = [1, 1]} : vector<8x96xf32> to vector<8x8xf32>
    %cst_161 = arith.constant dense<0.000000e+00> : vector<8x8xf32>
    %205 = tpu.matmul %202, %203, %cst_161 {dimension_numbers = #tpu.dot_dimension_numbers<[1], [1], [0], [0], [0, 0, 1, 0], [], []>} : vector<8x8xf32>, vector<8x8xf32>, vector<8x8xf32> -> vector<8x8xf32>
    %206 = vector.broadcast %101 : vector<1x8xf32> to vector<8x8xf32>
    %207 = arith.addf %205, %206 : vector<8x8xf32>
    %cst_162 = arith.constant dense<0xFF800000> : vector<8xf32>
    %208 = vector.multi_reduction <maximumf>, %207, %cst_162 [1] : vector<8x8xf32> to vector<8xf32>
    %209 = vector.shape_cast %208 : vector<8xf32> to vector<8x1xf32>
    %210 = vector.broadcast %209 : vector<8x1xf32> to vector<8x8xf32>
    %211 = arith.subf %207, %210 : vector<8x8xf32>
    %212 = math.exp %211 : vector<8x8xf32>
    %cst_163 = arith.constant dense<0.000000e+00> : vector<8xf32>
    %213 = vector.multi_reduction <add>, %212, %cst_163 [1] : vector<8x8xf32> to vector<8xf32>
    %214 = vector.shape_cast %213 : vector<8xf32> to vector<8x1xf32>
    %215 = tpu.reciprocal %214 {approx = true} : vector<8x1xf32> -> vector<8x1xf32>
    %216 = vector.broadcast %215 : vector<8x1xf32> to vector<8x8xf32>
    %217 = arith.mulf %212, %216 : vector<8x8xf32>
    %cst_164 = arith.constant dense<0.000000e+00> : vector<8x8xf32>
    %218 = tpu.matmul %217, %204, %cst_164 {dimension_numbers = #tpu.dot_dimension_numbers<[1], [0], [0], [1], [0, 0, 1, 1], [], []>} : vector<8x8xf32>, vector<8x8xf32>, vector<8x8xf32> -> vector<8x8xf32>
    %c0_i32_165 = arith.constant 0 : i32
    %c0_i32_166 = arith.constant 0 : i32
    %c0_i32_167 = arith.constant 0 : i32
    %219 = tpu.memref_slice %arg6[%c0_i32_165, %c0_i32_166, %c0_i32_167] : memref<2x32x32xf32, #tpu.memory_space<vmem>> -> memref<1x32x32xf32, #tpu.memory_space<vmem>>
    %220 = tpu.memref_squeeze %219 : memref<1x32x32xf32, #tpu.memory_space<vmem>> -> memref<32x32xf32, #tpu.memory_space<vmem>>
    %c24 = arith.constant 24 : index
    %c0_168 = arith.constant 0 : index
    %221 = vector.load %220[%c24, %c0_168] : memref<32x32xf32, #tpu.memory_space<vmem>>, vector<8x32xf32>
    %cst_169 = arith.constant dense<0.000000e+00> : vector<8x32xf32>
    %222 = tpu.matmul %218, %221, %cst_169 {dimension_numbers = #tpu.dot_dimension_numbers<[1], [0], [0], [1], [0, 0, 1, 1], [], []>} : vector<8x8xf32>, vector<8x32xf32>, vector<8x32xf32> -> vector<8x32xf32>
    %223 = arith.addf %201, %222 : vector<8x32xf32>
    %224 = vector.extract_strided_slice %135 {offsets = [8, 0], sizes = [8, 96], strides = [1, 1]} : vector<16x96xf32> to vector<8x96xf32>
    %225 = vector.extract_strided_slice %224 {offsets = [0, 0], sizes = [8, 8], strides = [1, 1]} : vector<8x96xf32> to vector<8x8xf32>
    %226 = vector.extract_strided_slice %224 {offsets = [0, 32], sizes = [8, 8], strides = [1, 1]} : vector<8x96xf32> to vector<8x8xf32>
    %227 = vector.extract_strided_slice %224 {offsets = [0, 64], sizes = [8, 8], strides = [1, 1]} : vector<8x96xf32> to vector<8x8xf32>
    %cst_170 = arith.constant dense<0.000000e+00> : vector<8x8xf32>
    %228 = tpu.matmul %225, %226, %cst_170 {dimension_numbers = #tpu.dot_dimension_numbers<[1], [1], [0], [0], [0, 0, 1, 0], [], []>} : vector<8x8xf32>, vector<8x8xf32>, vector<8x8xf32> -> vector<8x8xf32>
    %229 = vector.broadcast %106 : vector<1x8xf32> to vector<8x8xf32>
    %230 = arith.addf %228, %229 : vector<8x8xf32>
    %cst_171 = arith.constant dense<0xFF800000> : vector<8xf32>
    %231 = vector.multi_reduction <maximumf>, %230, %cst_171 [1] : vector<8x8xf32> to vector<8xf32>
    %232 = vector.shape_cast %231 : vector<8xf32> to vector<8x1xf32>
    %233 = vector.broadcast %232 : vector<8x1xf32> to vector<8x8xf32>
    %234 = arith.subf %230, %233 : vector<8x8xf32>
    %235 = math.exp %234 : vector<8x8xf32>
    %cst_172 = arith.constant dense<0.000000e+00> : vector<8xf32>
    %236 = vector.multi_reduction <add>, %235, %cst_172 [1] : vector<8x8xf32> to vector<8xf32>
    %237 = vector.shape_cast %236 : vector<8xf32> to vector<8x1xf32>
    %238 = tpu.reciprocal %237 {approx = true} : vector<8x1xf32> -> vector<8x1xf32>
    %239 = vector.broadcast %238 : vector<8x1xf32> to vector<8x8xf32>
    %240 = arith.mulf %235, %239 : vector<8x8xf32>
    %cst_173 = arith.constant dense<0.000000e+00> : vector<8x8xf32>
    %241 = tpu.matmul %240, %227, %cst_173 {dimension_numbers = #tpu.dot_dimension_numbers<[1], [0], [0], [1], [0, 0, 1, 1], [], []>} : vector<8x8xf32>, vector<8x8xf32>, vector<8x8xf32> -> vector<8x8xf32>
    %c0_i32_174 = arith.constant 0 : i32
    %c0_i32_175 = arith.constant 0 : i32
    %c0_i32_176 = arith.constant 0 : i32
    %242 = tpu.memref_slice %arg6[%c0_i32_174, %c0_i32_175, %c0_i32_176] : memref<2x32x32xf32, #tpu.memory_space<vmem>> -> memref<1x32x32xf32, #tpu.memory_space<vmem>>
    %243 = tpu.memref_squeeze %242 : memref<1x32x32xf32, #tpu.memory_space<vmem>> -> memref<32x32xf32, #tpu.memory_space<vmem>>
    %c0_177 = arith.constant 0 : index
    %c0_178 = arith.constant 0 : index
    %244 = vector.load %243[%c0_177, %c0_178] : memref<32x32xf32, #tpu.memory_space<vmem>>, vector<8x32xf32>
    %cst_179 = arith.constant dense<0.000000e+00> : vector<8x32xf32>
    %245 = tpu.matmul %241, %244, %cst_179 {dimension_numbers = #tpu.dot_dimension_numbers<[1], [0], [0], [1], [0, 0, 1, 1], [], []>} : vector<8x8xf32>, vector<8x32xf32>, vector<8x32xf32> -> vector<8x32xf32>
    %246 = vector.extract_strided_slice %224 {offsets = [0, 8], sizes = [8, 8], strides = [1, 1]} : vector<8x96xf32> to vector<8x8xf32>
    %247 = vector.extract_strided_slice %224 {offsets = [0, 40], sizes = [8, 8], strides = [1, 1]} : vector<8x96xf32> to vector<8x8xf32>
    %248 = vector.extract_strided_slice %224 {offsets = [0, 72], sizes = [8, 8], strides = [1, 1]} : vector<8x96xf32> to vector<8x8xf32>
    %cst_180 = arith.constant dense<0.000000e+00> : vector<8x8xf32>
    %249 = tpu.matmul %246, %247, %cst_180 {dimension_numbers = #tpu.dot_dimension_numbers<[1], [1], [0], [0], [0, 0, 1, 0], [], []>} : vector<8x8xf32>, vector<8x8xf32>, vector<8x8xf32> -> vector<8x8xf32>
    %250 = vector.broadcast %106 : vector<1x8xf32> to vector<8x8xf32>
    %251 = arith.addf %249, %250 : vector<8x8xf32>
    %cst_181 = arith.constant dense<0xFF800000> : vector<8xf32>
    %252 = vector.multi_reduction <maximumf>, %251, %cst_181 [1] : vector<8x8xf32> to vector<8xf32>
    %253 = vector.shape_cast %252 : vector<8xf32> to vector<8x1xf32>
    %254 = vector.broadcast %253 : vector<8x1xf32> to vector<8x8xf32>
    %255 = arith.subf %251, %254 : vector<8x8xf32>
    %256 = math.exp %255 : vector<8x8xf32>
    %cst_182 = arith.constant dense<0.000000e+00> : vector<8xf32>
    %257 = vector.multi_reduction <add>, %256, %cst_182 [1] : vector<8x8xf32> to vector<8xf32>
    %258 = vector.shape_cast %257 : vector<8xf32> to vector<8x1xf32>
    %259 = tpu.reciprocal %258 {approx = true} : vector<8x1xf32> -> vector<8x1xf32>
    %260 = vector.broadcast %259 : vector<8x1xf32> to vector<8x8xf32>
    %261 = arith.mulf %256, %260 : vector<8x8xf32>
    %cst_183 = arith.constant dense<0.000000e+00> : vector<8x8xf32>
    %262 = tpu.matmul %261, %248, %cst_183 {dimension_numbers = #tpu.dot_dimension_numbers<[1], [0], [0], [1], [0, 0, 1, 1], [], []>} : vector<8x8xf32>, vector<8x8xf32>, vector<8x8xf32> -> vector<8x8xf32>
    %c0_i32_184 = arith.constant 0 : i32
    %c0_i32_185 = arith.constant 0 : i32
    %c0_i32_186 = arith.constant 0 : i32
    %263 = tpu.memref_slice %arg6[%c0_i32_184, %c0_i32_185, %c0_i32_186] : memref<2x32x32xf32, #tpu.memory_space<vmem>> -> memref<1x32x32xf32, #tpu.memory_space<vmem>>
    %264 = tpu.memref_squeeze %263 : memref<1x32x32xf32, #tpu.memory_space<vmem>> -> memref<32x32xf32, #tpu.memory_space<vmem>>
    %c8_187 = arith.constant 8 : index
    %c0_188 = arith.constant 0 : index
    %265 = vector.load %264[%c8_187, %c0_188] : memref<32x32xf32, #tpu.memory_space<vmem>>, vector<8x32xf32>
    %cst_189 = arith.constant dense<0.000000e+00> : vector<8x32xf32>
    %266 = tpu.matmul %262, %265, %cst_189 {dimension_numbers = #tpu.dot_dimension_numbers<[1], [0], [0], [1], [0, 0, 1, 1], [], []>} : vector<8x8xf32>, vector<8x32xf32>, vector<8x32xf32> -> vector<8x32xf32>
    %267 = arith.addf %245, %266 : vector<8x32xf32>
    %268 = vector.extract_strided_slice %224 {offsets = [0, 16], sizes = [8, 8], strides = [1, 1]} : vector<8x96xf32> to vector<8x8xf32>
    %269 = vector.extract_strided_slice %224 {offsets = [0, 48], sizes = [8, 8], strides = [1, 1]} : vector<8x96xf32> to vector<8x8xf32>
    %270 = vector.extract_strided_slice %224 {offsets = [0, 80], sizes = [8, 8], strides = [1, 1]} : vector<8x96xf32> to vector<8x8xf32>
    %cst_190 = arith.constant dense<0.000000e+00> : vector<8x8xf32>
    %271 = tpu.matmul %268, %269, %cst_190 {dimension_numbers = #tpu.dot_dimension_numbers<[1], [1], [0], [0], [0, 0, 1, 0], [], []>} : vector<8x8xf32>, vector<8x8xf32>, vector<8x8xf32> -> vector<8x8xf32>
    %272 = vector.broadcast %106 : vector<1x8xf32> to vector<8x8xf32>
    %273 = arith.addf %271, %272 : vector<8x8xf32>
    %cst_191 = arith.constant dense<0xFF800000> : vector<8xf32>
    %274 = vector.multi_reduction <maximumf>, %273, %cst_191 [1] : vector<8x8xf32> to vector<8xf32>
    %275 = vector.shape_cast %274 : vector<8xf32> to vector<8x1xf32>
    %276 = vector.broadcast %275 : vector<8x1xf32> to vector<8x8xf32>
    %277 = arith.subf %273, %276 : vector<8x8xf32>
    %278 = math.exp %277 : vector<8x8xf32>
    %cst_192 = arith.constant dense<0.000000e+00> : vector<8xf32>
    %279 = vector.multi_reduction <add>, %278, %cst_192 [1] : vector<8x8xf32> to vector<8xf32>
    %280 = vector.shape_cast %279 : vector<8xf32> to vector<8x1xf32>
    %281 = tpu.reciprocal %280 {approx = true} : vector<8x1xf32> -> vector<8x1xf32>
    %282 = vector.broadcast %281 : vector<8x1xf32> to vector<8x8xf32>
    %283 = arith.mulf %278, %282 : vector<8x8xf32>
    %cst_193 = arith.constant dense<0.000000e+00> : vector<8x8xf32>
    %284 = tpu.matmul %283, %270, %cst_193 {dimension_numbers = #tpu.dot_dimension_numbers<[1], [0], [0], [1], [0, 0, 1, 1], [], []>} : vector<8x8xf32>, vector<8x8xf32>, vector<8x8xf32> -> vector<8x8xf32>
    %c0_i32_194 = arith.constant 0 : i32
    %c0_i32_195 = arith.constant 0 : i32
    %c0_i32_196 = arith.constant 0 : i32
    %285 = tpu.memref_slice %arg6[%c0_i32_194, %c0_i32_195, %c0_i32_196] : memref<2x32x32xf32, #tpu.memory_space<vmem>> -> memref<1x32x32xf32, #tpu.memory_space<vmem>>
    %286 = tpu.memref_squeeze %285 : memref<1x32x32xf32, #tpu.memory_space<vmem>> -> memref<32x32xf32, #tpu.memory_space<vmem>>
    %c16_197 = arith.constant 16 : index
    %c0_198 = arith.constant 0 : index
    %287 = vector.load %286[%c16_197, %c0_198] : memref<32x32xf32, #tpu.memory_space<vmem>>, vector<8x32xf32>
    %cst_199 = arith.constant dense<0.000000e+00> : vector<8x32xf32>
    %288 = tpu.matmul %284, %287, %cst_199 {dimension_numbers = #tpu.dot_dimension_numbers<[1], [0], [0], [1], [0, 0, 1, 1], [], []>} : vector<8x8xf32>, vector<8x32xf32>, vector<8x32xf32> -> vector<8x32xf32>
    %289 = arith.addf %267, %288 : vector<8x32xf32>
    %290 = vector.extract_strided_slice %224 {offsets = [0, 24], sizes = [8, 8], strides = [1, 1]} : vector<8x96xf32> to vector<8x8xf32>
    %291 = vector.extract_strided_slice %224 {offsets = [0, 56], sizes = [8, 8], strides = [1, 1]} : vector<8x96xf32> to vector<8x8xf32>
    %292 = vector.extract_strided_slice %224 {offsets = [0, 88], sizes = [8, 8], strides = [1, 1]} : vector<8x96xf32> to vector<8x8xf32>
    %cst_200 = arith.constant dense<0.000000e+00> : vector<8x8xf32>
    %293 = tpu.matmul %290, %291, %cst_200 {dimension_numbers = #tpu.dot_dimension_numbers<[1], [1], [0], [0], [0, 0, 1, 0], [], []>} : vector<8x8xf32>, vector<8x8xf32>, vector<8x8xf32> -> vector<8x8xf32>
    %294 = vector.broadcast %106 : vector<1x8xf32> to vector<8x8xf32>
    %295 = arith.addf %293, %294 : vector<8x8xf32>
    %cst_201 = arith.constant dense<0xFF800000> : vector<8xf32>
    %296 = vector.multi_reduction <maximumf>, %295, %cst_201 [1] : vector<8x8xf32> to vector<8xf32>
    %297 = vector.shape_cast %296 : vector<8xf32> to vector<8x1xf32>
    %298 = vector.broadcast %297 : vector<8x1xf32> to vector<8x8xf32>
    %299 = arith.subf %295, %298 : vector<8x8xf32>
    %300 = math.exp %299 : vector<8x8xf32>
    %cst_202 = arith.constant dense<0.000000e+00> : vector<8xf32>
    %301 = vector.multi_reduction <add>, %300, %cst_202 [1] : vector<8x8xf32> to vector<8xf32>
    %302 = vector.shape_cast %301 : vector<8xf32> to vector<8x1xf32>
    %303 = tpu.reciprocal %302 {approx = true} : vector<8x1xf32> -> vector<8x1xf32>
    %304 = vector.broadcast %303 : vector<8x1xf32> to vector<8x8xf32>
    %305 = arith.mulf %300, %304 : vector<8x8xf32>
    %cst_203 = arith.constant dense<0.000000e+00> : vector<8x8xf32>
    %306 = tpu.matmul %305, %292, %cst_203 {dimension_numbers = #tpu.dot_dimension_numbers<[1], [0], [0], [1], [0, 0, 1, 1], [], []>} : vector<8x8xf32>, vector<8x8xf32>, vector<8x8xf32> -> vector<8x8xf32>
    %c0_i32_204 = arith.constant 0 : i32
    %c0_i32_205 = arith.constant 0 : i32
    %c0_i32_206 = arith.constant 0 : i32
    %307 = tpu.memref_slice %arg6[%c0_i32_204, %c0_i32_205, %c0_i32_206] : memref<2x32x32xf32, #tpu.memory_space<vmem>> -> memref<1x32x32xf32, #tpu.memory_space<vmem>>
    %308 = tpu.memref_squeeze %307 : memref<1x32x32xf32, #tpu.memory_space<vmem>> -> memref<32x32xf32, #tpu.memory_space<vmem>>
    %c24_207 = arith.constant 24 : index
    %c0_208 = arith.constant 0 : index
    %309 = vector.load %308[%c24_207, %c0_208] : memref<32x32xf32, #tpu.memory_space<vmem>>, vector<8x32xf32>
    %cst_209 = arith.constant dense<0.000000e+00> : vector<8x32xf32>
    %310 = tpu.matmul %306, %309, %cst_209 {dimension_numbers = #tpu.dot_dimension_numbers<[1], [0], [0], [1], [0, 0, 1, 1], [], []>} : vector<8x8xf32>, vector<8x32xf32>, vector<8x32xf32> -> vector<8x32xf32>
    %311 = arith.addf %289, %310 : vector<8x32xf32>
    %312 = tpu.concatenate %223, %311 in 0 : vector<8x32xf32>, vector<8x32xf32> -> vector<16x32xf32>
    %313 = vector.broadcast %112 : vector<1x32xf32> to vector<16x32xf32>
    %314 = arith.addf %312, %313 : vector<16x32xf32>
    %315 = arith.addf %96, %314 : vector<16x32xf32>
    %cst_210 = arith.constant dense<0.000000e+00> : vector<16xf32>
    %316 = vector.multi_reduction <add>, %315, %cst_210 [1] : vector<16x32xf32> to vector<16xf32>
    %317 = vector.shape_cast %316 : vector<16xf32> to vector<16x1xf32>
    %cst_211 = arith.constant 3.200000e+01 : f32
    %318 = vector.broadcast %cst_211 : f32 to vector<16x1xf32>
    %319 = arith.divf %317, %318 : vector<16x1xf32>
    %320 = vector.broadcast %319 : vector<16x1xf32> to vector<16x32xf32>
    %321 = arith.subf %315, %320 : vector<16x32xf32>
    %322 = arith.mulf %321, %321 : vector<16x32xf32>
    %cst_212 = arith.constant dense<0.000000e+00> : vector<16xf32>
    %323 = vector.multi_reduction <add>, %322, %cst_212 [1] : vector<16x32xf32> to vector<16xf32>
    %324 = vector.shape_cast %323 : vector<16xf32> to vector<16x1xf32>
    %cst_213 = arith.constant 3.200000e+01 : f32
    %325 = vector.broadcast %cst_213 : f32 to vector<16x1xf32>
    %326 = arith.divf %324, %325 : vector<16x1xf32>
    %327 = vector.broadcast %319 : vector<16x1xf32> to vector<16x32xf32>
    %328 = arith.subf %315, %327 : vector<16x32xf32>
    %cst_214 = arith.constant 9.99999996E-13 : f32
    %329 = vector.broadcast %cst_214 : f32 to vector<16x1xf32>
    %330 = arith.addf %326, %329 : vector<16x1xf32>
    %331 = math.rsqrt %330 : vector<16x1xf32>
    %332 = vector.broadcast %331 : vector<16x1xf32> to vector<16x32xf32>
    %333 = arith.mulf %328, %332 : vector<16x32xf32>
    %334 = vector.broadcast %115 : vector<1x32xf32> to vector<16x32xf32>
    %335 = arith.mulf %333, %334 : vector<16x32xf32>
    %336 = vector.broadcast %118 : vector<1x32xf32> to vector<16x32xf32>
    %337 = arith.addf %335, %336 : vector<16x32xf32>
    %c0_215 = arith.constant 0 : index
    %c0_216 = arith.constant 0 : index
    %c0_217 = arith.constant 0 : index
    %338 = vector.load %arg7[%c0_215, %c0_216, %c0_217] : memref<2x32x64xf32, #tpu.memory_space<vmem>>, vector<1x32x64xf32>
    %339 = vector.shape_cast %338 : vector<1x32x64xf32> to vector<32x64xf32>
    %c0_218 = arith.constant 0 : index
    %c0_219 = arith.constant 0 : index
    %c0_220 = arith.constant 0 : index
    %340 = vector.load %arg8[%c0_218, %c0_219, %c0_220] : memref<2x64x32xf32, #tpu.memory_space<vmem>>, vector<1x64x32xf32>
    %341 = vector.shape_cast %340 : vector<1x64x32xf32> to vector<64x32xf32>
    %cst_221 = arith.constant dense<0.000000e+00> : vector<16x64xf32>
    %342 = tpu.matmul %337, %339, %cst_221 {dimension_numbers = #tpu.dot_dimension_numbers<[1], [0], [0], [1], [0, 0, 1, 1], [], []>} : vector<16x32xf32>, vector<32x64xf32>, vector<16x64xf32> -> vector<16x64xf32>
    %343 = vector.broadcast %127 : vector<1x64xf32> to vector<16x64xf32>
    %344 = arith.addf %342, %343 : vector<16x64xf32>
    %345 = arith.mulf %344, %344 : vector<16x64xf32>
    %346 = arith.mulf %344, %345 : vector<16x64xf32>
    %cst_222 = arith.constant 4.471500e-02 : f32
    %347 = vector.broadcast %cst_222 : f32 to vector<16x64xf32>
    %348 = arith.mulf %347, %346 : vector<16x64xf32>
    %349 = arith.addf %344, %348 : vector<16x64xf32>
    %cst_223 = arith.constant 0.797884583 : f32
    %350 = vector.broadcast %cst_223 : f32 to vector<16x64xf32>
    %351 = arith.mulf %350, %349 : vector<16x64xf32>
    %352 = math.tanh %351 : vector<16x64xf32>
    %cst_224 = arith.constant 1.000000e+00 : f32
    %353 = vector.broadcast %cst_224 : f32 to vector<16x64xf32>
    %354 = arith.addf %353, %352 : vector<16x64xf32>
    %cst_225 = arith.constant 5.000000e-01 : f32
    %355 = vector.broadcast %cst_225 : f32 to vector<16x64xf32>
    %356 = arith.mulf %355, %354 : vector<16x64xf32>
    %357 = arith.mulf %344, %356 : vector<16x64xf32>
    %cst_226 = arith.constant dense<0.000000e+00> : vector<16x32xf32>
    %358 = tpu.matmul %357, %341, %cst_226 {dimension_numbers = #tpu.dot_dimension_numbers<[1], [0], [0], [1], [0, 0, 1, 1], [], []>} : vector<16x64xf32>, vector<64x32xf32>, vector<16x32xf32> -> vector<16x32xf32>
    %359 = vector.broadcast %130 : vector<1x32xf32> to vector<16x32xf32>
    %360 = arith.addf %358, %359 : vector<16x32xf32>
    %361 = arith.addf %337, %360 : vector<16x32xf32>
    %cst_227 = arith.constant dense<0.000000e+00> : vector<16xf32>
    %362 = vector.multi_reduction <add>, %361, %cst_227 [1] : vector<16x32xf32> to vector<16xf32>
    %363 = vector.shape_cast %362 : vector<16xf32> to vector<16x1xf32>
    %cst_228 = arith.constant 3.200000e+01 : f32
    %364 = vector.broadcast %cst_228 : f32 to vector<16x1xf32>
    %365 = arith.divf %363, %364 : vector<16x1xf32>
    %366 = vector.broadcast %365 : vector<16x1xf32> to vector<16x32xf32>
    %367 = arith.subf %361, %366 : vector<16x32xf32>
    %368 = arith.mulf %367, %367 : vector<16x32xf32>
    %cst_229 = arith.constant dense<0.000000e+00> : vector<16xf32>
    %369 = vector.multi_reduction <add>, %368, %cst_229 [1] : vector<16x32xf32> to vector<16xf32>
    %370 = vector.shape_cast %369 : vector<16xf32> to vector<16x1xf32>
    %cst_230 = arith.constant 3.200000e+01 : f32
    %371 = vector.broadcast %cst_230 : f32 to vector<16x1xf32>
    %372 = arith.divf %370, %371 : vector<16x1xf32>
    %373 = vector.broadcast %365 : vector<16x1xf32> to vector<16x32xf32>
    %374 = arith.subf %361, %373 : vector<16x32xf32>
    %cst_231 = arith.constant 9.99999996E-13 : f32
    %375 = vector.broadcast %cst_231 : f32 to vector<16x1xf32>
    %376 = arith.addf %372, %375 : vector<16x1xf32>
    %377 = math.rsqrt %376 : vector<16x1xf32>
    %378 = vector.broadcast %377 : vector<16x1xf32> to vector<16x32xf32>
    %379 = arith.mulf %374, %378 : vector<16x32xf32>
    %380 = vector.broadcast %121 : vector<1x32xf32> to vector<16x32xf32>
    %381 = arith.mulf %379, %380 : vector<16x32xf32>
    %382 = vector.broadcast %124 : vector<1x32xf32> to vector<16x32xf32>
    %383 = arith.addf %381, %382 : vector<16x32xf32>
    %c1_i32 = arith.constant 1 : i32
    %c0_i32_232 = arith.constant 0 : i32
    %c0_i32_233 = arith.constant 0 : i32
    %384 = tpu.memref_slice %arg9[%c1_i32, %c0_i32_232, %c0_i32_233] : memref<2x8x128xf32, #tpu.memory_space<vmem>> -> memref<1x8x128xf32, #tpu.memory_space<vmem>>
    %385 = tpu.memref_squeeze %384 : memref<1x8x128xf32, #tpu.memory_space<vmem>> -> memref<8x128xf32, #tpu.memory_space<vmem>>
    %c0_234 = arith.constant 0 : index
    %c0_235 = arith.constant 0 : index
    %386 = vector.load %385[%c0_234, %c0_235] : memref<8x128xf32, #tpu.memory_space<vmem>>, vector<1x96xf32>
    %c1_i32_236 = arith.constant 1 : i32
    %c0_i32_237 = arith.constant 0 : i32
    %c0_i32_238 = arith.constant 0 : i32
    %387 = tpu.memref_slice %arg9[%c1_i32_236, %c0_i32_237, %c0_i32_238] : memref<2x8x128xf32, #tpu.memory_space<vmem>> -> memref<1x8x128xf32, #tpu.memory_space<vmem>>
    %388 = tpu.memref_squeeze %387 : memref<1x8x128xf32, #tpu.memory_space<vmem>> -> memref<8x128xf32, #tpu.memory_space<vmem>>
    %c1_239 = arith.constant 1 : index
    %c0_240 = arith.constant 0 : index
    %389 = vector.load %388[%c1_239, %c0_240] : memref<8x128xf32, #tpu.memory_space<vmem>>, vector<1x32xf32>
    %c1_i32_241 = arith.constant 1 : i32
    %c0_i32_242 = arith.constant 0 : i32
    %c0_i32_243 = arith.constant 0 : i32
    %390 = tpu.memref_slice %arg9[%c1_i32_241, %c0_i32_242, %c0_i32_243] : memref<2x8x128xf32, #tpu.memory_space<vmem>> -> memref<1x8x128xf32, #tpu.memory_space<vmem>>
    %391 = tpu.memref_squeeze %390 : memref<1x8x128xf32, #tpu.memory_space<vmem>> -> memref<8x128xf32, #tpu.memory_space<vmem>>
    %c2_244 = arith.constant 2 : index
    %c0_245 = arith.constant 0 : index
    %392 = vector.load %391[%c2_244, %c0_245] : memref<8x128xf32, #tpu.memory_space<vmem>>, vector<1x32xf32>
    %c1_i32_246 = arith.constant 1 : i32
    %c0_i32_247 = arith.constant 0 : i32
    %c0_i32_248 = arith.constant 0 : i32
    %393 = tpu.memref_slice %arg9[%c1_i32_246, %c0_i32_247, %c0_i32_248] : memref<2x8x128xf32, #tpu.memory_space<vmem>> -> memref<1x8x128xf32, #tpu.memory_space<vmem>>
    %394 = tpu.memref_squeeze %393 : memref<1x8x128xf32, #tpu.memory_space<vmem>> -> memref<8x128xf32, #tpu.memory_space<vmem>>
    %c3_249 = arith.constant 3 : index
    %c0_250 = arith.constant 0 : index
    %395 = vector.load %394[%c3_249, %c0_250] : memref<8x128xf32, #tpu.memory_space<vmem>>, vector<1x32xf32>
    %c1_i32_251 = arith.constant 1 : i32
    %c0_i32_252 = arith.constant 0 : i32
    %c0_i32_253 = arith.constant 0 : i32
    %396 = tpu.memref_slice %arg9[%c1_i32_251, %c0_i32_252, %c0_i32_253] : memref<2x8x128xf32, #tpu.memory_space<vmem>> -> memref<1x8x128xf32, #tpu.memory_space<vmem>>
    %397 = tpu.memref_squeeze %396 : memref<1x8x128xf32, #tpu.memory_space<vmem>> -> memref<8x128xf32, #tpu.memory_space<vmem>>
    %c4_254 = arith.constant 4 : index
    %c0_255 = arith.constant 0 : index
    %398 = vector.load %397[%c4_254, %c0_255] : memref<8x128xf32, #tpu.memory_space<vmem>>, vector<1x32xf32>
    %c1_i32_256 = arith.constant 1 : i32
    %c0_i32_257 = arith.constant 0 : i32
    %c0_i32_258 = arith.constant 0 : i32
    %399 = tpu.memref_slice %arg9[%c1_i32_256, %c0_i32_257, %c0_i32_258] : memref<2x8x128xf32, #tpu.memory_space<vmem>> -> memref<1x8x128xf32, #tpu.memory_space<vmem>>
    %400 = tpu.memref_squeeze %399 : memref<1x8x128xf32, #tpu.memory_space<vmem>> -> memref<8x128xf32, #tpu.memory_space<vmem>>
    %c5_259 = arith.constant 5 : index
    %c0_260 = arith.constant 0 : index
    %401 = vector.load %400[%c5_259, %c0_260] : memref<8x128xf32, #tpu.memory_space<vmem>>, vector<1x32xf32>
    %c1_i32_261 = arith.constant 1 : i32
    %c0_i32_262 = arith.constant 0 : i32
    %c0_i32_263 = arith.constant 0 : i32
    %402 = tpu.memref_slice %arg9[%c1_i32_261, %c0_i32_262, %c0_i32_263] : memref<2x8x128xf32, #tpu.memory_space<vmem>> -> memref<1x8x128xf32, #tpu.memory_space<vmem>>
    %403 = tpu.memref_squeeze %402 : memref<1x8x128xf32, #tpu.memory_space<vmem>> -> memref<8x128xf32, #tpu.memory_space<vmem>>
    %c6_264 = arith.constant 6 : index
    %c0_265 = arith.constant 0 : index
    %404 = vector.load %403[%c6_264, %c0_265] : memref<8x128xf32, #tpu.memory_space<vmem>>, vector<1x64xf32>
    %c1_i32_266 = arith.constant 1 : i32
    %c0_i32_267 = arith.constant 0 : i32
    %c0_i32_268 = arith.constant 0 : i32
    %405 = tpu.memref_slice %arg9[%c1_i32_266, %c0_i32_267, %c0_i32_268] : memref<2x8x128xf32, #tpu.memory_space<vmem>> -> memref<1x8x128xf32, #tpu.memory_space<vmem>>
    %406 = tpu.memref_squeeze %405 : memref<1x8x128xf32, #tpu.memory_space<vmem>> -> memref<8x128xf32, #tpu.memory_space<vmem>>
    %c7_269 = arith.constant 7 : index
    %c0_270 = arith.constant 0 : index
    %407 = vector.load %406[%c7_269, %c0_270] : memref<8x128xf32, #tpu.memory_space<vmem>>, vector<1x32xf32>
    %c1_271 = arith.constant 1 : index
    %c0_272 = arith.constant 0 : index
    %c0_273 = arith.constant 0 : index
    %408 = vector.load %arg5[%c1_271, %c0_272, %c0_273] : memref<2x32x96xf32, #tpu.memory_space<vmem>>, vector<1x32x96xf32>
    %409 = vector.shape_cast %408 : vector<1x32x96xf32> to vector<32x96xf32>
    %cst_274 = arith.constant dense<0.000000e+00> : vector<16x96xf32>
    %410 = tpu.matmul %383, %409, %cst_274 {dimension_numbers = #tpu.dot_dimension_numbers<[1], [0], [0], [1], [0, 0, 1, 1], [], []>} : vector<16x32xf32>, vector<32x96xf32>, vector<16x96xf32> -> vector<16x96xf32>
    %411 = vector.broadcast %386 : vector<1x96xf32> to vector<16x96xf32>
    %412 = arith.addf %410, %411 : vector<16x96xf32>
    %413 = vector.extract_strided_slice %412 {offsets = [0, 0], sizes = [8, 96], strides = [1, 1]} : vector<16x96xf32> to vector<8x96xf32>
    %414 = vector.extract_strided_slice %413 {offsets = [0, 0], sizes = [8, 8], strides = [1, 1]} : vector<8x96xf32> to vector<8x8xf32>
    %415 = vector.extract_strided_slice %413 {offsets = [0, 32], sizes = [8, 8], strides = [1, 1]} : vector<8x96xf32> to vector<8x8xf32>
    %416 = vector.extract_strided_slice %413 {offsets = [0, 64], sizes = [8, 8], strides = [1, 1]} : vector<8x96xf32> to vector<8x8xf32>
    %cst_275 = arith.constant dense<0.000000e+00> : vector<8x8xf32>
    %417 = tpu.matmul %414, %415, %cst_275 {dimension_numbers = #tpu.dot_dimension_numbers<[1], [1], [0], [0], [0, 0, 1, 0], [], []>} : vector<8x8xf32>, vector<8x8xf32>, vector<8x8xf32> -> vector<8x8xf32>
    %418 = vector.broadcast %101 : vector<1x8xf32> to vector<8x8xf32>
    %419 = arith.addf %417, %418 : vector<8x8xf32>
    %cst_276 = arith.constant dense<0xFF800000> : vector<8xf32>
    %420 = vector.multi_reduction <maximumf>, %419, %cst_276 [1] : vector<8x8xf32> to vector<8xf32>
    %421 = vector.shape_cast %420 : vector<8xf32> to vector<8x1xf32>
    %422 = vector.broadcast %421 : vector<8x1xf32> to vector<8x8xf32>
    %423 = arith.subf %419, %422 : vector<8x8xf32>
    %424 = math.exp %423 : vector<8x8xf32>
    %cst_277 = arith.constant dense<0.000000e+00> : vector<8xf32>
    %425 = vector.multi_reduction <add>, %424, %cst_277 [1] : vector<8x8xf32> to vector<8xf32>
    %426 = vector.shape_cast %425 : vector<8xf32> to vector<8x1xf32>
    %427 = tpu.reciprocal %426 {approx = true} : vector<8x1xf32> -> vector<8x1xf32>
    %428 = vector.broadcast %427 : vector<8x1xf32> to vector<8x8xf32>
    %429 = arith.mulf %424, %428 : vector<8x8xf32>
    %cst_278 = arith.constant dense<0.000000e+00> : vector<8x8xf32>
    %430 = tpu.matmul %429, %416, %cst_278 {dimension_numbers = #tpu.dot_dimension_numbers<[1], [0], [0], [1], [0, 0, 1, 1], [], []>} : vector<8x8xf32>, vector<8x8xf32>, vector<8x8xf32> -> vector<8x8xf32>
    %c1_i32_279 = arith.constant 1 : i32
    %c0_i32_280 = arith.constant 0 : i32
    %c0_i32_281 = arith.constant 0 : i32
    %431 = tpu.memref_slice %arg6[%c1_i32_279, %c0_i32_280, %c0_i32_281] : memref<2x32x32xf32, #tpu.memory_space<vmem>> -> memref<1x32x32xf32, #tpu.memory_space<vmem>>
    %432 = tpu.memref_squeeze %431 : memref<1x32x32xf32, #tpu.memory_space<vmem>> -> memref<32x32xf32, #tpu.memory_space<vmem>>
    %c0_282 = arith.constant 0 : index
    %c0_283 = arith.constant 0 : index
    %433 = vector.load %432[%c0_282, %c0_283] : memref<32x32xf32, #tpu.memory_space<vmem>>, vector<8x32xf32>
    %cst_284 = arith.constant dense<0.000000e+00> : vector<8x32xf32>
    %434 = tpu.matmul %430, %433, %cst_284 {dimension_numbers = #tpu.dot_dimension_numbers<[1], [0], [0], [1], [0, 0, 1, 1], [], []>} : vector<8x8xf32>, vector<8x32xf32>, vector<8x32xf32> -> vector<8x32xf32>
    %435 = vector.extract_strided_slice %413 {offsets = [0, 8], sizes = [8, 8], strides = [1, 1]} : vector<8x96xf32> to vector<8x8xf32>
    %436 = vector.extract_strided_slice %413 {offsets = [0, 40], sizes = [8, 8], strides = [1, 1]} : vector<8x96xf32> to vector<8x8xf32>
    %437 = vector.extract_strided_slice %413 {offsets = [0, 72], sizes = [8, 8], strides = [1, 1]} : vector<8x96xf32> to vector<8x8xf32>
    %cst_285 = arith.constant dense<0.000000e+00> : vector<8x8xf32>
    %438 = tpu.matmul %435, %436, %cst_285 {dimension_numbers = #tpu.dot_dimension_numbers<[1], [1], [0], [0], [0, 0, 1, 0], [], []>} : vector<8x8xf32>, vector<8x8xf32>, vector<8x8xf32> -> vector<8x8xf32>
    %439 = vector.broadcast %101 : vector<1x8xf32> to vector<8x8xf32>
    %440 = arith.addf %438, %439 : vector<8x8xf32>
    %cst_286 = arith.constant dense<0xFF800000> : vector<8xf32>
    %441 = vector.multi_reduction <maximumf>, %440, %cst_286 [1] : vector<8x8xf32> to vector<8xf32>
    %442 = vector.shape_cast %441 : vector<8xf32> to vector<8x1xf32>
    %443 = vector.broadcast %442 : vector<8x1xf32> to vector<8x8xf32>
    %444 = arith.subf %440, %443 : vector<8x8xf32>
    %445 = math.exp %444 : vector<8x8xf32>
    %cst_287 = arith.constant dense<0.000000e+00> : vector<8xf32>
    %446 = vector.multi_reduction <add>, %445, %cst_287 [1] : vector<8x8xf32> to vector<8xf32>
    %447 = vector.shape_cast %446 : vector<8xf32> to vector<8x1xf32>
    %448 = tpu.reciprocal %447 {approx = true} : vector<8x1xf32> -> vector<8x1xf32>
    %449 = vector.broadcast %448 : vector<8x1xf32> to vector<8x8xf32>
    %450 = arith.mulf %445, %449 : vector<8x8xf32>
    %cst_288 = arith.constant dense<0.000000e+00> : vector<8x8xf32>
    %451 = tpu.matmul %450, %437, %cst_288 {dimension_numbers = #tpu.dot_dimension_numbers<[1], [0], [0], [1], [0, 0, 1, 1], [], []>} : vector<8x8xf32>, vector<8x8xf32>, vector<8x8xf32> -> vector<8x8xf32>
    %c1_i32_289 = arith.constant 1 : i32
    %c0_i32_290 = arith.constant 0 : i32
    %c0_i32_291 = arith.constant 0 : i32
    %452 = tpu.memref_slice %arg6[%c1_i32_289, %c0_i32_290, %c0_i32_291] : memref<2x32x32xf32, #tpu.memory_space<vmem>> -> memref<1x32x32xf32, #tpu.memory_space<vmem>>
    %453 = tpu.memref_squeeze %452 : memref<1x32x32xf32, #tpu.memory_space<vmem>> -> memref<32x32xf32, #tpu.memory_space<vmem>>
    %c8_292 = arith.constant 8 : index
    %c0_293 = arith.constant 0 : index
    %454 = vector.load %453[%c8_292, %c0_293] : memref<32x32xf32, #tpu.memory_space<vmem>>, vector<8x32xf32>
    %cst_294 = arith.constant dense<0.000000e+00> : vector<8x32xf32>
    %455 = tpu.matmul %451, %454, %cst_294 {dimension_numbers = #tpu.dot_dimension_numbers<[1], [0], [0], [1], [0, 0, 1, 1], [], []>} : vector<8x8xf32>, vector<8x32xf32>, vector<8x32xf32> -> vector<8x32xf32>
    %456 = arith.addf %434, %455 : vector<8x32xf32>
    %457 = vector.extract_strided_slice %413 {offsets = [0, 16], sizes = [8, 8], strides = [1, 1]} : vector<8x96xf32> to vector<8x8xf32>
    %458 = vector.extract_strided_slice %413 {offsets = [0, 48], sizes = [8, 8], strides = [1, 1]} : vector<8x96xf32> to vector<8x8xf32>
    %459 = vector.extract_strided_slice %413 {offsets = [0, 80], sizes = [8, 8], strides = [1, 1]} : vector<8x96xf32> to vector<8x8xf32>
    %cst_295 = arith.constant dense<0.000000e+00> : vector<8x8xf32>
    %460 = tpu.matmul %457, %458, %cst_295 {dimension_numbers = #tpu.dot_dimension_numbers<[1], [1], [0], [0], [0, 0, 1, 0], [], []>} : vector<8x8xf32>, vector<8x8xf32>, vector<8x8xf32> -> vector<8x8xf32>
    %461 = vector.broadcast %101 : vector<1x8xf32> to vector<8x8xf32>
    %462 = arith.addf %460, %461 : vector<8x8xf32>
    %cst_296 = arith.constant dense<0xFF800000> : vector<8xf32>
    %463 = vector.multi_reduction <maximumf>, %462, %cst_296 [1] : vector<8x8xf32> to vector<8xf32>
    %464 = vector.shape_cast %463 : vector<8xf32> to vector<8x1xf32>
    %465 = vector.broadcast %464 : vector<8x1xf32> to vector<8x8xf32>
    %466 = arith.subf %462, %465 : vector<8x8xf32>
    %467 = math.exp %466 : vector<8x8xf32>
    %cst_297 = arith.constant dense<0.000000e+00> : vector<8xf32>
    %468 = vector.multi_reduction <add>, %467, %cst_297 [1] : vector<8x8xf32> to vector<8xf32>
    %469 = vector.shape_cast %468 : vector<8xf32> to vector<8x1xf32>
    %470 = tpu.reciprocal %469 {approx = true} : vector<8x1xf32> -> vector<8x1xf32>
    %471 = vector.broadcast %470 : vector<8x1xf32> to vector<8x8xf32>
    %472 = arith.mulf %467, %471 : vector<8x8xf32>
    %cst_298 = arith.constant dense<0.000000e+00> : vector<8x8xf32>
    %473 = tpu.matmul %472, %459, %cst_298 {dimension_numbers = #tpu.dot_dimension_numbers<[1], [0], [0], [1], [0, 0, 1, 1], [], []>} : vector<8x8xf32>, vector<8x8xf32>, vector<8x8xf32> -> vector<8x8xf32>
    %c1_i32_299 = arith.constant 1 : i32
    %c0_i32_300 = arith.constant 0 : i32
    %c0_i32_301 = arith.constant 0 : i32
    %474 = tpu.memref_slice %arg6[%c1_i32_299, %c0_i32_300, %c0_i32_301] : memref<2x32x32xf32, #tpu.memory_space<vmem>> -> memref<1x32x32xf32, #tpu.memory_space<vmem>>
    %475 = tpu.memref_squeeze %474 : memref<1x32x32xf32, #tpu.memory_space<vmem>> -> memref<32x32xf32, #tpu.memory_space<vmem>>
    %c16_302 = arith.constant 16 : index
    %c0_303 = arith.constant 0 : index
    %476 = vector.load %475[%c16_302, %c0_303] : memref<32x32xf32, #tpu.memory_space<vmem>>, vector<8x32xf32>
    %cst_304 = arith.constant dense<0.000000e+00> : vector<8x32xf32>
    %477 = tpu.matmul %473, %476, %cst_304 {dimension_numbers = #tpu.dot_dimension_numbers<[1], [0], [0], [1], [0, 0, 1, 1], [], []>} : vector<8x8xf32>, vector<8x32xf32>, vector<8x32xf32> -> vector<8x32xf32>
    %478 = arith.addf %456, %477 : vector<8x32xf32>
    %479 = vector.extract_strided_slice %413 {offsets = [0, 24], sizes = [8, 8], strides = [1, 1]} : vector<8x96xf32> to vector<8x8xf32>
    %480 = vector.extract_strided_slice %413 {offsets = [0, 56], sizes = [8, 8], strides = [1, 1]} : vector<8x96xf32> to vector<8x8xf32>
    %481 = vector.extract_strided_slice %413 {offsets = [0, 88], sizes = [8, 8], strides = [1, 1]} : vector<8x96xf32> to vector<8x8xf32>
    %cst_305 = arith.constant dense<0.000000e+00> : vector<8x8xf32>
    %482 = tpu.matmul %479, %480, %cst_305 {dimension_numbers = #tpu.dot_dimension_numbers<[1], [1], [0], [0], [0, 0, 1, 0], [], []>} : vector<8x8xf32>, vector<8x8xf32>, vector<8x8xf32> -> vector<8x8xf32>
    %483 = vector.broadcast %101 : vector<1x8xf32> to vector<8x8xf32>
    %484 = arith.addf %482, %483 : vector<8x8xf32>
    %cst_306 = arith.constant dense<0xFF800000> : vector<8xf32>
    %485 = vector.multi_reduction <maximumf>, %484, %cst_306 [1] : vector<8x8xf32> to vector<8xf32>
    %486 = vector.shape_cast %485 : vector<8xf32> to vector<8x1xf32>
    %487 = vector.broadcast %486 : vector<8x1xf32> to vector<8x8xf32>
    %488 = arith.subf %484, %487 : vector<8x8xf32>
    %489 = math.exp %488 : vector<8x8xf32>
    %cst_307 = arith.constant dense<0.000000e+00> : vector<8xf32>
    %490 = vector.multi_reduction <add>, %489, %cst_307 [1] : vector<8x8xf32> to vector<8xf32>
    %491 = vector.shape_cast %490 : vector<8xf32> to vector<8x1xf32>
    %492 = tpu.reciprocal %491 {approx = true} : vector<8x1xf32> -> vector<8x1xf32>
    %493 = vector.broadcast %492 : vector<8x1xf32> to vector<8x8xf32>
    %494 = arith.mulf %489, %493 : vector<8x8xf32>
    %cst_308 = arith.constant dense<0.000000e+00> : vector<8x8xf32>
    %495 = tpu.matmul %494, %481, %cst_308 {dimension_numbers = #tpu.dot_dimension_numbers<[1], [0], [0], [1], [0, 0, 1, 1], [], []>} : vector<8x8xf32>, vector<8x8xf32>, vector<8x8xf32> -> vector<8x8xf32>
    %c1_i32_309 = arith.constant 1 : i32
    %c0_i32_310 = arith.constant 0 : i32
    %c0_i32_311 = arith.constant 0 : i32
    %496 = tpu.memref_slice %arg6[%c1_i32_309, %c0_i32_310, %c0_i32_311] : memref<2x32x32xf32, #tpu.memory_space<vmem>> -> memref<1x32x32xf32, #tpu.memory_space<vmem>>
    %497 = tpu.memref_squeeze %496 : memref<1x32x32xf32, #tpu.memory_space<vmem>> -> memref<32x32xf32, #tpu.memory_space<vmem>>
    %c24_312 = arith.constant 24 : index
    %c0_313 = arith.constant 0 : index
    %498 = vector.load %497[%c24_312, %c0_313] : memref<32x32xf32, #tpu.memory_space<vmem>>, vector<8x32xf32>
    %cst_314 = arith.constant dense<0.000000e+00> : vector<8x32xf32>
    %499 = tpu.matmul %495, %498, %cst_314 {dimension_numbers = #tpu.dot_dimension_numbers<[1], [0], [0], [1], [0, 0, 1, 1], [], []>} : vector<8x8xf32>, vector<8x32xf32>, vector<8x32xf32> -> vector<8x32xf32>
    %500 = arith.addf %478, %499 : vector<8x32xf32>
    %501 = vector.extract_strided_slice %412 {offsets = [8, 0], sizes = [8, 96], strides = [1, 1]} : vector<16x96xf32> to vector<8x96xf32>
    %502 = vector.extract_strided_slice %501 {offsets = [0, 0], sizes = [8, 8], strides = [1, 1]} : vector<8x96xf32> to vector<8x8xf32>
    %503 = vector.extract_strided_slice %501 {offsets = [0, 32], sizes = [8, 8], strides = [1, 1]} : vector<8x96xf32> to vector<8x8xf32>
    %504 = vector.extract_strided_slice %501 {offsets = [0, 64], sizes = [8, 8], strides = [1, 1]} : vector<8x96xf32> to vector<8x8xf32>
    %cst_315 = arith.constant dense<0.000000e+00> : vector<8x8xf32>
    %505 = tpu.matmul %502, %503, %cst_315 {dimension_numbers = #tpu.dot_dimension_numbers<[1], [1], [0], [0], [0, 0, 1, 0], [], []>} : vector<8x8xf32>, vector<8x8xf32>, vector<8x8xf32> -> vector<8x8xf32>
    %506 = vector.broadcast %106 : vector<1x8xf32> to vector<8x8xf32>
    %507 = arith.addf %505, %506 : vector<8x8xf32>
    %cst_316 = arith.constant dense<0xFF800000> : vector<8xf32>
    %508 = vector.multi_reduction <maximumf>, %507, %cst_316 [1] : vector<8x8xf32> to vector<8xf32>
    %509 = vector.shape_cast %508 : vector<8xf32> to vector<8x1xf32>
    %510 = vector.broadcast %509 : vector<8x1xf32> to vector<8x8xf32>
    %511 = arith.subf %507, %510 : vector<8x8xf32>
    %512 = math.exp %511 : vector<8x8xf32>
    %cst_317 = arith.constant dense<0.000000e+00> : vector<8xf32>
    %513 = vector.multi_reduction <add>, %512, %cst_317 [1] : vector<8x8xf32> to vector<8xf32>
    %514 = vector.shape_cast %513 : vector<8xf32> to vector<8x1xf32>
    %515 = tpu.reciprocal %514 {approx = true} : vector<8x1xf32> -> vector<8x1xf32>
    %516 = vector.broadcast %515 : vector<8x1xf32> to vector<8x8xf32>
    %517 = arith.mulf %512, %516 : vector<8x8xf32>
    %cst_318 = arith.constant dense<0.000000e+00> : vector<8x8xf32>
    %518 = tpu.matmul %517, %504, %cst_318 {dimension_numbers = #tpu.dot_dimension_numbers<[1], [0], [0], [1], [0, 0, 1, 1], [], []>} : vector<8x8xf32>, vector<8x8xf32>, vector<8x8xf32> -> vector<8x8xf32>
    %c1_i32_319 = arith.constant 1 : i32
    %c0_i32_320 = arith.constant 0 : i32
    %c0_i32_321 = arith.constant 0 : i32
    %519 = tpu.memref_slice %arg6[%c1_i32_319, %c0_i32_320, %c0_i32_321] : memref<2x32x32xf32, #tpu.memory_space<vmem>> -> memref<1x32x32xf32, #tpu.memory_space<vmem>>
    %520 = tpu.memref_squeeze %519 : memref<1x32x32xf32, #tpu.memory_space<vmem>> -> memref<32x32xf32, #tpu.memory_space<vmem>>
    %c0_322 = arith.constant 0 : index
    %c0_323 = arith.constant 0 : index
    %521 = vector.load %520[%c0_322, %c0_323] : memref<32x32xf32, #tpu.memory_space<vmem>>, vector<8x32xf32>
    %cst_324 = arith.constant dense<0.000000e+00> : vector<8x32xf32>
    %522 = tpu.matmul %518, %521, %cst_324 {dimension_numbers = #tpu.dot_dimension_numbers<[1], [0], [0], [1], [0, 0, 1, 1], [], []>} : vector<8x8xf32>, vector<8x32xf32>, vector<8x32xf32> -> vector<8x32xf32>
    %523 = vector.extract_strided_slice %501 {offsets = [0, 8], sizes = [8, 8], strides = [1, 1]} : vector<8x96xf32> to vector<8x8xf32>
    %524 = vector.extract_strided_slice %501 {offsets = [0, 40], sizes = [8, 8], strides = [1, 1]} : vector<8x96xf32> to vector<8x8xf32>
    %525 = vector.extract_strided_slice %501 {offsets = [0, 72], sizes = [8, 8], strides = [1, 1]} : vector<8x96xf32> to vector<8x8xf32>
    %cst_325 = arith.constant dense<0.000000e+00> : vector<8x8xf32>
    %526 = tpu.matmul %523, %524, %cst_325 {dimension_numbers = #tpu.dot_dimension_numbers<[1], [1], [0], [0], [0, 0, 1, 0], [], []>} : vector<8x8xf32>, vector<8x8xf32>, vector<8x8xf32> -> vector<8x8xf32>
    %527 = vector.broadcast %106 : vector<1x8xf32> to vector<8x8xf32>
    %528 = arith.addf %526, %527 : vector<8x8xf32>
    %cst_326 = arith.constant dense<0xFF800000> : vector<8xf32>
    %529 = vector.multi_reduction <maximumf>, %528, %cst_326 [1] : vector<8x8xf32> to vector<8xf32>
    %530 = vector.shape_cast %529 : vector<8xf32> to vector<8x1xf32>
    %531 = vector.broadcast %530 : vector<8x1xf32> to vector<8x8xf32>
    %532 = arith.subf %528, %531 : vector<8x8xf32>
    %533 = math.exp %532 : vector<8x8xf32>
    %cst_327 = arith.constant dense<0.000000e+00> : vector<8xf32>
    %534 = vector.multi_reduction <add>, %533, %cst_327 [1] : vector<8x8xf32> to vector<8xf32>
    %535 = vector.shape_cast %534 : vector<8xf32> to vector<8x1xf32>
    %536 = tpu.reciprocal %535 {approx = true} : vector<8x1xf32> -> vector<8x1xf32>
    %537 = vector.broadcast %536 : vector<8x1xf32> to vector<8x8xf32>
    %538 = arith.mulf %533, %537 : vector<8x8xf32>
    %cst_328 = arith.constant dense<0.000000e+00> : vector<8x8xf32>
    %539 = tpu.matmul %538, %525, %cst_328 {dimension_numbers = #tpu.dot_dimension_numbers<[1], [0], [0], [1], [0, 0, 1, 1], [], []>} : vector<8x8xf32>, vector<8x8xf32>, vector<8x8xf32> -> vector<8x8xf32>
    %c1_i32_329 = arith.constant 1 : i32
    %c0_i32_330 = arith.constant 0 : i32
    %c0_i32_331 = arith.constant 0 : i32
    %540 = tpu.memref_slice %arg6[%c1_i32_329, %c0_i32_330, %c0_i32_331] : memref<2x32x32xf32, #tpu.memory_space<vmem>> -> memref<1x32x32xf32, #tpu.memory_space<vmem>>
    %541 = tpu.memref_squeeze %540 : memref<1x32x32xf32, #tpu.memory_space<vmem>> -> memref<32x32xf32, #tpu.memory_space<vmem>>
    %c8_332 = arith.constant 8 : index
    %c0_333 = arith.constant 0 : index
    %542 = vector.load %541[%c8_332, %c0_333] : memref<32x32xf32, #tpu.memory_space<vmem>>, vector<8x32xf32>
    %cst_334 = arith.constant dense<0.000000e+00> : vector<8x32xf32>
    %543 = tpu.matmul %539, %542, %cst_334 {dimension_numbers = #tpu.dot_dimension_numbers<[1], [0], [0], [1], [0, 0, 1, 1], [], []>} : vector<8x8xf32>, vector<8x32xf32>, vector<8x32xf32> -> vector<8x32xf32>
    %544 = arith.addf %522, %543 : vector<8x32xf32>
    %545 = vector.extract_strided_slice %501 {offsets = [0, 16], sizes = [8, 8], strides = [1, 1]} : vector<8x96xf32> to vector<8x8xf32>
    %546 = vector.extract_strided_slice %501 {offsets = [0, 48], sizes = [8, 8], strides = [1, 1]} : vector<8x96xf32> to vector<8x8xf32>
    %547 = vector.extract_strided_slice %501 {offsets = [0, 80], sizes = [8, 8], strides = [1, 1]} : vector<8x96xf32> to vector<8x8xf32>
    %cst_335 = arith.constant dense<0.000000e+00> : vector<8x8xf32>
    %548 = tpu.matmul %545, %546, %cst_335 {dimension_numbers = #tpu.dot_dimension_numbers<[1], [1], [0], [0], [0, 0, 1, 0], [], []>} : vector<8x8xf32>, vector<8x8xf32>, vector<8x8xf32> -> vector<8x8xf32>
    %549 = vector.broadcast %106 : vector<1x8xf32> to vector<8x8xf32>
    %550 = arith.addf %548, %549 : vector<8x8xf32>
    %cst_336 = arith.constant dense<0xFF800000> : vector<8xf32>
    %551 = vector.multi_reduction <maximumf>, %550, %cst_336 [1] : vector<8x8xf32> to vector<8xf32>
    %552 = vector.shape_cast %551 : vector<8xf32> to vector<8x1xf32>
    %553 = vector.broadcast %552 : vector<8x1xf32> to vector<8x8xf32>
    %554 = arith.subf %550, %553 : vector<8x8xf32>
    %555 = math.exp %554 : vector<8x8xf32>
    %cst_337 = arith.constant dense<0.000000e+00> : vector<8xf32>
    %556 = vector.multi_reduction <add>, %555, %cst_337 [1] : vector<8x8xf32> to vector<8xf32>
    %557 = vector.shape_cast %556 : vector<8xf32> to vector<8x1xf32>
    %558 = tpu.reciprocal %557 {approx = true} : vector<8x1xf32> -> vector<8x1xf32>
    %559 = vector.broadcast %558 : vector<8x1xf32> to vector<8x8xf32>
    %560 = arith.mulf %555, %559 : vector<8x8xf32>
    %cst_338 = arith.constant dense<0.000000e+00> : vector<8x8xf32>
    %561 = tpu.matmul %560, %547, %cst_338 {dimension_numbers = #tpu.dot_dimension_numbers<[1], [0], [0], [1], [0, 0, 1, 1], [], []>} : vector<8x8xf32>, vector<8x8xf32>, vector<8x8xf32> -> vector<8x8xf32>
    %c1_i32_339 = arith.constant 1 : i32
    %c0_i32_340 = arith.constant 0 : i32
    %c0_i32_341 = arith.constant 0 : i32
    %562 = tpu.memref_slice %arg6[%c1_i32_339, %c0_i32_340, %c0_i32_341] : memref<2x32x32xf32, #tpu.memory_space<vmem>> -> memref<1x32x32xf32, #tpu.memory_space<vmem>>
    %563 = tpu.memref_squeeze %562 : memref<1x32x32xf32, #tpu.memory_space<vmem>> -> memref<32x32xf32, #tpu.memory_space<vmem>>
    %c16_342 = arith.constant 16 : index
    %c0_343 = arith.constant 0 : index
    %564 = vector.load %563[%c16_342, %c0_343] : memref<32x32xf32, #tpu.memory_space<vmem>>, vector<8x32xf32>
    %cst_344 = arith.constant dense<0.000000e+00> : vector<8x32xf32>
    %565 = tpu.matmul %561, %564, %cst_344 {dimension_numbers = #tpu.dot_dimension_numbers<[1], [0], [0], [1], [0, 0, 1, 1], [], []>} : vector<8x8xf32>, vector<8x32xf32>, vector<8x32xf32> -> vector<8x32xf32>
    %566 = arith.addf %544, %565 : vector<8x32xf32>
    %567 = vector.extract_strided_slice %501 {offsets = [0, 24], sizes = [8, 8], strides = [1, 1]} : vector<8x96xf32> to vector<8x8xf32>
    %568 = vector.extract_strided_slice %501 {offsets = [0, 56], sizes = [8, 8], strides = [1, 1]} : vector<8x96xf32> to vector<8x8xf32>
    %569 = vector.extract_strided_slice %501 {offsets = [0, 88], sizes = [8, 8], strides = [1, 1]} : vector<8x96xf32> to vector<8x8xf32>
    %cst_345 = arith.constant dense<0.000000e+00> : vector<8x8xf32>
    %570 = tpu.matmul %567, %568, %cst_345 {dimension_numbers = #tpu.dot_dimension_numbers<[1], [1], [0], [0], [0, 0, 1, 0], [], []>} : vector<8x8xf32>, vector<8x8xf32>, vector<8x8xf32> -> vector<8x8xf32>
    %571 = vector.broadcast %106 : vector<1x8xf32> to vector<8x8xf32>
    %572 = arith.addf %570, %571 : vector<8x8xf32>
    %cst_346 = arith.constant dense<0xFF800000> : vector<8xf32>
    %573 = vector.multi_reduction <maximumf>, %572, %cst_346 [1] : vector<8x8xf32> to vector<8xf32>
    %574 = vector.shape_cast %573 : vector<8xf32> to vector<8x1xf32>
    %575 = vector.broadcast %574 : vector<8x1xf32> to vector<8x8xf32>
    %576 = arith.subf %572, %575 : vector<8x8xf32>
    %577 = math.exp %576 : vector<8x8xf32>
    %cst_347 = arith.constant dense<0.000000e+00> : vector<8xf32>
    %578 = vector.multi_reduction <add>, %577, %cst_347 [1] : vector<8x8xf32> to vector<8xf32>
    %579 = vector.shape_cast %578 : vector<8xf32> to vector<8x1xf32>
    %580 = tpu.reciprocal %579 {approx = true} : vector<8x1xf32> -> vector<8x1xf32>
    %581 = vector.broadcast %580 : vector<8x1xf32> to vector<8x8xf32>
    %582 = arith.mulf %577, %581 : vector<8x8xf32>
    %cst_348 = arith.constant dense<0.000000e+00> : vector<8x8xf32>
    %583 = tpu.matmul %582, %569, %cst_348 {dimension_numbers = #tpu.dot_dimension_numbers<[1], [0], [0], [1], [0, 0, 1, 1], [], []>} : vector<8x8xf32>, vector<8x8xf32>, vector<8x8xf32> -> vector<8x8xf32>
    %c1_i32_349 = arith.constant 1 : i32
    %c0_i32_350 = arith.constant 0 : i32
    %c0_i32_351 = arith.constant 0 : i32
    %584 = tpu.memref_slice %arg6[%c1_i32_349, %c0_i32_350, %c0_i32_351] : memref<2x32x32xf32, #tpu.memory_space<vmem>> -> memref<1x32x32xf32, #tpu.memory_space<vmem>>
    %585 = tpu.memref_squeeze %584 : memref<1x32x32xf32, #tpu.memory_space<vmem>> -> memref<32x32xf32, #tpu.memory_space<vmem>>
    %c24_352 = arith.constant 24 : index
    %c0_353 = arith.constant 0 : index
    %586 = vector.load %585[%c24_352, %c0_353] : memref<32x32xf32, #tpu.memory_space<vmem>>, vector<8x32xf32>
    %cst_354 = arith.constant dense<0.000000e+00> : vector<8x32xf32>
    %587 = tpu.matmul %583, %586, %cst_354 {dimension_numbers = #tpu.dot_dimension_numbers<[1], [0], [0], [1], [0, 0, 1, 1], [], []>} : vector<8x8xf32>, vector<8x32xf32>, vector<8x32xf32> -> vector<8x32xf32>
    %588 = arith.addf %566, %587 : vector<8x32xf32>
    %589 = tpu.concatenate %500, %588 in 0 : vector<8x32xf32>, vector<8x32xf32> -> vector<16x32xf32>
    %590 = vector.broadcast %389 : vector<1x32xf32> to vector<16x32xf32>
    %591 = arith.addf %589, %590 : vector<16x32xf32>
    %592 = arith.addf %383, %591 : vector<16x32xf32>
    %cst_355 = arith.constant dense<0.000000e+00> : vector<16xf32>
    %593 = vector.multi_reduction <add>, %592, %cst_355 [1] : vector<16x32xf32> to vector<16xf32>
    %594 = vector.shape_cast %593 : vector<16xf32> to vector<16x1xf32>
    %cst_356 = arith.constant 3.200000e+01 : f32
    %595 = vector.broadcast %cst_356 : f32 to vector<16x1xf32>
    %596 = arith.divf %594, %595 : vector<16x1xf32>
    %597 = vector.broadcast %596 : vector<16x1xf32> to vector<16x32xf32>
    %598 = arith.subf %592, %597 : vector<16x32xf32>
    %599 = arith.mulf %598, %598 : vector<16x32xf32>
    %cst_357 = arith.constant dense<0.000000e+00> : vector<16xf32>
    %600 = vector.multi_reduction <add>, %599, %cst_357 [1] : vector<16x32xf32> to vector<16xf32>
    %601 = vector.shape_cast %600 : vector<16xf32> to vector<16x1xf32>
    %cst_358 = arith.constant 3.200000e+01 : f32
    %602 = vector.broadcast %cst_358 : f32 to vector<16x1xf32>
    %603 = arith.divf %601, %602 : vector<16x1xf32>
    %604 = vector.broadcast %596 : vector<16x1xf32> to vector<16x32xf32>
    %605 = arith.subf %592, %604 : vector<16x32xf32>
    %cst_359 = arith.constant 9.99999996E-13 : f32
    %606 = vector.broadcast %cst_359 : f32 to vector<16x1xf32>
    %607 = arith.addf %603, %606 : vector<16x1xf32>
    %608 = math.rsqrt %607 : vector<16x1xf32>
    %609 = vector.broadcast %608 : vector<16x1xf32> to vector<16x32xf32>
    %610 = arith.mulf %605, %609 : vector<16x32xf32>
    %611 = vector.broadcast %392 : vector<1x32xf32> to vector<16x32xf32>
    %612 = arith.mulf %610, %611 : vector<16x32xf32>
    %613 = vector.broadcast %395 : vector<1x32xf32> to vector<16x32xf32>
    %614 = arith.addf %612, %613 : vector<16x32xf32>
    %c1_360 = arith.constant 1 : index
    %c0_361 = arith.constant 0 : index
    %c0_362 = arith.constant 0 : index
    %615 = vector.load %arg7[%c1_360, %c0_361, %c0_362] : memref<2x32x64xf32, #tpu.memory_space<vmem>>, vector<1x32x64xf32>
    %616 = vector.shape_cast %615 : vector<1x32x64xf32> to vector<32x64xf32>
    %c1_363 = arith.constant 1 : index
    %c0_364 = arith.constant 0 : index
    %c0_365 = arith.constant 0 : index
    %617 = vector.load %arg8[%c1_363, %c0_364, %c0_365] : memref<2x64x32xf32, #tpu.memory_space<vmem>>, vector<1x64x32xf32>
    %618 = vector.shape_cast %617 : vector<1x64x32xf32> to vector<64x32xf32>
    %cst_366 = arith.constant dense<0.000000e+00> : vector<16x64xf32>
    %619 = tpu.matmul %614, %616, %cst_366 {dimension_numbers = #tpu.dot_dimension_numbers<[1], [0], [0], [1], [0, 0, 1, 1], [], []>} : vector<16x32xf32>, vector<32x64xf32>, vector<16x64xf32> -> vector<16x64xf32>
    %620 = vector.broadcast %404 : vector<1x64xf32> to vector<16x64xf32>
    %621 = arith.addf %619, %620 : vector<16x64xf32>
    %622 = arith.mulf %621, %621 : vector<16x64xf32>
    %623 = arith.mulf %621, %622 : vector<16x64xf32>
    %cst_367 = arith.constant 4.471500e-02 : f32
    %624 = vector.broadcast %cst_367 : f32 to vector<16x64xf32>
    %625 = arith.mulf %624, %623 : vector<16x64xf32>
    %626 = arith.addf %621, %625 : vector<16x64xf32>
    %cst_368 = arith.constant 0.797884583 : f32
    %627 = vector.broadcast %cst_368 : f32 to vector<16x64xf32>
    %628 = arith.mulf %627, %626 : vector<16x64xf32>
    %629 = math.tanh %628 : vector<16x64xf32>
    %cst_369 = arith.constant 1.000000e+00 : f32
    %630 = vector.broadcast %cst_369 : f32 to vector<16x64xf32>
    %631 = arith.addf %630, %629 : vector<16x64xf32>
    %cst_370 = arith.constant 5.000000e-01 : f32
    %632 = vector.broadcast %cst_370 : f32 to vector<16x64xf32>
    %633 = arith.mulf %632, %631 : vector<16x64xf32>
    %634 = arith.mulf %621, %633 : vector<16x64xf32>
    %cst_371 = arith.constant dense<0.000000e+00> : vector<16x32xf32>
    %635 = tpu.matmul %634, %618, %cst_371 {dimension_numbers = #tpu.dot_dimension_numbers<[1], [0], [0], [1], [0, 0, 1, 1], [], []>} : vector<16x64xf32>, vector<64x32xf32>, vector<16x32xf32> -> vector<16x32xf32>
    %636 = vector.broadcast %407 : vector<1x32xf32> to vector<16x32xf32>
    %637 = arith.addf %635, %636 : vector<16x32xf32>
    %638 = arith.addf %614, %637 : vector<16x32xf32>
    %cst_372 = arith.constant dense<0.000000e+00> : vector<16xf32>
    %639 = vector.multi_reduction <add>, %638, %cst_372 [1] : vector<16x32xf32> to vector<16xf32>
    %640 = vector.shape_cast %639 : vector<16xf32> to vector<16x1xf32>
    %cst_373 = arith.constant 3.200000e+01 : f32
    %641 = vector.broadcast %cst_373 : f32 to vector<16x1xf32>
    %642 = arith.divf %640, %641 : vector<16x1xf32>
    %643 = vector.broadcast %642 : vector<16x1xf32> to vector<16x32xf32>
    %644 = arith.subf %638, %643 : vector<16x32xf32>
    %645 = arith.mulf %644, %644 : vector<16x32xf32>
    %cst_374 = arith.constant dense<0.000000e+00> : vector<16xf32>
    %646 = vector.multi_reduction <add>, %645, %cst_374 [1] : vector<16x32xf32> to vector<16xf32>
    %647 = vector.shape_cast %646 : vector<16xf32> to vector<16x1xf32>
    %cst_375 = arith.constant 3.200000e+01 : f32
    %648 = vector.broadcast %cst_375 : f32 to vector<16x1xf32>
    %649 = arith.divf %647, %648 : vector<16x1xf32>
    %650 = vector.broadcast %642 : vector<16x1xf32> to vector<16x32xf32>
    %651 = arith.subf %638, %650 : vector<16x32xf32>
    %cst_376 = arith.constant 9.99999996E-13 : f32
    %652 = vector.broadcast %cst_376 : f32 to vector<16x1xf32>
    %653 = arith.addf %649, %652 : vector<16x1xf32>
    %654 = math.rsqrt %653 : vector<16x1xf32>
    %655 = vector.broadcast %654 : vector<16x1xf32> to vector<16x32xf32>
    %656 = arith.mulf %651, %655 : vector<16x32xf32>
    %657 = vector.broadcast %398 : vector<1x32xf32> to vector<16x32xf32>
    %658 = arith.mulf %656, %657 : vector<16x32xf32>
    %659 = vector.broadcast %401 : vector<1x32xf32> to vector<16x32xf32>
    %660 = arith.addf %658, %659 : vector<16x32xf32>
    %c0_377 = arith.constant 0 : index
    %c0_378 = arith.constant 0 : index
    %661 = vector.load %arg10[%c0_377, %c0_378] : memref<32x128xf32, #tpu.memory_space<vmem>>, vector<32x128xf32>
    %cst_379 = arith.constant dense<0.000000e+00> : vector<16x128xf32>
    %662 = tpu.matmul %660, %661, %cst_379 {dimension_numbers = #tpu.dot_dimension_numbers<[1], [0], [0], [1], [0, 0, 1, 1], [], []>} : vector<16x32xf32>, vector<32x128xf32>, vector<16x128xf32> -> vector<16x128xf32>
    %c0_380 = arith.constant 0 : index
    %c0_381 = arith.constant 0 : index
    %663 = vector.load %arg11[%c0_380, %c0_381] : memref<1x128xf32, #tpu.memory_space<vmem>>, vector<1x128xf32>
    %664 = vector.broadcast %663 : vector<1x128xf32> to vector<16x128xf32>
    %665 = arith.addf %662, %664 : vector<16x128xf32>
    %c0_382 = arith.constant 0 : index
    %c0_383 = arith.constant 0 : index
    %666 = vector.load %arg12[%c0_382, %c0_383] : memref<16x128xf32, #tpu.memory_space<vmem>>, vector<16x128xf32>
    tpu.vector_store %arg12[%c0_382, %c0_383], %665 {strides = array<i32>} : memref<16x128xf32, #tpu.memory_space<vmem>>, vector<16x128xf32>,
    return
  }
  func.func @transform_0(%arg0: i32, %arg1: memref<16xi32, #tpu.memory_space<smem>>) -> (i32, i32) {
    %c0_i32 = arith.constant 0 : i32
    %c0_i32_0 = arith.constant 0 : i32
    %c0_i32_1 = arith.constant 0 : i32
    return %c0_i32, %c0_i32_0 : i32, i32
  }
  func.func @transform_1(%arg0: i32, %arg1: memref<16xi32, #tpu.memory_space<smem>>) -> (i32, i32) {
    %c0_i32 = arith.constant 0 : i32
    %c0_i32_0 = arith.constant 0 : i32
    %c0_i32_1 = arith.constant 0 : i32
    return %c0_i32, %c0_i32_0 : i32, i32
  }
  func.func @transform_2(%arg0: i32, %arg1: memref<16xi32, #tpu.memory_space<smem>>) -> (i32, i32) {
    %c0_i32 = arith.constant 0 : i32
    %c0_i32_0 = arith.constant 0 : i32
    %c0_i32_1 = arith.constant 0 : i32
    return %c0_i32, %c0_i32_0 : i32, i32
  }
  func.func @transform_3(%arg0: i32, %arg1: memref<16xi32, #tpu.memory_space<smem>>) -> (i32, i32, i32) {
    %c0_i32 = arith.constant 0 : i32
    %c0_i32_0 = arith.constant 0 : i32
    %c0_i32_1 = arith.constant 0 : i32
    %c0_i32_2 = arith.constant 0 : i32
    return %c0_i32, %c0_i32_0, %c0_i32_1 : i32, i32, i32
  }
  func.func @transform_4(%arg0: i32, %arg1: memref<16xi32, #tpu.memory_space<smem>>) -> (i32, i32, i32) {
    %c0_i32 = arith.constant 0 : i32
    %c0_i32_0 = arith.constant 0 : i32
    %c0_i32_1 = arith.constant 0 : i32
    %c0_i32_2 = arith.constant 0 : i32
    return %c0_i32, %c0_i32_0, %c0_i32_1 : i32, i32, i32
  }
  func.func @transform_5(%arg0: i32, %arg1: memref<16xi32, #tpu.memory_space<smem>>) -> (i32, i32, i32) {
    %c0_i32 = arith.constant 0 : i32
    %c0_i32_0 = arith.constant 0 : i32
    %c0_i32_1 = arith.constant 0 : i32
    %c0_i32_2 = arith.constant 0 : i32
    return %c0_i32, %c0_i32_0, %c0_i32_1 : i32, i32, i32
  }
  func.func @transform_6(%arg0: i32, %arg1: memref<16xi32, #tpu.memory_space<smem>>) -> (i32, i32, i32) {
    %c0_i32 = arith.constant 0 : i32
    %c0_i32_0 = arith.constant 0 : i32
    %c0_i32_1 = arith.constant 0 : i32
    %c0_i32_2 = arith.constant 0 : i32
    return %c0_i32, %c0_i32_0, %c0_i32_1 : i32, i32, i32
  }
  func.func @transform_7(%arg0: i32, %arg1: memref<16xi32, #tpu.memory_space<smem>>) -> (i32, i32, i32) {
    %c0_i32 = arith.constant 0 : i32
    %c0_i32_0 = arith.constant 0 : i32
    %c0_i32_1 = arith.constant 0 : i32
    %c0_i32_2 = arith.constant 0 : i32
    return %c0_i32, %c0_i32_0, %c0_i32_1 : i32, i32, i32
  }
  func.func @transform_8(%arg0: i32, %arg1: memref<16xi32, #tpu.memory_space<smem>>) -> (i32, i32) {
    %c0_i32 = arith.constant 0 : i32
    %c0_i32_0 = arith.constant 0 : i32
    %c0_i32_1 = arith.constant 0 : i32
    return %c0_i32, %c0_i32_0 : i32, i32
  }
  func.func @transform_9(%arg0: i32, %arg1: memref<16xi32, #tpu.memory_space<smem>>) -> (i32, i32) {
    %c0_i32 = arith.constant 0 : i32
    %c0_i32_0 = arith.constant 0 : i32
    %c0_i32_1 = arith.constant 0 : i32
    return %c0_i32, %c0_i32_0 : i32, i32
  }
  func.func @transform_10(%arg0: i32, %arg1: memref<16xi32, #tpu.memory_space<smem>>) -> (i32, i32) {
    %c0_i32 = arith.constant 0 : i32
    %c0_i32_0 = arith.constant 0 : i32
    %c0_i32_1 = arith.constant 0 : i32
    return %c0_i32, %c0_i32_0 : i32, i32
  }
}

</mosaic_0001>

<bundles_post_ra>
// kernel: tagger_model_forward.1
= control target key start
LH: loop header
LB: loop body
LE: loop exit
PB: predicated region body
PF: predicated region fallthrough
CT: control target
= control target key end

     0   :  { %s6654_s0 = inlined_call_operand.vmem [shape: s32[16], index: 0, kind: input, shape index: {}]   ;;  %s6655_s1 = inlined_call_operand.vmem [shape: f32[2,8], index: 1, kind: input, shape index: {}]   ;;  %s6656_s2 = inlined_call_operand.hbm [shape: f32[56,32], index: 2, kind: input, shape index: {}]   ;;  %s6657_s3 = inlined_call_operand.vmem [shape: f32[8,32], index: 3, kind: input, shape index: {}]   ;;  %s6658_s4 = inlined_call_operand.hbm [shape: f32[2,32,96], index: 4, kind: input, shape index: {}]   ;;  %s6659_s5 = inlined_call_operand.hbm [shape: f32[2,32,32], index: 5, kind: input, shape index: {}]   ;;  %s6660_s6 = inlined_call_operand.hbm [shape: f32[2,32,64], index: 6, kind: input, shape index: {}]   ;;  %s6661_s7 = inlined_call_operand.hbm [shape: f32[2,64,32], index: 7, kind: input, shape index: {}]   ;;  %s6662_s8 = inlined_call_operand.hbm [shape: f32[2,8,128], index: 8, kind: input, shape index: {}]   ;;  %s6663_s9 = inlined_call_operand.vmem [shape: f32[32,128], index: 9, kind: input, shape index: {}]   ;;  %s6664_s10 = inlined_call_operand.vmem [shape: f32[1,128], index: 10, kind: input, shape index: {}]   ;;  %s6665_s11 = inlined_call_operand.vmem [shape: f32[16,128], index: 11, kind: output, shape index: {}]  }
   0x1   :  { %s16_s19 = sshll.u32 %s6654_s0, 4  ;;  %s17_s19 = int_to_ptr.vmem [resolvable:$true] %s16_s19 }
   0x2   :  { %s5721_s20 = scalar_lea.vmem %s17_s19, 16  ;;  %p5726_p1 = scmp.lt.s32.totalorder %s17_s19, %s17_s19 }
   0x3   :  { %p5722_p0 = scmp.ne.s32.totalorder %s17_s19, %s5721_s20  ;;  %p5727_p2 = scmp.lt.s32.totalorder %s5721_s20, %s5721_s20 }
   0x5   :  { %p5728_p3 = por %p5727_p2, %p5726_p1 }
   0x7   :  { %p5729_p4 = pnand %p5728_p3, %p5722_p0 }
   0x9   :  { %5732 = shalt.err (!%p5729_p4)  }
   0xa   :  { %s5875_s21 = smov [#allocation4]  }
   0xb   :  { %19 = dma.vmem_to_smem %s17_s19, 16, %s5875_s21, [#allocation3] }
   0xc   :  { %5865 = dma.done.wait [#allocation3], 16 }
   0xd   :  { %5866 = vsyncadd [#allocation3], 4294967280 }
   0xe   :  { %21 = sfence }
   0xf   :  { %22 = vsyncpa [#allocation6], 0 }
  0x10   :  { %23 = vsyncpa [#allocation8], 0 }
  0x11   :  { %24 = vsyncpa [#allocation11], 0 }
  0x12   :  { %25 = vsyncpa [#allocation14], 0  ;;  %s5876_s22 = smov [#allocation7]   ;;  %s5877_s0 = smov [#allocation10]  }
  0x13   :  { %s47_s23 = sshll.u32 %s5876_s22, 4  ;;  %s71_s24 = sshll.u32 %s5877_s0, 4  ;;  %s48_s23 = int_to_ptr.vmem [resolvable:$true] %s47_s23  ;;  %s5960_s24 = int_to_ptr.vmem [resolvable:$true] %s71_s24 }
  0x14   :  { %s5733_s27 = scalar_lea.hbm %s6658_s4, 1024 }
  0x15   :  { %p5734_p5 = scmp.ne.s32.totalorder %s6658_s4, %s5733_s27  ;;  %p5737_p6 = scmp.lt.u32.totalorder %s5733_s27, %s6658_s4 }
  0x17   :  { %p5739_p7 = pnand %p5737_p6, %p5734_p5 }
  0x19   :  { %5742 = shalt.err (!%p5739_p7)
}
  0x1a   :  { %s5743_s13 = scalar_lea.vmem %s48_s23, 1024  ;;  %p5748_p9 = scmp.lt.s32.totalorder %s48_s23, %s48_s23 }
  0x1b   :  { %p5744_p8 = scmp.ne.s32.totalorder %s48_s23, %s5743_s13  ;;  %p5749_p10 = scmp.lt.s32.totalorder %s5743_s13, %s5743_s13 }
  0x1d   :  { %p5750_p11 = por %p5749_p10, %p5748_p9 }
  0x1f   :  { %p5751_p12 = pnand %p5750_p11, %p5744_p8 }
  0x21   :  { %5754 = shalt.err (!%p5751_p12)
}
  0x22   :  { %s5878_s14 = smov 128   ;;  %s5879_s15 = smov 8  }
  0x23   :  { %53 = dma.hbm_to_vmem [thread:$0]  %s6658_s4, 1024, %s48_s23, [#allocation8], %s5878_s14, %s5878_s14, %s5879_s15  }
  0x24   :  { %s5755_s20 = scalar_lea.hbm %s6660_s6, 1024 }
  0x25   :  { %p5756_p13 = scmp.ne.s32.totalorder %s6660_s6, %s5755_s20  ;;  %p5759_p0 = scmp.lt.u32.totalorder %s5755_s20, %s6660_s6 }
  0x27   :  { %p5761_p1 = pnand %p5759_p0, %p5756_p13 }
  0x29   :  { %5764 = shalt.err (!%p5761_p1)
}
  0x2a   :  { %s5765_s26 = scalar_lea.vmem %s5960_s24, 1024  ;;  %p5770_p3 = scmp.lt.s32.totalorder %s5960_s24, %s5960_s24 }
  0x2b   :  { %p5766_p2 = scmp.ne.s32.totalorder %s5960_s24, %s5765_s26  ;;  %p5771_p4 = scmp.lt.s32.totalorder %s5765_s26, %s5765_s26 }
  0x2d   :  { %p5772_p5 = por %p5771_p4, %p5770_p3 }
  0x2f   :  { %p5773_p6 = pnand %p5772_p5, %p5766_p2 }
  0x31   :  { %5776 = shalt.err (!%p5773_p6)
}
  0x32   :  { %77 = dma.hbm_to_vmem [thread:$0]  %s6660_s6, 1024, %s5960_s24, [#allocation11], %s5878_s14, %s5878_s14, %s5879_s15  }
  0x33   :  { %s5880_s27 = smov [#allocation5]   ;;  %s5881_s29 = smov [#allocation9]  }
  0x34   :  { %s33_s28 = sshll.u32 %s5880_s27, 4  ;;  %s59_s30 = sshll.u32 %s5881_s29, 4  ;;  %s34_s28 = int_to_ptr.vmem [resolvable:$true] %s33_s28  ;;  %s5997_s30 = int_to_ptr.vmem [resolvable:$true] %s59_s30 }
  0x35   :  { %s5777_s16 = scalar_lea.hbm %s6656_s2, 896 }
  0x36   :  { %p5778_p7 = scmp.ne.s32.totalorder %s6656_s2, %s5777_s16  ;;  %p5781_p8 = scmp.lt.u32.totalorder %s5777_s16, %s6656_s2 }
  0x38   :  { %p5783_p9 = pnand %p5781_p8, %p5778_p7 }
  0x3a   :  { %5786 = shalt.err (!%p5783_p9)
}
  0x3b   :  { %s5787_s6 = scalar_lea.vmem %s34_s28, 896  ;;  %p5792_p11 = scmp.lt.s32.totalorder %s34_s28, %s34_s28 }
  0x3c   :  { %p5788_p10 = scmp.ne.s32.totalorder %s34_s28, %s5787_s6  ;;  %p5793_p12 = scmp.lt.s32.totalorder %s5787_s6, %s5787_s6 }
  0x3e   :  { %p5794_p13 = por %p5793_p12, %p5792_p11 }
  0x40   :  { %p5795_p0 = pnand %p5794_p13, %p5788_p10 }
  0x42   :  { %5798 = shalt.err (!%p5795_p0)
}
  0x43   :  { %39 = dma.hbm_to_vmem [thread:$0]  %s6656_s2, 896, %s34_s28, [#allocation6], %s5878_s14, %s5878_s14, %s5879_s15  }
  0x44   :  { %s5799_s25 = scalar_lea.hbm %s6659_s5, 1024 }
  0x45   :  { %p5800_p1 = scmp.ne.s32.totalorder %s6659_s5, %s5799_s25  ;;  %p5803_p2 = scmp.lt.u32.totalorder %s5799_s25, %s6659_s5 }
  0x47   :  { %p5805_p3 = pnand %p5803_p2, %p5800_p1 }
  0x49   :  { %5808 = shalt.err (!%p5805_p3)
}
  0x4a   :  { %s5809_s29 = scalar_lea.vmem %s5997_s30, 1024  ;;  %p5814_p5 = scmp.lt.s32.totalorder %s5997_s30, %s5997_s30 }
  0x4b   :  { %p5810_p4 = scmp.ne.s32.totalorder %s5997_s30, %s5809_s29  ;;  %p5815_p6 = scmp.lt.s32.totalorder %s5809_s29, %s5809_s29 }
  0x4d   :  { %p5816_p7 = por %p5815_p6, %p5814_p5 }
  0x4f   :  { %p5817_p8 = pnand %p5816_p7, %p5810_p4 }
  0x51   :  { %5820 = shalt.err (!%p5817_p8)
}
  0x52   :  { %65 = dma.hbm_to_vmem [thread:$0]  %s6659_s5, 1024, %s5997_s30, [#allocation8], %s5878_s14, %s5878_s14, %s5879_s15  }
  0x53   :  { %s5882_s12 = smov [#allocation12]   ;;  %s5883_s16 = smov [#allocation13]  }
  0x54   :  { %s83_s13 = sshll.u32 %s5882_s12, 4  ;;  %s95_s17 = sshll.u32 %s5883_s16, 4  ;;  %s84_s13 = int_to_ptr.vmem [resolvable:$true] %s83_s13  ;;  %s6034_s17 = int_to_ptr.vmem [resolvable:$true] %s95_s17 }
  0x55   :  { %s5821_s20 = scalar_lea.hbm %s6661_s7, 2048 }
  0x56   :  { %p5822_p9 = scmp.ne.s32.totalorder %s6661_s7, %s5821_s20  ;;  %p5825_p10 = scmp.lt.u32.totalorder %s5821_s20, %s6661_s7 }
  0x58   :  { %p5827_p11 = pnand %p5825_p10, %p5822_p9 }
  0x5a   :  { %5830 = shalt.err (!%p5827_p11)
}
  0x5b   :  { %s5831_s5 = scalar_lea.vmem %s84_s13, 2048  ;;  %p5836_p13 = scmp.lt.s32.totalorder %s84_s13, %s84_s13 }
  0x5c   :  { %p5832_p12 = scmp.ne.s32.totalorder %s84_s13, %s5831_s5  ;;  %p5837_p0 = scmp.lt.s32.totalorder %s5831_s5, %s5831_s5 }
  0x5e   :  { %p5838_p1 = por %p5837_p0, %p5836_p13 }
  0x60   :  { %p5839_p2 = pnand %p5838_p1, %p5832_p12 }
  0x62   :  { %5842 = shalt.err (!%p5839_p2)
}
  0x63   :  { %89 = dma.hbm_to_vmem [thread:$0]  %s6661_s7, 2048, %s84_s13, [#allocation11], %s5878_s14, %s5878_s14, %s5879_s15  }
  0x64   :  { %s5843_s4 = scalar_lea.hbm %s6662_s8, 256 }
  0x65   :  { %p5844_p3 = scmp.ne.s32.totalorder %s6662_s8, %s5843_s4  ;;  %p5847_p4 = scmp.lt.u32.totalorder %s5843_s4, %s6662_s8 }
  0x67   :  { %p5849_p5 = pnand %p5847_p4, %p5844_p3 }
  0x69   :  { %5852 = shalt.err (!%p5849_p5)
}
  0x6a   :  { %s5853_s28 = scalar_lea.vmem %s6034_s17, 256  ;;  %p5858_p7 = scmp.lt.s32.totalorder %s6034_s17, %s6034_s17 }
  0x6b   :  { %p5854_p6 = scmp.ne.s32.totalorder %s6034_s17, %s5853_s28  ;;  %p5859_p8 = scmp.lt.s32.totalorder %s5853_s28, %s5853_s28 }
  0x6d   :  { %p5860_p9 = por %p5859_p8, %p5858_p7 }
  0x6f   :  { %p5861_p10 = pnand %p5860_p9, %p5854_p6 }
  0x71   :  { %5864 = shalt.err (!%p5861_p10)
}
  0x72   :  { %101 = dma.hbm_to_vmem [thread:$0]  %s6662_s8, 256, %s6034_s17, [#allocation14], %s5878_s14, %s5878_s14, %s5879_s15  }
  0x73   :  { %5867 = dma.done.wait [#allocation6], 896  }
  0x74   :  { %5868 = vsyncadd [#allocation6], 4294966400 }
  0x75   :  { %5869 = dma.done.wait [#allocation8], 2048  }
  0x76   :  { %5870 = vsyncadd [#allocation8], 4294965248 }
  0x77   :  { %5871 = dma.done.wait [#allocation11], 3072  }
  0x78   :  { %5872 = vsyncadd [#allocation11], 4294964224 }
  0x79   :  { %5873 = dma.done.wait [#allocation14], 256  }
  0x7a   :  { %5874 = vsyncadd [#allocation14], 4294967040  ;;  %s124_s13 = sld [smem:[#allocation4]]  ;;  %s4950_s16 = sld [smem:[#allocation4 + $0x1]]  ;;  %v237_v0 = vld [vmem:[#allocation7] sm:$0xff]  ;;  %v238_v1 = vld [vmem:[#allocation7 + $0x8] sm:$0xff] }
  0x7b   :  { %s4951_s18 = sld [smem:[#allocation4 + $0x2]]  ;;  %s6071_s19 = sld [smem:[#allocation4 + $0x3]]  ;;  %v239_v2 = vld [vmem:[#allocation7 + $0x10] sm:$0xff]  ;;  %vm129_vm0 = vcmask 253952   ;;  %v5539_v3 = vpack.c.bf16 %v238_v1, %v237_v0  ;;  %v240_v4 = vld [vmem:[#allocation7 + $0x18] sm:$0xff]  ;;  %vm245_vm1 = vcmask 261120   ;;  %v327_v1 = vlaneseq }
  0x7c   :  { %s6073_s20 = sld [smem:[#allocation4 + $0x4]]  ;;  %s6075_s6 = sld [smem:[#allocation4 + $0x5]]  ;;  %v127_v6 = vld [vmem:[%s6657_s3] sm:$0x1]  ;;  %v5543_v7 = vpack.c.bf16 %v240_v4, %v239_v2  ;;  %v134_v10 = vld [vmem:[%s6657_s3 + $0x1] sm:$0x1] }
  0x7d   :  { %s6077_s24 = sld [smem:[#allocation4 + $0x6]]  ;;  %s6079_s8 = sld [smem:[#allocation4 + $0x7]]  ;;  %5540 = vmatprep.subr.bf16.mxu0 %v5539_v3  ;;  %v140_v13 = vld [vmem:[%s6657_s3 + $0x2] sm:$0x1]  ;;  %v146_v14 = vld [vmem:[%s6657_s3 + $0x3] sm:$0x1] }
  0x7e   :  { %s6081_s14 = sld [smem:[#allocation4 + $0x8]]  ;;  %s6083_s15 = sld [smem:[#allocation4 + $0x9]]  ;;  %5542 = vmatpush3.bf16.msra.mxu0 %v5539_v3  ;;  %v152_v18 = vld [vmem:[%s6657_s3 + $0x4] sm:$0x1]  ;;  %v158_v21 = vld [vmem:[%s6657_s3 + $0x5] sm:$0x1] }
  0x7f   :  { %s6085_s17 = sld [smem:[#allocation4 + $0xa]]  ;;  %s6087_s21 = sld [smem:[#allocation4 + $0xb]]  ;;  %5544 = vmatprep.subr.bf16.mxu0 %v5543_v7  ;;  %v164_v22 = vld [vmem:[%s6657_s3 + $0x6] sm:$0x1]  ;;  %v170_v28 = vld [vmem:[%s6657_s3 + $0x7] sm:$0x1] }
  0x80   :  { %s125_s22 = scalar_lea.vmem [#allocation5], %s124_s13  ;;  %s132_s0 = scalar_lea.vmem [#allocation5], %s4950_s16  ;;  %v176_v31 = vld [vmem:[%s6657_s3] sm:$0x1]  ;;  %v182_v32 = vld [vmem:[%s6657_s3 + $0x1] sm:$0x1] }
  0x81   :  { %v126_v5 = vld [vmem:[%s125_s22] sm:$0x1]  ;;  %s138_s4 = scalar_lea.vmem [#allocation5], %s4951_s18  ;;  %s144_s28 = scalar_lea.vmem [#allocation5], %s6071_s19  ;;  %v188_v36 = vld [vmem:[%s6657_s3 + $0x2] sm:$0x1] }
  0x82   :  { %v128_v8 = vadd.f32 %v127_v6, %v126_v5  ;;  %v133_v9 = vld [vmem:[%s132_s0] sm:$0x1]  ;;  %s150_s7 = scalar_lea.vmem [#allocation5], %s6073_s20  ;;  %s156_s20 = scalar_lea.vmem [#allocation5], %s6075_s6  ;;  %5546 = vmatpush3.bf16.msra.mxu0 %v5543_v7  ;;  %v194_v39 = vld [vmem:[%s6657_s3 + $0x3] sm:$0x1] }
  0x83   :  { %v139_v11 = vld [vmem:[%s138_s4] sm:$0x1]  ;;  %v135_v12 = vadd.f32 %v134_v10, %v133_v9  ;;  %s162_s5 = scalar_lea.vmem [#allocation5], %s6077_s24  ;;  %s168_s30 = scalar_lea.vmem [#allocation5], %s6079_s8  ;;  %v200_v42 = vld [vmem:[%s6657_s3 + $0x4] sm:$0x1] }
  0x84   :  { %130 = vst.msk [vmem:[#allocation2] sm:$0x1] %vm129_vm0, %v128_v8  ;;  %v141_v15 = vadd.f32 %v140_v13, %v139_v11  ;;  %v145_v16 = vld [vmem:[%s144_s28] sm:$0x1]  ;;  %s174_s26 = scalar_lea.vmem [#allocation5], %s6081_s14  ;;  %s180_s8 = scalar_lea.vmem [#allocation5], %s6083_s15 }
  0x85   :  { %v151_v17 = vld [vmem:[%s150_s7] sm:$0x1]  ;;  %136 = vst.msk [vmem:[#allocation2 + $0x1] sm:$0x1] %vm129_vm0, %v135_v12  ;;  %v147_v19 = vadd.f32 %v146_v14, %v145_v16  ;;  %s186_s14 = scalar_lea.vmem [#allocation5], %s6085_s17  ;;  %s4961_s7 = sld [smem:[#allocation4 + $0xc]] }
  0x86   :  { %v153_v20 = vadd.f32 %v152_v18, %v151_v17  ;;  %142 = vst.msk [vmem:[#allocation2 + $0x2] sm:$0x1] %vm129_vm0, %v141_v15  ;;  %v157_v23 = vld [vmem:[%s156_s20] sm:$0x1]  ;;  %s192_s12 = scalar_lea.vmem [#allocation5], %s6087_s21  ;;  %s4962_s15 = sld [smem:[#allocation4 + $0xd]] }
  0x87   :  { %v163_v24 = vld [vmem:[%s162_s5] sm:$0x1]  ;;  %148 = vst.msk [vmem:[#allocation2 + $0x3] sm:$0x1] %vm129_vm0, %v147_v19  ;;  %v159_v25 = vadd.f32 %v158_v21, %v157_v23  ;;  %s4963_s17 = sld [smem:[#allocation4 + $0xe]]  ;;  %s4964_s13 = sld [smem:[#allocation4 + $0xf]] }
  0x88   :  { %154 = vst.msk [vmem:[#allocation2 + $0x4] sm:$0x1] %vm129_vm0, %v153_v20  ;;  %v165_v26 = vadd.f32 %v164_v22, %v163_v24  ;;  %v169_v27 = vld [vmem:[%s168_s30] sm:$0x1]  ;;  %v206_v43 = vld [vmem:[%s6657_s3 + $0x5] sm:$0x1] }
  0x89   :  { %v175_v29 = vld [vmem:[%s174_s26] sm:$0x1]  ;;  %v171_v30 = vadd.f32 %v170_v28, %v169_v27  ;;  %160 = vst.msk [vmem:[#allocation2 + $0x5] sm:$0x1] %vm129_vm0, %v159_v25  ;;  %v212_v46 = vld [vmem:[%s6657_s3 + $0x6] sm:$0x1] }
  0x8a   :  { %166 = vst.msk [vmem:[#allocation2 + $0x6] sm:$0x1] %vm129_vm0, %v165_v26  ;;  %v177_v33 = vadd.f32 %v176_v31, %v175_v29  ;;  %v181_v34 = vld [vmem:[%s180_s8] sm:$0x1]  ;;  %v218_v49 = vld [vmem:[%s6657_s3 + $0x7] sm:$0x1] }
  0x8b   :  { %v187_v35 = vld [vmem:[%s186_s14] sm:$0x1]  ;;  %172 = vst.msk [vmem:[#allocation2 + $0x7] sm:$0x1] %vm129_vm0, %v171_v30  ;;  %v183_v37 = vadd.f32 %v182_v32, %v181_v34  ;;  %s198_s21 = scalar_lea.vmem [#allocation5], %s4961_s7  ;;  %v5884_v56 = vmov 0.0  }
  0x8c   :  { %v189_v38 = vadd.f32 %v188_v36, %v187_v35  ;;  %178 = vst.msk [vmem:[#allocation2 + $0x8] sm:$0x1] %vm129_vm0, %v177_v33  ;;  %v193_v40 = vld [vmem:[%s192_s12] sm:$0x1]  ;;  %s204_s30 = scalar_lea.vmem [#allocation5], %s4962_s15  ;;  %5217 = vmatprep.subr.mxu1 %v5884_v56  ;;  %5227 = vmatprep.subr.mxu0 %v5884_v56  ;;  %vm5885_vm2 = vmmov 0  }
  0x8d   :  { %184 = vst.msk [vmem:[#allocation2 + $0x9] sm:$0x1] %vm129_vm0, %v183_v37  ;;  %v195_v41 = vadd.f32 %v194_v39, %v193_v40  ;;  %v199_v45 = vld [vmem:[%s198_s21] sm:$0x1]  ;;  %s210_s26 = scalar_lea.vmem [#allocation5], %s4963_s17  ;;  %s216_s6 = scalar_lea.vmem [#allocation5], %s4964_s13  ;;  %5219 = vmatprep.mubr.msk.f32.mxu1 %vm5885_vm2, %v5884_v56 }
  0x8e   :  { %190 = vst.msk [vmem:[#allocation2 + $0xa] sm:$0x1] %vm129_vm0, %v189_v38  ;;  %v201_v47 = vadd.f32 %v200_v42, %v199_v45  ;;  %v205_v48 = vld [vmem:[%s204_s30] sm:$0x1]  ;;  %v4965_v57 = vld [vmem:[#allocation13] ss:$0 sm:$0xff] }
  0x8f   :  { %196 = vst.msk [vmem:[#allocation2 + $0xb] sm:$0x1] %vm129_vm0, %v195_v41  ;;  %v207_v50 = vadd.f32 %v206_v43, %v205_v48  ;;  %v211_v51 = vld [vmem:[%s210_s26] sm:$0x1]  ;;  %s5886_s3 = smov 120   ;;  %s5887_s24 = smov 96  }
  0x90   :  { %202 = vst.msk [vmem:[#allocation2 + $0xc] sm:$0x1] %vm129_vm0, %v201_v47  ;;  %v213_v52 = vadd.f32 %v212_v46, %v211_v51  ;;  %v217_v53 = vld [vmem:[%s216_s6] sm:$0x1]  ;;  %s5888_s4 = smov 88   ;;  %vm334_vm3 = vcmask 64512  }
  0x91   :  { %208 = vst.msk [vmem:[#allocation2 + $0xd] sm:$0x1] %vm129_vm0, %v207_v50  ;;  %v219_v54 = vadd.f32 %v218_v49, %v217_v53  ;;  %v223_v2 = vld [vmem:[%s6655_s1] sm:$0x1]  ;;  %v6200_v4 = vshrl.u32 %v327_v1, 7  ;;  %s5889_s14 = smov 56  }
  0x92   :  { %v6152_v44 = vld [vmem:[#allocation2] sm:$0xff]  ;;  %214 = vst.msk [vmem:[#allocation2 + $0xe] sm:$0x1] %vm129_vm0, %v213_v52  ;;  %v224_v3 = vsub.f32 1.0, %v223_v2  ;;  %s5890_s27 = smov 64   ;;  %s5891_s29 = smov 80  }
  0x93   :  { %5214 = vmatprep.mubr.msk.f32.mxu0 %vm245_vm1, %v6152_v44  ;;  %220 = vst.msk [vmem:[#allocation2 + $0xf] sm:$0x1] %vm129_vm0, %v219_v54  ;;  %v329_v6 = vsub.s32 0, %v6200_v4  ;;  %s5892_s2 = smov 112   ;;  %v6221_v26 = vld [vmem:[#allocation9 + $0x8] sm:$0xff]  ;;  %v6233_v35 = vld [vmem:[#allocation9] sm:$0xff] }
  0x94   :  { %v225_v5 = vmul.f32 -1e+09, %v224_v3  ;;  %s5893_s28 = smov 72   ;;  %s5894_s7 = smov 104   ;;  %v6270_v3 = vld [vmem:[#allocation9 + $0x10] sm:$0xff]  ;;  %vm2412_vm4 = vcmask 523264  }
  0x95   :  { %s5895_s12 = smov 48   ;;  %s5896_s15 = smov 40  }
  0x96   :  { %v6205_v7 = vrot.slane %v225_v5, %v329_v6 }
  0x9a   :  { %v6166_v55 = vld [vmem:[#allocation2 + $0x8] sm:$0xff] }
  0x9b   :  { %5215 = vmatmul.mubr.msk.f32.vlgmr.msra.gmra.mrb[0].mxu0 %vm245_vm1, %v6166_v55 }
  0x9c   :  { %5229 = vmatprep.mubr.msk.f32.mxu0 %vm5885_vm2, %v5884_v56 }
 0x16e   :  { %v5216_v58 = vpop.f32.mrb[0].mxu0 }
 0x16f   :  { %v6176_v59 = vadd.f32 %v5216_v58, %v4965_v57  ;;  %v318_v60 = vpop.f32.mrb[1].mxu0 }
 0x170   :  { %v6178_v61 = vadd.f32 %v4965_v57, %v318_v60 }
 0x172   :  { %497 = vrot.lane.b32.xlu1 %v6178_v61, %s5886_s3  ;;  %332 = vrot.lane.b32.xlu0 %v6178_v61, %s5887_s24 }
 0x176   :  { %499 = vrot.lane.b32.xlu0 %v6178_v61, %s5888_s4 }
 0x1e4   :  { %v333_v62 = vpop.permute.xlu0 %332  ;;  %v498_v0 = vpop.permute.xlu1 %497 }
 0x1e5   :  { %5218 = vmatpush3.xpose.msk.msra.mxu1 %vm334_vm3, %v333_v62 }
 0x1e6   :  { %5222 = vmatprep.subr.mxu1 %v5884_v56 }
 0x1e8   :  { %5220 = vmatmul.mubr.msk.f32.vlgmr.msra.gmra.mrb[0].mxu1 %vm334_vm3, %v6178_v61  ;;  %v500_v63 = vpop.permute.xlu0 %499 }
 0x1e9   :  { %5228 = vmatpush3.xpose.msk.msra.mxu0 %vm334_vm3, %v500_v63  ;;  %5224 = vmatprep.mubr.msk.f32.mxu1 %vm5885_vm2, %v5884_v56 }
 0x1ea   :  { %5237 = vmatprep.subr.mxu0 %v5884_v56 }
 0x1ec   :  { %5230 = vmatmul.mubr.msk.f32.vlgmr.msra.gmra.mrb[2].mxu0 %vm334_vm3, %v498_v0 }
 0x1ed   :  { %5239 = vmatprep.mubr.msk.f32.mxu0 %vm5885_vm2, %v5884_v56  ;;  %5238 = vmatpush3.msra.mxu0 %v6221_v26 }
 0x1ee   :  { %5247 = vmatprep.subr.mxu0 %v5884_v56 }
 0x2bb   :  { %v405_v8 = vpop.f32.mrb[0].mxu1 }
 0x2bc   :  { %v406_v9 = vadd.f32 %v405_v8, %v6205_v7  ;;  %v5221_v10 = vpop.f32.mrb[1].mxu1 }
 0x2be   :  { %v409_v11 = vsel %vm334_vm3, %v406_v9, -inf }
 0x2bf   :  { %410 = vmax.xlane.f32.xlu1 %v409_v11  ;;  %v571_v12 = vpop.f32.mrb[2].mxu0 }
 0x2c0   :  { %v572_v13 = vadd.f32 %v571_v12, %v6205_v7  ;;  %v5231_v14 = vpop.f32.mrb[3].mxu0 }
 0x2c2   :  { %v575_v15 = vsel %vm334_vm3, %v572_v13, -inf }
 0x2c3   :  { %576 = vmax.xlane.f32.xlu0 %v575_v15 }
 0x34c   :  { %v411_v16 = vpop.xlane.xlu1 %410 }
 0x34d   :  { %v412_v17 = vsub.f32 %v406_v9, %v411_v16 }
 0x34f   :  { %v413_v18 = vmul.f32 1.442695, %v412_v17 }
 0x350   :  { %v577_v19 = vpop.xlane.xlu0 %576 }
 0x351   :  { %5633 = vpow2.f32 %v413_v18  ;;  %v578_v20 = vsub.f32 %v572_v13, %v577_v19 }
 0x353   :  { %v579_v21 = vmul.f32 1.442695, %v578_v20 }
 0x355   :  { %5635 = vpow2.f32 %v579_v21 }
 0x35b   :  { %v5634_v22 = vpop.eup %5633 }
 0x35c   :  { %v415_v23 = vsel %vm334_vm3, %v5634_v22, 0.0 }
 0x35d   :  { %416 = vadd.xlane.f32.xlu0 %v415_v23 }
 0x35f   :  { %v5636_v24 = vpop.eup %5635 }
 0x360   :  { %v581_v25 = vsel %vm334_vm3, %v5636_v24, 0.0 }
 0x361   :  { %582 = vadd.xlane.f32.xlu1 %v581_v25 }
 0x372   :  { %586 = vrot.lane.b32.xlu1 %v6178_v61, %s5889_s14 }
 0x373   :  { %420 = vrot.lane.b32.xlu0 %v6178_v61, %s5890_s27 }
 0x376   :  { %811 = vrot.lane.b32.xlu1 %v6178_v61, %s5891_s29 }
 0x377   :  { %809 = vrot.lane.b32.xlu0 %v6178_v61, %s5892_s2 }
 0x3ea   :  { %v417_v27 = vpop.xlane.xlu0 %416 }
 0x3eb   :  { %5637 = vrcp.f32 %v417_v27 }
 0x3ee   :  { %v583_v28 = vpop.xlane.xlu1 %582  ;;  %v421_v29 = vpop.permute.xlu0 %420 }
 0x3ef   :  { %5639 = vrcp.f32 %v583_v28  ;;  %5223 = vmatpush3.msra.mxu1 %v421_v29  ;;  %v6306_v28 = vld [vmem:[#allocation9 + $0x18] sm:$0xff] }
 0x3f0   :  { %5232 = vmatprep.subr.mxu1 %v5884_v56  ;;  %v226_v29 = vld [vmem:[%s6655_s1 + $0x1] sm:$0x1] }
 0x3f2   :  { %v587_v32 = vpop.permute.xlu1 %586  ;;  %v810_v41 = vpop.permute.xlu0 %809 }
 0x3f5   :  { %v5638_v30 = vpop.eup %5637 }
 0x3f6   :  { %v419_v31 = vmul.f32 %v5638_v30, %v5634_v22  ;;  %v812_v39 = vpop.permute.xlu1 %811  ;;  %v227_v30 = vsub.f32 1.0, %v226_v29 }
 0x3f8   :  { %5225 = vmatmul.mubr.msk.f32.vlgmr.msra.gmra.mrb[2].mxu1 %vm334_vm3, %v419_v31  ;;  %v228_v31 = vmul.f32 -1e+09, %v227_v30 }
 0x3f9   :  { %v5640_v33 = vpop.eup %5639  ;;  %5233 = vmatpush3.msra.mxu1 %v587_v32  ;;  %5234 = vmatprep.mubr.msk.f32.mxu1 %vm5885_vm2, %v5884_v56 }
 0x3fa   :  { %v585_v34 = vmul.f32 %v5640_v33, %v5636_v24  ;;  %5242 = vmatprep.subr.mxu1 %v5884_v56 }
 0x3fc   :  { %5235 = vmatmul.mubr.msk.f32.vlgmr.msra.gmra.mrb[4].mxu1 %vm334_vm3, %v585_v34 }
 0x3fd   :  { %5244 = vmatprep.mubr.msk.f32.mxu1 %vm5885_vm2, %v5884_v56  ;;  %5243 = vmatpush3.msra.mxu1 %v6233_v35 }
 0x3fe   :  { %5252 = vmatprep.subr.mxu1 %v5884_v56 }
 0x4cb   :  { %v492_v36 = vpop.f32.mrb[2].mxu1 }
 0x4cc   :  { %v5226_v37 = vpop.f32.mrb[3].mxu1  ;;  %5245 = vmatmul.mubr.msk.f32.vlgmr.msra.gmra.mrb[6].mxu1 %vm334_vm3, %v492_v36 }
 0x4cd   :  { %5254 = vmatprep.mubr.msk.f32.mxu1 %vm5885_vm2, %v5884_v56 }
 0x4cf   :  { %v658_v38 = vpop.f32.mrb[4].mxu1 }
 0x4d0   :  { %v5236_v40 = vpop.f32.mrb[5].mxu1  ;;  %5240 = vmatmul.mubr.msk.f32.vlgmr.msra.gmra.mrb[4].mxu0 %vm334_vm3, %v658_v38 }
 0x4d1   :  { %5248 = vmatpush3.xpose.msk.msra.mxu0 %vm334_vm3, %v812_v39  ;;  %5249 = vmatprep.mubr.msk.f32.mxu0 %vm5885_vm2, %v5884_v56 }
 0x4d2   :  { %5257 = vmatprep.subr.mxu0 %v5884_v56 }
 0x4d4   :  { %5250 = vmatmul.mubr.msk.f32.vlgmr.msra.gmra.mrb[6].mxu0 %vm334_vm3, %v810_v41 }
 0x4d5   :  { %5259 = vmatprep.mubr.msk.f32.mxu0 %vm5885_vm2, %v5884_v56  ;;  %5258 = vmatpush3.msra.mxu0 %v6270_v3 }
 0x4d6   :  { %5267 = vmatprep.subr.mxu0 %v5884_v56 }
 0x59f   :  { %v805_v42 = vpop.f32.mrb[6].mxu1 }
 0x5a0   :  { %v5246_v43 = vpop.f32.mrb[7].mxu1 }
 0x5a3   :  { %v732_v45 = vpop.f32.mrb[4].mxu0 }
 0x5a4   :  { %v6248_v46 = vadd.f32 %v805_v42, %v732_v45  ;;  %v5241_v47 = vpop.f32.mrb[5].mxu0 }
 0x5a7   :  { %v883_v48 = vpop.f32.mrb[6].mxu0 }
 0x5a8   :  { %v884_v49 = vadd.f32 %v883_v48, %v6205_v7  ;;  %v5251_v50 = vpop.f32.mrb[7].mxu0 }
 0x5aa   :  { %v887_v51 = vsel %vm334_vm3, %v884_v49, -inf }
 0x5ab   :  { %888 = vmax.xlane.f32.xlu1 %v887_v51 }
 0x5bc   :  { %1051 = vrot.lane.b32.xlu1 %v6178_v61, %s5893_s28 }
 0x5c0   :  { %1049 = vrot.lane.b32.xlu1 %v6178_v61, %s5894_s7 }
 0x5c4   :  { %1294 = vrot.lane.b32.xlu1 %v6176_v59, %s5887_s24 }
 0x638   :  { %v889_v52 = vpop.xlane.xlu1 %888 }
 0x639   :  { %v890_v53 = vsub.f32 %v884_v49, %v889_v52 }
 0x63b   :  { %v891_v54 = vmul.f32 1.442695, %v890_v53 }
 0x63c   :  { %v1052_v0 = vpop.permute.xlu1 %1051 }
 0x63d   :  { %5641 = vpow2.f32 %v891_v54 }
 0x640   :  { %v1050_v2 = vpop.permute.xlu1 %1049 }
 0x644   :  { %v1295_v21 = vpop.permute.xlu1 %1294 }
 0x647   :  { %v5642_v57 = vpop.eup %5641 }
 0x648   :  { %v893_v58 = vsel %vm334_vm3, %v5642_v57, 0.0 }
 0x649   :  { %894 = vadd.xlane.f32.xlu0 %v893_v58 }
 0x65f   :  { %898 = vrot.lane.b32.xlu0 %v6178_v61, %s5895_s12 }
 0x6d6   :  { %v895_v60 = vpop.xlane.xlu0 %894 }
 0x6d7   :  { %5643 = vrcp.f32 %v895_v60 }
 0x6da   :  { %v899_v62 = vpop.permute.xlu0 %898 }
 0x6db   :  { %5253 = vmatpush3.msra.mxu1 %v899_v62 }
 0x6dc   :  { %5262 = vmatprep.subr.mxu1 %v5884_v56 }
 0x6e1   :  { %v5644_v63 = vpop.eup %5643 }
 0x6e2   :  { %v897_v1 = vmul.f32 %v5644_v63, %v5642_v57 }
 0x6e4   :  { %5255 = vmatmul.mubr.msk.f32.vlgmr.msra.gmra.mrb[8].mxu1 %vm334_vm3, %v897_v1 }
 0x6e5   :  { %5263 = vmatpush3.xpose.msk.msra.mxu1 %vm334_vm3, %v1052_v0  ;;  %5264 = vmatprep.mubr.msk.f32.mxu1 %vm5885_vm2, %v5884_v56 }
 0x6e6   :  { %5272 = vmatprep.subr.mxu1 %v5884_v56 }
 0x6e8   :  { %5265 = vmatmul.mubr.msk.f32.vlgmr.msra.gmra.mrb[10].mxu1 %vm334_vm3, %v1050_v2 }
 0x6e9   :  { %5274 = vmatprep.mubr.msk.f32.mxu1 %vm5885_vm2, %v5884_v56  ;;  %5273 = vmatpush3.msra.mxu1 %v6306_v28 }
 0x6ea   :  { %5282 = vmatprep.subr.mxu1 %v5884_v56 }
 0x7b7   :  { %v970_v5 = vpop.f32.mrb[8].mxu1 }
 0x7b8   :  { %v5256_v8 = vpop.f32.mrb[9].mxu1  ;;  %5260 = vmatmul.mubr.msk.f32.vlgmr.msra.gmra.mrb[8].mxu0 %vm334_vm3, %v970_v5 }
 0x7b9   :  { %5269 = vmatprep.mubr.msk.f32.mxu0 %vm5885_vm2, %v5884_v56 }
 0x7bb   :  { %v1123_v9 = vpop.f32.mrb[10].mxu1 }
 0x7bc   :  { %v1124_v10 = vadd.f32 %v1123_v9, %v6205_v7  ;;  %v5266_v11 = vpop.f32.mrb[11].mxu1 }
 0x7be   :  { %v1127_v12 = vsel %vm334_vm3, %v1124_v10, -inf }
 0x7bf   :  { %1128 = vmax.xlane.f32.xlu0 %v1127_v12 }
 0x7d5   :  { %1138 = vrot.lane.b32.xlu0 %v6178_v61, %s5896_s15 }
 0x7d9   :  { %1459 = vrot.lane.b32.xlu0 %v6176_v59, %s5888_s4 }
 0x84c   :  { %v1129_v13 = vpop.xlane.xlu0 %1128 }
 0x84d   :  { %v1130_v14 = vsub.f32 %v1124_v10, %v1129_v13 }
 0x84f   :  { %v1131_v15 = vmul.f32 1.442695, %v1130_v14 }
 0x850   :  { %v1139_v16 = vpop.permute.xlu0 %1138 }
 0x851   :  { %5645 = vpow2.f32 %v1131_v15  ;;  %5268 = vmatpush3.msra.mxu0 %v1139_v16 }
 0x852   :  { %5277 = vmatprep.subr.mxu0 %v5884_v56 }
 0x854   :  { %v1460_v25 = vpop.permute.xlu0 %1459 }
 0x85b   :  { %v5646_v17 = vpop.eup %5645 }
 0x85c   :  { %v1133_v18 = vsel %vm334_vm3, %v5646_v17, 0.0 }
 0x85d   :  { %1134 = vadd.xlane.f32.xlu1 %v1133_v18 }
 0x86e   :  { %1457 = vrot.lane.b32.xlu1 %v6176_v59, %s5886_s3 }
 0x88b   :  { %v1044_v19 = vpop.f32.mrb[8].mxu0 }
 0x88c   :  { %v6288_v61 = vadd.f32 %v1044_v19, %v6248_v46  ;;  %v5261_v20 = vpop.f32.mrb[9].mxu0 }
 0x8ea   :  { %v1135_v22 = vpop.xlane.xlu1 %1134 }
 0x8eb   :  { %5647 = vrcp.f32 %v1135_v22 }
 0x8ee   :  { %v1458_v27 = vpop.permute.xlu1 %1457 }
 0x8f5   :  { %v5648_v23 = vpop.eup %5647 }
 0x8f6   :  { %v1137_v24 = vmul.f32 %v5648_v23, %v5646_v17 }
 0x8f8   :  { %5270 = vmatmul.mubr.msk.f32.vlgmr.msra.gmra.mrb[10].mxu0 %vm334_vm3, %v1137_v24 }
 0x8f9   :  { %5278 = vmatpush3.xpose.msk.msra.mxu0 %vm334_vm3, %v1295_v21  ;;  %5279 = vmatprep.mubr.msk.f32.mxu0 %vm5885_vm2, %v5884_v56 }
 0x8fa   :  { %5287 = vmatprep.subr.mxu0 %v5884_v56 }
 0x8fc   :  { %5280 = vmatmul.mubr.msk.f32.vlgmr.msra.gmra.mrb[12].mxu0 %vm334_vm3, %v6176_v59 }
 0x8fd   :  { %5288 = vmatpush3.xpose.msk.msra.mxu0 %vm334_vm3, %v1460_v25  ;;  %5289 = vmatprep.mubr.msk.f32.mxu0 %vm5885_vm2, %v5884_v56 }
 0x8fe   :  { %5297 = vmatprep.subr.mxu0 %v5884_v56 }
 0x900   :  { %5290 = vmatmul.mubr.msk.f32.vlgmr.msra.gmra.mrb[14].mxu0 %vm334_vm3, %v1458_v27 }
 0x901   :  { %5298 = vmatpush3.msra.mxu0 %v6221_v26  ;;  %5299 = vmatprep.mubr.msk.f32.mxu0 %vm5885_vm2, %v5884_v56  ;;  %v6316_v26 = vrot.slane %v228_v31, %v329_v6 }
 0x902   :  { %5307 = vmatprep.subr.mxu0 %v5884_v56 }
 0x9cb   :  { %v1210_v32 = vpop.f32.mrb[10].mxu0 }
 0x9cc   :  { %v5271_v33 = vpop.f32.mrb[11].mxu0  ;;  %5275 = vmatmul.mubr.msk.f32.vlgmr.msra.gmra.mrb[12].mxu1 %vm334_vm3, %v1210_v32  ;;  %v5000_v32 = vld [vmem:[#allocation13 + $0x1] ss:$0 sm:$0xff] }
 0x9cd   :  { %5284 = vmatprep.mubr.msk.f32.mxu1 %vm5885_vm2, %v5884_v56 }
 0x9cf   :  { %v1366_v34 = vpop.f32.mrb[12].mxu0 }
 0x9d0   :  { %v1367_v36 = vadd.f32 %v1366_v34, %v6316_v26  ;;  %v5281_v37 = vpop.f32.mrb[13].mxu0 }
 0x9d2   :  { %v1370_v38 = vsel %vm334_vm3, %v1367_v36, -inf }
 0x9d3   :  { %1371 = vmax.xlane.f32.xlu0 %v1370_v38  ;;  %v1531_v39 = vpop.f32.mrb[14].mxu0 }
 0x9d4   :  { %v1532_v40 = vadd.f32 %v1531_v39, %v6316_v26  ;;  %v5291_v41 = vpop.f32.mrb[15].mxu0 }
 0x9d6   :  { %v1535_v42 = vsel %vm334_vm3, %v1532_v40, -inf }
 0x9d7   :  { %1536 = vmax.xlane.f32.xlu1 %v1535_v42 }
 0x9e8   :  { %1381 = vrot.lane.b32.xlu1 %v6176_v59, %s5890_s27 }
 0x9ec   :  { %1770 = vrot.lane.b32.xlu1 %v6176_v59, %s5891_s29 }
 0x9f0   :  { %1768 = vrot.lane.b32.xlu1 %v6176_v59, %s5892_s2 }
 0xa60   :  { %v1372_v4 = vpop.xlane.xlu0 %1371 }
 0xa61   :  { %v1373_v6 = vsub.f32 %v1367_v36, %v1372_v4 }
 0xa63   :  { %v1374_v43 = vmul.f32 1.442695, %v1373_v6 }
 0xa64   :  { %v1537_v45 = vpop.xlane.xlu1 %1536 }
 0xa65   :  { %5649 = vpow2.f32 %v1374_v43  ;;  %v1538_v46 = vsub.f32 %v1532_v40, %v1537_v45 }
 0xa67   :  { %v1539_v47 = vmul.f32 1.442695, %v1538_v46 }
 0xa68   :  { %v1382_v48 = vpop.permute.xlu1 %1381 }
 0xa69   :  { %5651 = vpow2.f32 %v1539_v47  ;;  %5283 = vmatpush3.msra.mxu1 %v1382_v48 }
 0xa6a   :  { %5292 = vmatprep.subr.mxu1 %v5884_v56 }
 0xa6c   :  { %v1771_v9 = vpop.permute.xlu1 %1770 }
 0xa6f   :  { %v5650_v49 = vpop.eup %5649 }
 0xa70   :  { %v1376_v50 = vsel %vm334_vm3, %v5650_v49, 0.0 }
 0xa71   :  { %1377 = vadd.xlane.f32.xlu0 %v1376_v50 }
 0xa73   :  { %v5652_v51 = vpop.eup %5651 }
 0xa74   :  { %v1541_v52 = vsel %vm334_vm3, %v5652_v51, 0.0 }
 0xa75   :  { %1542 = vadd.xlane.f32.xlu0 %v1541_v52 }
 0xa8b   :  { %1546 = vrot.lane.b32.xlu0 %v6176_v59, %s5889_s14 }
 0xa9f   :  { %v1284_v53 = vpop.f32.mrb[12].mxu1 }
 0xaa0   :  { %v6336_v54 = vadd.f32 %v1284_v53, %v6288_v61  ;;  %v5276_v57 = vpop.f32.mrb[13].mxu1 }
 0xaa2   :  { %v2250_v36 = vadd.f32 %v5000_v32, %v6336_v54 }
 0xafe   :  { %v1378_v58 = vpop.xlane.xlu0 %1377 }
 0xaff   :  { %5653 = vrcp.f32 %v1378_v58 }
 0xb02   :  { %v1543_v60 = vpop.xlane.xlu0 %1542 }
 0xb03   :  { %5655 = vrcp.f32 %v1543_v60 }
 0xb06   :  { %v1547_v0 = vpop.permute.xlu0 %1546 }
 0xb09   :  { %v5654_v62 = vpop.eup %5653 }
 0xb0a   :  { %v1380_v63 = vmul.f32 %v5654_v62, %v5650_v49 }
 0xb0c   :  { %5285 = vmatmul.mubr.msk.f32.vlgmr.msra.gmra.mrb[14].mxu1 %vm334_vm3, %v1380_v63 }
 0xb0d   :  { %v5656_v1 = vpop.eup %5655  ;;  %5293 = vmatpush3.msra.mxu1 %v1547_v0  ;;  %5294 = vmatprep.mubr.msk.f32.mxu1 %vm5885_vm2, %v5884_v56 }
 0xb0e   :  { %v1545_v2 = vmul.f32 %v5656_v1, %v5652_v51  ;;  %5302 = vmatprep.subr.mxu1 %v5884_v56 }
 0xb10   :  { %5295 = vmatmul.mubr.msk.f32.vlgmr.msra.gmra.mrb[16].mxu1 %vm334_vm3, %v1545_v2 }
 0xb11   :  { %5303 = vmatpush3.msra.mxu1 %v6233_v35  ;;  %5304 = vmatprep.mubr.msk.f32.mxu1 %vm5885_vm2, %v5884_v56  ;;  %v1769_v35 = vpop.permute.xlu1 %1768 }
 0xb12   :  { %5312 = vmatprep.subr.mxu1 %v5884_v56 }
 0xbdf   :  { %v1453_v5 = vpop.f32.mrb[14].mxu1 }
 0xbe0   :  { %v5286_v8 = vpop.f32.mrb[15].mxu1  ;;  %5305 = vmatmul.mubr.msk.f32.vlgmr.msra.gmra.mrb[18].mxu1 %vm334_vm3, %v1453_v5 }
 0xbe1   :  { %5314 = vmatprep.mubr.msk.f32.mxu1 %vm5885_vm2, %v5884_v56 }
 0xbe3   :  { %v1618_v10 = vpop.f32.mrb[16].mxu1 }
 0xbe4   :  { %v5296_v11 = vpop.f32.mrb[17].mxu1  ;;  %5300 = vmatmul.mubr.msk.f32.vlgmr.msra.gmra.mrb[16].mxu0 %vm334_vm3, %v1618_v10 }
 0xbe5   :  { %5308 = vmatpush3.xpose.msk.msra.mxu0 %vm334_vm3, %v1771_v9  ;;  %5309 = vmatprep.mubr.msk.f32.mxu0 %vm5885_vm2, %v5884_v56 }
 0xbe6   :  { %5317 = vmatprep.subr.mxu0 %v5884_v56 }
 0xbe8   :  { %5310 = vmatmul.mubr.msk.f32.vlgmr.msra.gmra.mrb[18].mxu0 %vm334_vm3, %v1769_v35 }
 0xbe9   :  { %5318 = vmatpush3.msra.mxu0 %v6270_v3  ;;  %5319 = vmatprep.mubr.msk.f32.mxu0 %vm5885_vm2, %v5884_v56 }
 0xbea   :  { %5327 = vmatprep.subr.mxu0 %v5884_v56 }
 0xcb3   :  { %v1764_v12 = vpop.f32.mrb[18].mxu1 }
 0xcb4   :  { %v5306_v13 = vpop.f32.mrb[19].mxu1 }
 0xcb7   :  { %v1691_v14 = vpop.f32.mrb[16].mxu0 }
 0xcb8   :  { %v1765_v15 = vadd.f32 %v1764_v12, %v1691_v14  ;;  %v5301_v16 = vpop.f32.mrb[17].mxu0 }
 0xcbb   :  { %v1842_v17 = vpop.f32.mrb[18].mxu0 }
 0xcbc   :  { %v1843_v18 = vadd.f32 %v1842_v17, %v6316_v26  ;;  %v5311_v19 = vpop.f32.mrb[19].mxu0  ;;  %v5002_v17 = vld [vmem:[#allocation13 + $0x3] ss:$0 sm:$0xff] }
 0xcbe   :  { %v1846_v61 = vsel %vm334_vm3, %v1843_v18, -inf }
 0xcbf   :  { %1847 = vmax.xlane.f32.xlu0 %v1846_v61  ;;  %v2293_v61 = vld [vmem:[#allocation10] sm:$0xff] }
 0xcd5   :  { %1857 = vrot.lane.b32.xlu0 %v6176_v59, %s5895_s12 }
 0xcd9   :  { %2007 = vrot.lane.b32.xlu0 %v6176_v59, %s5894_s7 }
 0xd4c   :  { %v1848_v3 = vpop.xlane.xlu0 %1847 }
 0xd4d   :  { %v1849_v20 = vsub.f32 %v1843_v18, %v1848_v3  ;;  %v2294_v3 = vld [vmem:[#allocation10 + $0x8] sm:$0xff] }
 0xd4f   :  { %v1850_v21 = vmul.f32 1.442695, %v1849_v20  ;;  %v5547_v20 = vpack.c.bf16 %v2294_v3, %v2293_v61 }
 0xd50   :  { %v1858_v22 = vpop.permute.xlu0 %1857 }
 0xd51   :  { %5657 = vpow2.f32 %v1850_v21  ;;  %5313 = vmatpush3.msra.mxu1 %v1858_v22  ;;  %v2295_v21 = vld [vmem:[#allocation10 + $0x10] sm:$0xff]  ;;  %v2296_v22 = vld [vmem:[#allocation10 + $0x18] sm:$0xff] }
 0xd52   :  { %5322 = vmatprep.subr.mxu1 %v5884_v56 }
 0xd54   :  { %v2008_v31 = vpop.permute.xlu0 %2007 }
 0xd5b   :  { %v5658_v23 = vpop.eup %5657 }
 0xd5c   :  { %v1852_v24 = vsel %vm334_vm3, %v5658_v23, 0.0 }
 0xd5d   :  { %1853 = vadd.xlane.f32.xlu1 %v1852_v24 }
 0xd6e   :  { %2009 = vrot.lane.b32.xlu1 %v6176_v59, %s5893_s28 }
 0xdea   :  { %v1854_v25 = vpop.xlane.xlu1 %1853 }
 0xdeb   :  { %5659 = vrcp.f32 %v1854_v25 }
 0xdee   :  { %v2010_v30 = vpop.permute.xlu1 %2009 }
 0xdf5   :  { %v5660_v27 = vpop.eup %5659 }
 0xdf6   :  { %v1856_v29 = vmul.f32 %v5660_v27, %v5658_v23  ;;  %v5551_v23 = vpack.c.bf16 %v2296_v22, %v2295_v21 }
 0xdf8   :  { %5315 = vmatmul.mubr.msk.f32.vlgmr.msra.gmra.mrb[20].mxu1 %vm334_vm3, %v1856_v29 }
 0xdf9   :  { %5323 = vmatpush3.xpose.msk.msra.mxu1 %vm334_vm3, %v2010_v30  ;;  %5324 = vmatprep.mubr.msk.f32.mxu1 %vm5885_vm2, %v5884_v56 }
 0xdfa   :  { %5332 = vmatprep.subr.mxu1 %v5884_v56 }
 0xdfc   :  { %5325 = vmatmul.mubr.msk.f32.vlgmr.msra.gmra.mrb[22].mxu1 %vm334_vm3, %v2008_v31 }
 0xdfd   :  { %5333 = vmatpush3.msra.mxu1 %v6306_v28  ;;  %5334 = vmatprep.mubr.msk.f32.mxu1 %vm5885_vm2, %v5884_v56  ;;  %v2252_v28 = vadd.f32 %v2250_v36, %v6152_v44 }
 0xdff   :  { %v2254_v41 = vsel %vm245_vm1, %v2252_v28, 0.0 }
 0xecb   :  { %v1929_v33 = vpop.f32.mrb[20].mxu1 }
 0xecc   :  { %v5316_v34 = vpop.f32.mrb[21].mxu1  ;;  %5320 = vmatmul.mubr.msk.f32.vlgmr.msra.gmra.mrb[20].mxu0 %vm334_vm3, %v1929_v33  ;;  %v2297_v33 = vld [vmem:[#allocation12] sm:$0xff] }
 0xecd   :  { %5329 = vmatprep.mubr.msk.f32.mxu0 %vm5885_vm2, %v5884_v56  ;;  %v2298_v34 = vld [vmem:[#allocation12 + $0x8] sm:$0xff] }
 0xece   :  { %v5555_v36 = vpack.c.bf16 %v2298_v34, %v2297_v33 }
 0xecf   :  { %v2081_v37 = vpop.f32.mrb[22].mxu1 }
 0xed0   :  { %v2082_v38 = vadd.f32 %v2081_v37, %v6316_v26  ;;  %v5326_v39 = vpop.f32.mrb[23].mxu1  ;;  %5556 = vmatprep.subr.bf16.mxu1 %v5555_v36  ;;  %v2299_v37 = vld [vmem:[#allocation12 + $0x10] sm:$0xff] }
 0xed2   :  { %v2085_v40 = vsel %vm334_vm3, %v2082_v38, -inf }
 0xed3   :  { %2086 = vmax.xlane.f32.xlu1 %v2085_v40  ;;  %v2301_v40 = vld [vmem:[#allocation12 + $0x20] sm:$0xff] }
 0xed7   :  { %2255 = vadd.xlane.f32.xlu1 %v2254_v41 }
 0xf60   :  { %v2087_v42 = vpop.xlane.xlu1 %2086 }
 0xf61   :  { %v2088_v4 = vsub.f32 %v2082_v38, %v2087_v42  ;;  %v2300_v38 = vld [vmem:[#allocation12 + $0x18] sm:$0xff]  ;;  %v2303_v42 = vld [vmem:[#allocation12 + $0x30] sm:$0xff] }
 0xf62   :  { %v5559_v39 = vpack.c.bf16 %v2300_v38, %v2299_v37 }
 0xf63   :  { %v2089_v6 = vmul.f32 1.442695, %v2088_v4  ;;  %v2304_v4 = vld [vmem:[#allocation12 + $0x38] sm:$0xff] }
 0xf64   :  { %v2256_v54 = vpop.xlane.xlu1 %2255 }
 0xf65   :  { %5661 = vpow2.f32 %v2089_v6  ;;  %v2261_v57 = vmul.f32 0.03125, %v2256_v54  ;;  %v5567_v6 = vpack.c.bf16 %v2304_v4, %v2303_v42 }
 0xf67   :  { %v2263_v62 = vsub.f32 %v2252_v28, %v2261_v57  ;;  %v2302_v28 = vld [vmem:[#allocation12 + $0x28] sm:$0xff] }
 0xf68   :  { %v5563_v41 = vpack.c.bf16 %v2302_v28, %v2301_v40  ;;  %v5009_v40 = vld [vmem:[#allocation13 + $0x4] ss:$0 sm:$0xff] }
 0xf69   :  { %v2265_v2 = vmul.f32 %v2263_v62, %v2263_v62 }
 0xf6b   :  { %v2267_v5 = vsel %vm245_vm1, %v2265_v2, 0.0 }
 0xf6f   :  { %v5662_v43 = vpop.eup %5661 }
 0xf70   :  { %v2091_v45 = vsel %vm334_vm3, %v5662_v43, 0.0 }
 0xf71   :  { %2092 = vadd.xlane.f32.xlu0 %v2091_v45 }
 0xf87   :  { %2096 = vrot.lane.b32.xlu0 %v6176_v59, %s5896_s15 }
 0xf9f   :  { %v2002_v46 = vpop.f32.mrb[20].mxu0 }
 0xfa0   :  { %v2006_v47 = vadd.f32 %v2002_v46, %v1765_v15  ;;  %v5321_v48 = vpop.f32.mrb[21].mxu0 }
 0xffe   :  { %v2093_v49 = vpop.xlane.xlu0 %2092 }
 0xfff   :  { %5663 = vrcp.f32 %v2093_v49 }
0x1002   :  { %v2097_v44 = vpop.permute.xlu0 %2096 }
0x1003   :  { %5328 = vmatpush3.msra.mxu0 %v2097_v44 }
0x1004   :  { %5548 = vmatprep.subr.bf16.mxu0 %v5547_v20 }
0x1009   :  { %v5664_v50 = vpop.eup %5663 }
0x100a   :  { %v2095_v51 = vmul.f32 %v5664_v50, %v5662_v43  ;;  %v5003_v43 = vld [vmem:[#allocation13 + $0x6] ss:$0 sm:$0xff] }
0x100c   :  { %5330 = vmatmul.mubr.msk.f32.vlgmr.msra.gmra.mrb[22].mxu0 %vm334_vm3, %v2095_v51 }
0x100d   :  { %5550 = vmatpush3.bf16.msra.mxu0 %v5547_v20 }
0x100e   :  { %5552 = vmatprep.subr.bf16.mxu0 %v5551_v23 }
0x1011   :  { %5554 = vmatpush3.bf16.msra.mxu0 %v5551_v23 }
0x10df   :  { %v2168_v52 = vpop.f32.mrb[22].mxu0 }
0x10e0   :  { %v5331_v53 = vpop.f32.mrb[23].mxu0  ;;  %5335 = vmatmul.mubr.msk.f32.vlgmr.msra.gmra.mrb[24].mxu1 %vm334_vm3, %v2168_v52 }
0x10e1   :  { %5558 = vmatpush3.bf16.msra.mxu1 %v5555_v36 }
0x10e2   :  { %5560 = vmatprep.subr.bf16.mxu1 %v5559_v39 }
0x10e5   :  { %5562 = vmatpush3.bf16.msra.mxu1 %v5559_v39 }
0x10e6   :  { %5564 = vmatprep.subr.bf16.mxu1 %v5563_v41 }
0x10e9   :  { %5566 = vmatpush3.bf16.msra.mxu1 %v5563_v41  ;;  %v5010_v41 = vld [vmem:[#allocation13 + $0x5] ss:$0 sm:$0xff] }
0x10ea   :  { %5568 = vmatprep.subr.bf16.mxu1 %v5567_v6 }
0x10ed   :  { %5570 = vmatpush3.bf16.msra.mxu1 %v5567_v6 }
0x10ee   :  { %5383 = vmatprep.subr.mxu1 %v5884_v56 }
0x11b3   :  { %v2241_v58 = vpop.f32.mrb[24].mxu1 }
0x11b4   :  { %v2245_v60 = vadd.f32 %v2241_v58, %v2006_v47  ;;  %v5336_v59 = vpop.f32.mrb[25].mxu1 }
0x11b6   :  { %v2251_v63 = vadd.f32 %v5000_v32, %v2245_v60 }
0x11b8   :  { %v2253_v0 = vadd.f32 %v2251_v63, %v6166_v55  ;;  %v5001_v55 = vld [vmem:[#allocation13 + $0x2] ss:$0 sm:$0xff] }
0x11ba   :  { %v2257_v1 = vsel %vm245_vm1, %v2253_v0, 0.0 }
0x11bb   :  { %2258 = vadd.xlane.f32.xlu1 %v2257_v1 }
0x11bf   :  { %2268 = vadd.xlane.f32.xlu1 %v2267_v5 }
0x1248   :  { %v2259_v8 = vpop.xlane.xlu1 %2258 }
0x1249   :  { %v2262_v9 = vmul.f32 0.03125, %v2259_v8 }
0x124b   :  { %v2264_v10 = vsub.f32 %v2253_v0, %v2262_v9  ;;  %v5006_v9 = vld [vmem:[#allocation13 + $0x7] ss:$0 sm:$0xff] }
0x124c   :  { %v2269_v11 = vpop.xlane.xlu1 %2268 }
0x124d   :  { %v2273_v35 = vmul.f32 0.03125, %v2269_v11  ;;  %v2266_v12 = vmul.f32 %v2264_v10, %v2264_v10 }
0x124f   :  { %v2275_v13 = vadd.f32 1e-12, %v2273_v35  ;;  %v2270_v14 = vsel %vm245_vm1, %v2266_v12, 0.0 }
0x1250   :  { %2271 = vadd.xlane.f32.xlu1 %v2270_v14 }
0x1251   :  { %5665 = vrsqrt.f32 %v2275_v13 }
0x125b   :  { %v5666_v15 = vpop.eup %5665 }
0x125c   :  { %v2279_v16 = vmul.f32 %v5666_v15, %v2263_v62 }
0x125e   :  { %v2285_v18 = vmul.f32 %v5001_v55, %v2279_v16 }
0x1260   :  { %v6396_v19 = vadd.f32 %v5002_v17, %v2285_v18 }
0x1262   :  { %5345 = vmatprep.mubr.msk.f32.mxu0 %vm245_vm1, %v6396_v19 }
0x12dd   :  { %v2272_v24 = vpop.xlane.xlu1 %2271 }
0x12de   :  { %v2274_v25 = vmul.f32 0.03125, %v2272_v24  ;;  %v2544_v24 = vld [vmem:[#allocation7 + $0x20] sm:$0xff] }
0x12e0   :  { %v2276_v27 = vadd.f32 1e-12, %v2274_v25  ;;  %v2545_v25 = vld [vmem:[#allocation7 + $0x28] sm:$0xff] }
0x12e2   :  { %5667 = vrsqrt.f32 %v2276_v27  ;;  %v5571_v27 = vpack.c.bf16 %v2545_v25, %v2544_v24 }
0x12e4   :  { %5572 = vmatprep.subr.bf16.mxu0 %v5571_v27 }
0x12ec   :  { %v5668_v29 = vpop.eup %5667 }
0x12ed   :  { %v2280_v30 = vmul.f32 %v5668_v29, %v2264_v10  ;;  %v2546_v29 = vld [vmem:[#allocation7 + $0x30] sm:$0xff] }
0x12ef   :  { %v2286_v31 = vmul.f32 %v5001_v55, %v2280_v30  ;;  %v2547_v30 = vld [vmem:[#allocation7 + $0x38] sm:$0xff] }
0x12f1   :  { %v2292_v32 = vadd.f32 %v5002_v17, %v2286_v31  ;;  %v5575_v31 = vpack.c.bf16 %v2547_v30, %v2546_v29 }
0x12f3   :  { %5346 = vmatmul.mubr.msk.f32.vlgmr.msra.gmra.mrb[24].mxu0 %vm245_vm1, %v2292_v32 }
0x12f4   :  { %5574 = vmatpush3.bf16.msra.mxu0 %v5571_v27 }
0x12f5   :  { %5576 = vmatprep.subr.bf16.mxu0 %v5575_v31 }
0x12f8   :  { %5578 = vmatpush3.bf16.msra.mxu0 %v5575_v31 }
0x12f9   :  { %5378 = vmatprep.subr.mxu0 %v5884_v56 }
0x13c6   :  { %v5347_v45 = vpop.f32.mrb[24].mxu0 }
0x13c7   :  { %v2387_v46 = vadd.f32 %v5347_v45, %v5003_v43  ;;  %v2381_v47 = vpop.f32.mrb[25].mxu0 }
0x13c8   :  { %v2382_v48 = vadd.f32 %v5003_v43, %v2381_v47  ;;  %v5011_v47 = vld [vmem:[#allocation13 + $0x8] ss:$0 sm:$0xff] }
0x13c9   :  { %v2391_v49 = vmul.f32 %v2387_v46, %v2387_v46 }
0x13ca   :  { %v2390_v44 = vmul.f32 %v2382_v48, %v2382_v48 }
0x13cb   :  { %v2393_v50 = vmul.f32 %v2391_v49, %v2387_v46 }
0x13cc   :  { %v2392_v51 = vmul.f32 %v2390_v44, %v2382_v48 }
0x13cd   :  { %v2395_v52 = vmul.f32 0.044715, %v2393_v50 }
0x13ce   :  { %v2394_v53 = vmul.f32 0.044715, %v2392_v51 }
0x13cf   :  { %v2397_v54 = vadd.f32 %v2395_v52, %v2387_v46 }
0x13d0   :  { %v2396_v57 = vadd.f32 %v2394_v53, %v2382_v48 }
0x13d1   :  { %v2399_v58 = vmul.f32 0.7978846, %v2397_v54 }
0x13d2   :  { %v2398_v60 = vmul.f32 0.7978846, %v2396_v57 }
0x13d3   :  { %5669 = vtanh.f32 %v2399_v58 }
0x13d4   :  { %5671 = vtanh.f32 %v2398_v60 }
0x13dd   :  { %v5670_v59 = vpop.eup %5669 }
0x13de   :  { %v5672_v62 = vpop.eup %5671  ;;  %v2403_v63 = vadd.f32 1.0, %v5670_v59 }
0x13df   :  { %v2402_v0 = vadd.f32 1.0, %v5672_v62 }
0x13e0   :  { %v2405_v1 = vmul.f32 0.5, %v2403_v63 }
0x13e1   :  { %v2404_v2 = vmul.f32 0.5, %v2402_v0 }
0x13e2   :  { %v2407_v8 = vmul.f32 %v2405_v1, %v2387_v46 }
0x13e3   :  { %v2406_v5 = vmul.f32 %v2404_v2, %v2382_v48 }
0x13e5   :  { %5364 = vmatprep.mubr.msk.f32.mxu1 %vm2412_vm4, %v2406_v5 }
0x13e6   :  { %5365 = vmatmul.mubr.msk.f32.vlgmr.msra.gmra.mrb[26].mxu1 %vm2412_vm4, %v2407_v8 }
0x13e7   :  { %5385 = vmatprep.mubr.msk.f32.mxu1 %vm5885_vm2, %v5884_v56 }
0x14b9   :  { %v5366_v10 = vpop.f32.mrb[26].mxu1 }
0x14ba   :  { %v2485_v11 = vpop.f32.mrb[27].mxu1  ;;  %v2491_v35 = vadd.f32 %v5366_v10, %v5006_v9 }
0x14bb   :  { %v2486_v12 = vadd.f32 %v5006_v9, %v2485_v11 }
0x14bc   :  { %v2495_v15 = vadd.f32 %v2491_v35, %v2292_v32 }
0x14bd   :  { %v2494_v13 = vadd.f32 %v2486_v12, %v6396_v19 }
0x14be   :  { %v2499_v55 = vsel %vm245_vm1, %v2495_v15, 0.0 }
0x14bf   :  { %v2496_v14 = vsel %vm245_vm1, %v2494_v13, 0.0 }
0x14c0   :  { %2497 = vadd.xlane.f32.xlu1 %v2496_v14 }
0x14c4   :  { %2500 = vadd.xlane.f32.xlu1 %v2499_v55 }
0x154d   :  { %v2498_v16 = vpop.xlane.xlu1 %2497 }
0x154e   :  { %v2502_v17 = vmul.f32 0.03125, %v2498_v16 }
0x1550   :  { %v2504_v18 = vsub.f32 %v2494_v13, %v2502_v17 }
0x1551   :  { %v2501_v61 = vpop.xlane.xlu1 %2500 }
0x1552   :  { %v2503_v3 = vmul.f32 0.03125, %v2501_v61  ;;  %v2506_v20 = vmul.f32 %v2504_v18, %v2504_v18 }
0x1554   :  { %v2505_v21 = vsub.f32 %v2495_v15, %v2503_v3  ;;  %v2508_v22 = vsel %vm245_vm1, %v2506_v20, 0.0  ;;  %v6458_v15 = vld [vmem:[#allocation9 + $0x28] sm:$0xff] }
0x1555   :  { %2509 = vadd.xlane.f32.xlu0 %v2508_v22 }
0x1556   :  { %v2507_v23 = vmul.f32 %v2505_v21, %v2505_v21 }
0x1558   :  { %v2511_v19 = vsel %vm245_vm1, %v2507_v23, 0.0 }
0x1559   :  { %2512 = vadd.xlane.f32.xlu1 %v2511_v19 }
0x15e2   :  { %v2510_v32 = vpop.xlane.xlu0 %2509 }
0x15e3   :  { %v2514_v33 = vmul.f32 0.03125, %v2510_v32 }
0x15e5   :  { %v2516_v34 = vadd.f32 1e-12, %v2514_v33 }
0x15e6   :  { %v2513_v36 = vpop.xlane.xlu1 %2512 }
0x15e7   :  { %5673 = vrsqrt.f32 %v2516_v34  ;;  %v2515_v37 = vmul.f32 0.03125, %v2513_v36 }
0x15e9   :  { %v2517_v38 = vadd.f32 1e-12, %v2515_v37 }
0x15eb   :  { %5675 = vrsqrt.f32 %v2517_v38 }
0x15f1   :  { %v5674_v39 = vpop.eup %5673 }
0x15f2   :  { %v2520_v28 = vmul.f32 %v5674_v39, %v2504_v18 }
0x15f4   :  { %v2526_v42 = vmul.f32 %v5009_v40, %v2520_v28 }
0x15f5   :  { %v5676_v4 = vpop.eup %5675 }
0x15f6   :  { %v2521_v6 = vmul.f32 %v5676_v4, %v2505_v21  ;;  %v6412_v43 = vadd.f32 %v5010_v41, %v2526_v42  ;;  %v6469_v21 = vld [vmem:[#allocation9 + $0x20] sm:$0xff] }
0x15f8   :  { %v2527_v45 = vmul.f32 %v5009_v40, %v2521_v6  ;;  %5375 = vmatprep.mubr.msk.f32.mxu0 %vm245_vm1, %v6412_v43 }
0x15fa   :  { %v6416_v46 = vadd.f32 %v5010_v41, %v2527_v45 }
0x15fc   :  { %5376 = vmatmul.mubr.msk.f32.vlgmr.msra.gmra.mrb[26].mxu0 %vm245_vm1, %v6416_v46 }
0x15fd   :  { %5380 = vmatprep.mubr.msk.f32.mxu0 %vm5885_vm2, %v5884_v56 }
0x16cf   :  { %v5377_v48 = vpop.f32.mrb[26].mxu0 }
0x16d0   :  { %v6422_v49 = vadd.f32 %v5377_v48, %v5011_v47  ;;  %v2624_v44 = vpop.f32.mrb[27].mxu0 }
0x16d1   :  { %v6424_v50 = vadd.f32 %v5011_v47, %v2624_v44 }
0x16d3   :  { %2634 = vrot.lane.b32.xlu1 %v6424_v50, %s5887_s24 }
0x16d7   :  { %2801 = vrot.lane.b32.xlu1 %v6424_v50, %s5888_s4 }
0x16db   :  { %2799 = vrot.lane.b32.xlu1 %v6424_v50, %s5886_s3 }
0x1745   :  { %v2635_v51 = vpop.permute.xlu1 %2634 }
0x1746   :  { %5379 = vmatpush3.xpose.msk.msra.mxu0 %vm334_vm3, %v2635_v51  ;;  %v6502_v51 = vld [vmem:[#allocation9 + $0x30] sm:$0xff] }
0x1747   :  { %5388 = vmatprep.subr.mxu0 %v5884_v56 }
0x1749   :  { %5381 = vmatmul.mubr.msk.f32.vlgmr.msra.gmra.mrb[28].mxu0 %vm334_vm3, %v6424_v50  ;;  %v2802_v52 = vpop.permute.xlu1 %2801 }
0x174a   :  { %5389 = vmatpush3.xpose.msk.msra.mxu0 %vm334_vm3, %v2802_v52  ;;  %5390 = vmatprep.mubr.msk.f32.mxu0 %vm5885_vm2, %v5884_v56 }
0x174b   :  { %5398 = vmatprep.subr.mxu0 %v5884_v56 }
0x174d   :  { %v2800_v53 = vpop.permute.xlu1 %2799 }
0x174e   :  { %5391 = vmatmul.mubr.msk.f32.vlgmr.msra.gmra.mrb[30].mxu0 %vm334_vm3, %v2800_v53 }
0x174f   :  { %5400 = vmatprep.mubr.msk.f32.mxu0 %vm5885_vm2, %v5884_v56  ;;  %5399 = vmatpush3.msra.mxu0 %v6458_v15 }
0x1750   :  { %5408 = vmatprep.subr.mxu0 %v5884_v56 }
0x181c   :  { %v2706_v54 = vpop.f32.mrb[28].mxu0 }
0x181d   :  { %v2707_v57 = vadd.f32 %v2706_v54, %v6205_v7  ;;  %v5382_v58 = vpop.f32.mrb[29].mxu0 }
0x181f   :  { %v2710_v60 = vsel %vm334_vm3, %v2707_v57, -inf }
0x1820   :  { %2711 = vmax.xlane.f32.xlu0 %v2710_v60 }
0x1821   :  { %v2873_v59 = vpop.f32.mrb[30].mxu0 }
0x1822   :  { %v2874_v62 = vadd.f32 %v2873_v59, %v6205_v7  ;;  %v5392_v63 = vpop.f32.mrb[31].mxu0 }
0x1824   :  { %v2877_v0 = vsel %vm334_vm3, %v2874_v62, -inf }
0x1825   :  { %2878 = vmax.xlane.f32.xlu1 %v2877_v0 }
0x1836   :  { %2721 = vrot.lane.b32.xlu0 %v6424_v50, %s5890_s27  ;;  %3113 = vrot.lane.b32.xlu1 %v6424_v50, %s5891_s29 }
0x18ad   :  { %v2712_v1 = vpop.xlane.xlu0 %2711 }
0x18ae   :  { %v2713_v2 = vsub.f32 %v2707_v57, %v2712_v1 }
0x18b0   :  { %v2714_v5 = vmul.f32 1.442695, %v2713_v2 }
0x18b1   :  { %v2722_v8 = vpop.permute.xlu0 %2721 }
0x18b2   :  { %5677 = vpow2.f32 %v2714_v5  ;;  %5384 = vmatpush3.msra.mxu1 %v2722_v8  ;;  %v2879_v9 = vpop.xlane.xlu1 %2878 }
0x18b3   :  { %v2880_v10 = vsub.f32 %v2874_v62, %v2879_v9  ;;  %5393 = vmatprep.subr.mxu1 %v5884_v56 }
0x18b5   :  { %v2881_v11 = vmul.f32 1.442695, %v2880_v10 }
0x18b6   :  { %v3114_v24 = vpop.permute.xlu1 %3113 }
0x18b7   :  { %5679 = vpow2.f32 %v2881_v11 }
0x18bc   :  { %v5678_v35 = vpop.eup %5677 }
0x18bd   :  { %v2716_v12 = vsel %vm334_vm3, %v5678_v35, 0.0 }
0x18be   :  { %2717 = vadd.xlane.f32.xlu0 %v2716_v12 }
0x18c1   :  { %v5680_v13 = vpop.eup %5679 }
0x18c2   :  { %v2883_v14 = vsel %vm334_vm3, %v5680_v13, 0.0 }
0x18c3   :  { %2884 = vadd.xlane.f32.xlu0 %v2883_v14 }
0x18d9   :  { %2888 = vrot.lane.b32.xlu0 %v6424_v50, %s5889_s14 }
0x18dd   :  { %3111 = vrot.lane.b32.xlu0 %v6424_v50, %s5892_s2 }
0x194b   :  { %v2718_v55 = vpop.xlane.xlu0 %2717 }
0x194c   :  { %5681 = vrcp.f32 %v2718_v55 }
0x1950   :  { %v2885_v16 = vpop.xlane.xlu0 %2884 }
0x1951   :  { %5683 = vrcp.f32 %v2885_v16 }
0x1954   :  { %v2889_v61 = vpop.permute.xlu0 %2888 }
0x1956   :  { %v5682_v17 = vpop.eup %5681 }
0x1957   :  { %v2720_v18 = vmul.f32 %v5682_v17, %v5678_v35 }
0x1958   :  { %v3112_v27 = vpop.permute.xlu0 %3111 }
0x1959   :  { %5386 = vmatmul.mubr.msk.f32.vlgmr.msra.gmra.mrb[28].mxu1 %vm334_vm3, %v2720_v18 }
0x195a   :  { %5394 = vmatpush3.msra.mxu1 %v2889_v61  ;;  %5395 = vmatprep.mubr.msk.f32.mxu1 %vm5885_vm2, %v5884_v56 }
0x195b   :  { %v5684_v3 = vpop.eup %5683  ;;  %5403 = vmatprep.subr.mxu1 %v5884_v56 }
0x195c   :  { %v2887_v20 = vmul.f32 %v5684_v3, %v5680_v13  ;;  %v6537_v13 = vld [vmem:[#allocation9 + $0x38] sm:$0xff] }
0x195e   :  { %5396 = vmatmul.mubr.msk.f32.vlgmr.msra.gmra.mrb[30].mxu1 %vm334_vm3, %v2887_v20 }
0x195f   :  { %5405 = vmatprep.mubr.msk.f32.mxu1 %vm5885_vm2, %v5884_v56  ;;  %5404 = vmatpush3.msra.mxu1 %v6469_v21 }
0x1960   :  { %5413 = vmatprep.subr.mxu1 %v5884_v56 }
0x1a2c   :  { %v2793_v22 = vpop.f32.mrb[28].mxu1 }
0x1a2d   :  { %v5387_v23 = vpop.f32.mrb[29].mxu1  ;;  %5406 = vmatmul.mubr.msk.f32.vlgmr.msra.gmra.mrb[32].mxu1 %vm334_vm3, %v2793_v22 }
0x1a2e   :  { %5415 = vmatprep.mubr.msk.f32.mxu1 %vm5885_vm2, %v5884_v56 }
0x1a31   :  { %v2960_v19 = vpop.f32.mrb[30].mxu1 }
0x1a32   :  { %v5397_v25 = vpop.f32.mrb[31].mxu1  ;;  %5401 = vmatmul.mubr.msk.f32.vlgmr.msra.gmra.mrb[32].mxu0 %vm334_vm3, %v2960_v19 }
0x1a33   :  { %5409 = vmatpush3.xpose.msk.msra.mxu0 %vm334_vm3, %v3114_v24  ;;  %5410 = vmatprep.mubr.msk.f32.mxu0 %vm5885_vm2, %v5884_v56 }
0x1a34   :  { %5418 = vmatprep.subr.mxu0 %v5884_v56 }
0x1a36   :  { %5411 = vmatmul.mubr.msk.f32.vlgmr.msra.gmra.mrb[34].mxu0 %vm334_vm3, %v3112_v27 }
0x1a37   :  { %5420 = vmatprep.mubr.msk.f32.mxu0 %vm5885_vm2, %v5884_v56  ;;  %5419 = vmatpush3.msra.mxu0 %v6502_v51 }
0x1a38   :  { %5428 = vmatprep.subr.mxu0 %v5884_v56 }
0x1b00   :  { %v3107_v29 = vpop.f32.mrb[32].mxu1 }
0x1b01   :  { %v5407_v30 = vpop.f32.mrb[33].mxu1 }
0x1b05   :  { %v3034_v31 = vpop.f32.mrb[32].mxu0 }
0x1b06   :  { %v3108_v32 = vadd.f32 %v3107_v29, %v3034_v31  ;;  %v5402_v33 = vpop.f32.mrb[33].mxu0 }
0x1b09   :  { %v3185_v34 = vpop.f32.mrb[34].mxu0 }
0x1b0a   :  { %v3186_v36 = vadd.f32 %v3185_v34, %v6205_v7  ;;  %v5412_v37 = vpop.f32.mrb[35].mxu0 }
0x1b0c   :  { %v3189_v38 = vsel %vm334_vm3, %v3186_v36, -inf }
0x1b0d   :  { %3190 = vmax.xlane.f32.xlu0 %v3189_v38 }
0x1b23   :  { %3200 = vrot.lane.b32.xlu0 %v6424_v50, %s5895_s12 }
0x1b27   :  { %3351 = vrot.lane.b32.xlu0 %v6424_v50, %s5894_s7 }
0x1b9a   :  { %v3191_v39 = vpop.xlane.xlu0 %3190 }
0x1b9b   :  { %v3192_v40 = vsub.f32 %v3186_v36, %v3191_v39 }
0x1b9d   :  { %v3193_v28 = vmul.f32 1.442695, %v3192_v40 }
0x1b9e   :  { %v3201_v41 = vpop.permute.xlu0 %3200 }
0x1b9f   :  { %5685 = vpow2.f32 %v3193_v28  ;;  %5414 = vmatpush3.msra.mxu1 %v3201_v41 }
0x1ba0   :  { %5423 = vmatprep.subr.mxu1 %v5884_v56 }
0x1ba2   :  { %v3352_v44 = vpop.permute.xlu0 %3351 }
0x1ba9   :  { %v5686_v42 = vpop.eup %5685 }
0x1baa   :  { %v3195_v4 = vsel %vm334_vm3, %v5686_v42, 0.0 }
0x1bab   :  { %3196 = vadd.xlane.f32.xlu1 %v3195_v4 }
0x1bbc   :  { %3353 = vrot.lane.b32.xlu1 %v6424_v50, %s5893_s28 }
0x1c38   :  { %v3197_v6 = vpop.xlane.xlu1 %3196 }
0x1c39   :  { %5687 = vrcp.f32 %v3197_v6 }
0x1c3c   :  { %v3354_v48 = vpop.permute.xlu1 %3353 }
0x1c43   :  { %v5688_v45 = vpop.eup %5687 }
0x1c44   :  { %v3199_v47 = vmul.f32 %v5688_v45, %v5686_v42 }
0x1c46   :  { %5416 = vmatmul.mubr.msk.f32.vlgmr.msra.gmra.mrb[34].mxu1 %vm334_vm3, %v3199_v47 }
0x1c47   :  { %5424 = vmatpush3.xpose.msk.msra.mxu1 %vm334_vm3, %v3354_v48  ;;  %5425 = vmatprep.mubr.msk.f32.mxu1 %vm5885_vm2, %v5884_v56 }
0x1c48   :  { %5433 = vmatprep.subr.mxu1 %v5884_v56 }
0x1c4a   :  { %5426 = vmatmul.mubr.msk.f32.vlgmr.msra.gmra.mrb[36].mxu1 %vm334_vm3, %v3352_v44 }
0x1c4b   :  { %5435 = vmatprep.mubr.msk.f32.mxu1 %vm5885_vm2, %v5884_v56  ;;  %5434 = vmatpush3.msra.mxu1 %v6537_v13 }
0x1c4c   :  { %5443 = vmatprep.subr.mxu1 %v5884_v56 }
0x1d19   :  { %v3272_v52 = vpop.f32.mrb[34].mxu1 }
0x1d1a   :  { %v5417_v53 = vpop.f32.mrb[35].mxu1  ;;  %5421 = vmatmul.mubr.msk.f32.vlgmr.msra.gmra.mrb[36].mxu0 %vm334_vm3, %v3272_v52 }
0x1d1b   :  { %5430 = vmatprep.mubr.msk.f32.mxu0 %vm5885_vm2, %v5884_v56 }
0x1d1d   :  { %v3425_v54 = vpop.f32.mrb[36].mxu1 }
0x1d1e   :  { %v3426_v57 = vadd.f32 %v3425_v54, %v6205_v7  ;;  %v5427_v58 = vpop.f32.mrb[37].mxu1 }
0x1d20   :  { %v3429_v60 = vsel %vm334_vm3, %v3426_v57, -inf }
0x1d21   :  { %3430 = vmax.xlane.f32.xlu0 %v3429_v60 }
0x1d37   :  { %3440 = vrot.lane.b32.xlu0 %v6424_v50, %s5896_s15 }
0x1d3b   :  { %3757 = vrot.lane.b32.xlu0 %v6422_v49, %s5888_s4 }
0x1d3f   :  { %3755 = vrot.lane.b32.xlu0 %v6422_v49, %s5886_s3 }
0x1dae   :  { %v3431_v59 = vpop.xlane.xlu0 %3430 }
0x1daf   :  { %v3432_v62 = vsub.f32 %v3426_v57, %v3431_v59 }
0x1db1   :  { %v3433_v63 = vmul.f32 1.442695, %v3432_v62 }
0x1db2   :  { %v3441_v0 = vpop.permute.xlu0 %3440 }
0x1db3   :  { %5689 = vpow2.f32 %v3433_v63  ;;  %5429 = vmatpush3.msra.mxu0 %v3441_v0 }
0x1db4   :  { %5438 = vmatprep.subr.mxu0 %v5884_v56 }
0x1db6   :  { %v3758_v35 = vpop.permute.xlu0 %3757 }
0x1dba   :  { %v3756_v12 = vpop.permute.xlu0 %3755 }
0x1dbd   :  { %v5690_v7 = vpop.eup %5689 }
0x1dbe   :  { %v3435_v1 = vsel %vm334_vm3, %v5690_v7, 0.0 }
0x1dbf   :  { %3436 = vadd.xlane.f32.xlu1 %v3435_v1 }
0x1dd0   :  { %3592 = vrot.lane.b32.xlu1 %v6422_v49, %s5887_s24 }
0x1ded   :  { %v3346_v50 = vpop.f32.mrb[36].mxu0 }
0x1dee   :  { %v3350_v2 = vadd.f32 %v3346_v50, %v3108_v32  ;;  %v5422_v5 = vpop.f32.mrb[37].mxu0 }
0x1e4c   :  { %v3437_v8 = vpop.xlane.xlu1 %3436 }
0x1e4d   :  { %5691 = vrcp.f32 %v3437_v8 }
0x1e50   :  { %v3593_v11 = vpop.permute.xlu1 %3592 }
0x1e57   :  { %v5692_v9 = vpop.eup %5691 }
0x1e58   :  { %v3439_v10 = vmul.f32 %v5692_v9, %v5690_v7 }
0x1e5a   :  { %5431 = vmatmul.mubr.msk.f32.vlgmr.msra.gmra.mrb[38].mxu0 %vm334_vm3, %v3439_v10 }
0x1e5b   :  { %5439 = vmatpush3.xpose.msk.msra.mxu0 %vm334_vm3, %v3593_v11  ;;  %5440 = vmatprep.mubr.msk.f32.mxu0 %vm5885_vm2, %v5884_v56 }
0x1e5c   :  { %5448 = vmatprep.subr.mxu0 %v5884_v56 }
0x1e5e   :  { %5441 = vmatmul.mubr.msk.f32.vlgmr.msra.gmra.mrb[40].mxu0 %vm334_vm3, %v6422_v49 }
0x1e5f   :  { %5449 = vmatpush3.xpose.msk.msra.mxu0 %vm334_vm3, %v3758_v35  ;;  %5450 = vmatprep.mubr.msk.f32.mxu0 %vm5885_vm2, %v5884_v56 }
0x1e60   :  { %5458 = vmatprep.subr.mxu0 %v5884_v56 }
0x1e62   :  { %5451 = vmatmul.mubr.msk.f32.vlgmr.msra.gmra.mrb[42].mxu0 %vm334_vm3, %v3756_v12  ;;  %v5046_v12 = vld [vmem:[#allocation13 + $0x9] ss:$0 sm:$0xff] }
0x1e63   :  { %5459 = vmatpush3.msra.mxu0 %v6458_v15  ;;  %5460 = vmatprep.mubr.msk.f32.mxu0 %vm5885_vm2, %v5884_v56 }
0x1e64   :  { %5468 = vmatprep.subr.mxu0 %v5884_v56 }
0x1f2d   :  { %v3512_v14 = vpop.f32.mrb[38].mxu0 }
0x1f2e   :  { %v5432_v55 = vpop.f32.mrb[39].mxu0  ;;  %5436 = vmatmul.mubr.msk.f32.vlgmr.msra.gmra.mrb[38].mxu1 %vm334_vm3, %v3512_v14 }
0x1f2f   :  { %5445 = vmatprep.mubr.msk.f32.mxu1 %vm5885_vm2, %v5884_v56 }
0x1f31   :  { %v3664_v16 = vpop.f32.mrb[40].mxu0 }
0x1f32   :  { %v3665_v15 = vadd.f32 %v3664_v16, %v6316_v26  ;;  %v5442_v17 = vpop.f32.mrb[41].mxu0 }
0x1f34   :  { %v3668_v18 = vsel %vm334_vm3, %v3665_v15, -inf }
0x1f35   :  { %3669 = vmax.xlane.f32.xlu0 %v3668_v18  ;;  %v3829_v61 = vpop.f32.mrb[42].mxu0 }
0x1f36   :  { %v3830_v3 = vadd.f32 %v3829_v61, %v6316_v26  ;;  %v5452_v20 = vpop.f32.mrb[43].mxu0 }
0x1f38   :  { %v3833_v22 = vsel %vm334_vm3, %v3830_v3, -inf }
0x1f39   :  { %3834 = vmax.xlane.f32.xlu1 %v3833_v22 }
0x1f4a   :  { %3679 = vrot.lane.b32.xlu1 %v6422_v49, %s5890_s27 }
0x1f4e   :  { %4068 = vrot.lane.b32.xlu1 %v6422_v49, %s5891_s29 }
0x1f52   :  { %4066 = vrot.lane.b32.xlu1 %v6422_v49, %s5892_s2 }
0x1fc2   :  { %v3670_v23 = vpop.xlane.xlu0 %3669 }
0x1fc3   :  { %v3671_v19 = vsub.f32 %v3665_v15, %v3670_v23 }
0x1fc5   :  { %v3672_v24 = vmul.f32 1.442695, %v3671_v19 }
0x1fc6   :  { %v3835_v25 = vpop.xlane.xlu1 %3834 }
0x1fc7   :  { %5693 = vpow2.f32 %v3672_v24  ;;  %v3836_v27 = vsub.f32 %v3830_v3, %v3835_v25 }
0x1fc9   :  { %v3837_v29 = vmul.f32 1.442695, %v3836_v27 }
0x1fca   :  { %v3680_v30 = vpop.permute.xlu1 %3679 }
0x1fcb   :  { %5695 = vpow2.f32 %v3837_v29  ;;  %5444 = vmatpush3.msra.mxu1 %v3680_v30 }
0x1fcc   :  { %5453 = vmatprep.subr.mxu1 %v5884_v56 }
0x1fce   :  { %v4069_v48 = vpop.permute.xlu1 %4068 }
0x1fd1   :  { %v5694_v31 = vpop.eup %5693 }
0x1fd2   :  { %v3674_v32 = vsel %vm334_vm3, %v5694_v31, 0.0 }
0x1fd3   :  { %3675 = vadd.xlane.f32.xlu0 %v3674_v32 }
0x1fd5   :  { %v5696_v33 = vpop.eup %5695 }
0x1fd6   :  { %v3839_v34 = vsel %vm334_vm3, %v5696_v33, 0.0 }
0x1fd7   :  { %3840 = vadd.xlane.f32.xlu0 %v3839_v34 }
0x1fed   :  { %3844 = vrot.lane.b32.xlu0 %v6422_v49, %s5889_s14 }
0x2001   :  { %v3586_v36 = vpop.f32.mrb[38].mxu1 }
0x2002   :  { %v6559_v37 = vadd.f32 %v3586_v36, %v3350_v2  ;;  %v5437_v38 = vpop.f32.mrb[39].mxu1 }
0x2004   :  { %v4548_v16 = vadd.f32 %v5046_v12, %v6559_v37 }
0x2060   :  { %v3676_v39 = vpop.xlane.xlu0 %3675 }
0x2061   :  { %5697 = vrcp.f32 %v3676_v39 }
0x2064   :  { %v3841_v40 = vpop.xlane.xlu0 %3840 }
0x2065   :  { %5699 = vrcp.f32 %v3841_v40 }
0x2068   :  { %v3845_v42 = vpop.permute.xlu0 %3844 }
0x206b   :  { %v5698_v28 = vpop.eup %5697 }
0x206c   :  { %v3678_v41 = vmul.f32 %v5698_v28, %v5694_v31 }
0x206e   :  { %5446 = vmatmul.mubr.msk.f32.vlgmr.msra.gmra.mrb[40].mxu1 %vm334_vm3, %v3678_v41 }
0x206f   :  { %v5700_v4 = vpop.eup %5699  ;;  %5454 = vmatpush3.msra.mxu1 %v3845_v42  ;;  %5455 = vmatprep.mubr.msk.f32.mxu1 %vm5885_vm2, %v5884_v56 }
0x2070   :  { %v3843_v6 = vmul.f32 %v5700_v4, %v5696_v33  ;;  %5463 = vmatprep.subr.mxu1 %v5884_v56 }
0x2072   :  { %5456 = vmatmul.mubr.msk.f32.vlgmr.msra.gmra.mrb[42].mxu1 %vm334_vm3, %v3843_v6 }
0x2073   :  { %5464 = vmatpush3.msra.mxu1 %v6469_v21  ;;  %5465 = vmatprep.mubr.msk.f32.mxu1 %vm5885_vm2, %v5884_v56  ;;  %v4067_v21 = vpop.permute.xlu1 %4066 }
0x2074   :  { %5473 = vmatprep.subr.mxu1 %v5884_v56 }
0x2141   :  { %v3751_v45 = vpop.f32.mrb[40].mxu1 }
0x2142   :  { %v5447_v47 = vpop.f32.mrb[41].mxu1  ;;  %5466 = vmatmul.mubr.msk.f32.vlgmr.msra.gmra.mrb[44].mxu1 %vm334_vm3, %v3751_v45 }
0x2143   :  { %5475 = vmatprep.mubr.msk.f32.mxu1 %vm5885_vm2, %v5884_v56 }
0x2145   :  { %v3916_v44 = vpop.f32.mrb[42].mxu1 }
0x2146   :  { %v5457_v52 = vpop.f32.mrb[43].mxu1  ;;  %5461 = vmatmul.mubr.msk.f32.vlgmr.msra.gmra.mrb[44].mxu0 %vm334_vm3, %v3916_v44 }
0x2147   :  { %5469 = vmatpush3.xpose.msk.msra.mxu0 %vm334_vm3, %v4069_v48  ;;  %5470 = vmatprep.mubr.msk.f32.mxu0 %vm5885_vm2, %v5884_v56 }
0x2148   :  { %5478 = vmatprep.subr.mxu0 %v5884_v56 }
0x214a   :  { %5471 = vmatmul.mubr.msk.f32.vlgmr.msra.gmra.mrb[46].mxu0 %vm334_vm3, %v4067_v21 }
0x214b   :  { %5479 = vmatpush3.msra.mxu0 %v6502_v51  ;;  %5480 = vmatprep.mubr.msk.f32.mxu0 %vm5885_vm2, %v5884_v56 }
0x214c   :  { %5488 = vmatprep.subr.mxu0 %v5884_v56 }
0x2215   :  { %v4062_v53 = vpop.f32.mrb[44].mxu1 }
0x2216   :  { %v5467_v54 = vpop.f32.mrb[45].mxu1 }
0x2219   :  { %v3989_v57 = vpop.f32.mrb[44].mxu0 }
0x221a   :  { %v4063_v58 = vadd.f32 %v4062_v53, %v3989_v57  ;;  %v5462_v60 = vpop.f32.mrb[45].mxu0  ;;  %v5048_v57 = vld [vmem:[#allocation13 + $0xb] ss:$0 sm:$0xff] }
0x221d   :  { %v4140_v59 = vpop.f32.mrb[46].mxu0 }
0x221e   :  { %v4141_v62 = vadd.f32 %v4140_v59, %v6316_v26  ;;  %v5472_v63 = vpop.f32.mrb[47].mxu0  ;;  %v4591_v59 = vld [vmem:[#allocation10 + $0x20] sm:$0xff] }
0x2220   :  { %v4144_v0 = vsel %vm334_vm3, %v4141_v62, -inf }
0x2221   :  { %4145 = vmax.xlane.f32.xlu0 %v4144_v0  ;;  %v4593_v0 = vld [vmem:[#allocation10 + $0x30] sm:$0xff] }
0x2237   :  { %4155 = vrot.lane.b32.xlu0 %v6422_v49, %s5895_s12 }
0x223b   :  { %4305 = vrot.lane.b32.xlu0 %v6422_v49, %s5894_s7 }
0x22ae   :  { %v4146_v51 = vpop.xlane.xlu0 %4145 }
0x22af   :  { %v4147_v7 = vsub.f32 %v4141_v62, %v4146_v51  ;;  %v4592_v62 = vld [vmem:[#allocation10 + $0x28] sm:$0xff]  ;;  %v4594_v51 = vld [vmem:[#allocation10 + $0x38] sm:$0xff] }
0x22b0   :  { %v5579_v63 = vpack.c.bf16 %v4592_v62, %v4591_v59 }
0x22b1   :  { %v4148_v1 = vmul.f32 1.442695, %v4147_v7  ;;  %v5583_v7 = vpack.c.bf16 %v4594_v51, %v4593_v0  ;;  %v4832_v0 = vld [vmem:[%s6663_s9] sm:$0xff]  ;;  %v4833_v51 = vld [vmem:[%s6663_s9 + $0x8] sm:$0xff] }
0x22b2   :  { %v4156_v50 = vpop.permute.xlu0 %4155 }
0x22b3   :  { %5701 = vpow2.f32 %v4148_v1  ;;  %5474 = vmatpush3.msra.mxu1 %v4156_v50 }
0x22b4   :  { %5483 = vmatprep.subr.mxu1 %v5884_v56 }
0x22b6   :  { %v4306_v35 = vpop.permute.xlu0 %4305 }
0x22bd   :  { %v5702_v2 = vpop.eup %5701 }
0x22be   :  { %v4150_v5 = vsel %vm334_vm3, %v5702_v2, 0.0 }
0x22bf   :  { %4151 = vadd.xlane.f32.xlu1 %v4150_v5 }
0x22d0   :  { %4307 = vrot.lane.b32.xlu1 %v6422_v49, %s5893_s28 }
0x234c   :  { %v4152_v8 = vpop.xlane.xlu1 %4151 }
0x234d   :  { %5703 = vrcp.f32 %v4152_v8 }
0x2350   :  { %v4308_v11 = vpop.permute.xlu1 %4307 }
0x2357   :  { %v5704_v9 = vpop.eup %5703 }
0x2358   :  { %v4154_v10 = vmul.f32 %v5704_v9, %v5702_v2 }
0x235a   :  { %5476 = vmatmul.mubr.msk.f32.vlgmr.msra.gmra.mrb[46].mxu1 %vm334_vm3, %v4154_v10 }
0x235b   :  { %5484 = vmatpush3.xpose.msk.msra.mxu1 %vm334_vm3, %v4308_v11  ;;  %5485 = vmatprep.mubr.msk.f32.mxu1 %vm5885_vm2, %v5884_v56  ;;  %v4596_v11 = vld [vmem:[#allocation12 + $0x40] sm:$0xff] }
0x235c   :  { %5493 = vmatprep.subr.mxu1 %v5884_v56 }
0x235e   :  { %5486 = vmatmul.mubr.msk.f32.vlgmr.msra.gmra.mrb[48].mxu1 %vm334_vm3, %v4306_v35  ;;  %v4597_v35 = vld [vmem:[#allocation12 + $0x48] sm:$0xff] }
0x235f   :  { %5494 = vmatpush3.msra.mxu1 %v6537_v13  ;;  %5495 = vmatprep.mubr.msk.f32.mxu1 %vm5885_vm2, %v5884_v56  ;;  %v4550_v13 = vadd.f32 %v4548_v16, %v6412_v43 }
0x2361   :  { %v4552_v3 = vsel %vm245_vm1, %v4550_v13, 0.0 }
0x242d   :  { %v4227_v14 = vpop.f32.mrb[46].mxu1 }
0x242e   :  { %v5477_v55 = vpop.f32.mrb[47].mxu1  ;;  %5481 = vmatmul.mubr.msk.f32.vlgmr.msra.gmra.mrb[48].mxu0 %vm334_vm3, %v4227_v14  ;;  %v4598_v14 = vld [vmem:[#allocation12 + $0x50] sm:$0xff] }
0x242f   :  { %5490 = vmatprep.mubr.msk.f32.mxu0 %vm5885_vm2, %v5884_v56  ;;  %v4599_v55 = vld [vmem:[#allocation12 + $0x58] sm:$0xff] }
0x2430   :  { %v5591_v16 = vpack.c.bf16 %v4599_v55, %v4598_v14  ;;  %v5055_v14 = vld [vmem:[#allocation13 + $0xc] ss:$0 sm:$0xff] }
0x2431   :  { %v4379_v15 = vpop.f32.mrb[48].mxu1 }
0x2432   :  { %v4380_v17 = vadd.f32 %v4379_v15, %v6316_v26  ;;  %v5487_v18 = vpop.f32.mrb[49].mxu1  ;;  %v4600_v15 = vld [vmem:[#allocation12 + $0x60] sm:$0xff] }
0x2434   :  { %v4383_v61 = vsel %vm334_vm3, %v4380_v17, -inf }
0x2435   :  { %4384 = vmax.xlane.f32.xlu1 %v4383_v61  ;;  %v4602_v61 = vld [vmem:[#allocation12 + $0x70] sm:$0xff] }
0x2439   :  { %4553 = vadd.xlane.f32.xlu1 %v4552_v3 }
0x24c2   :  { %v4385_v20 = vpop.xlane.xlu1 %4384 }
0x24c3   :  { %v4386_v22 = vsub.f32 %v4380_v17, %v4385_v20  ;;  %v4601_v17 = vld [vmem:[#allocation12 + $0x68] sm:$0xff] }
0x24c4   :  { %v5595_v18 = vpack.c.bf16 %v4601_v17, %v4600_v15  ;;  %v5049_v20 = vld [vmem:[#allocation13 + $0xe] ss:$0 sm:$0xff] }
0x24c5   :  { %v4387_v23 = vmul.f32 1.442695, %v4386_v22 }
0x24c6   :  { %v4554_v33 = vpop.xlane.xlu1 %4553 }
0x24c7   :  { %5705 = vpow2.f32 %v4387_v23  ;;  %v4558_v34 = vmul.f32 0.03125, %v4554_v33 }
0x24c9   :  { %v4560_v38 = vsub.f32 %v4550_v13, %v4558_v34  ;;  %v4603_v13 = vld [vmem:[#allocation12 + $0x78] sm:$0xff] }
0x24ca   :  { %v5599_v3 = vpack.c.bf16 %v4603_v13, %v4602_v61 }
0x24cb   :  { %v4562_v41 = vmul.f32 %v4560_v38, %v4560_v38 }
0x24cd   :  { %v4564_v42 = vsel %vm245_vm1, %v4562_v41, 0.0  ;;  %v5052_v41 = vld [vmem:[#allocation13 + $0xf] ss:$0 sm:$0xff] }
0x24d1   :  { %v5706_v19 = vpop.eup %5705 }
0x24d2   :  { %v4389_v56 = vsel %vm334_vm3, %v5706_v19, 0.0 }
0x24d3   :  { %4390 = vadd.xlane.f32.xlu0 %v4389_v56 }
0x24e9   :  { %4394 = vrot.lane.b32.xlu0 %v6422_v49, %s5896_s15 }
0x2501   :  { %v4300_v26 = vpop.f32.mrb[48].mxu0 }
0x2502   :  { %v4304_v24 = vadd.f32 %v4300_v26, %v4063_v58  ;;  %v5482_v25 = vpop.f32.mrb[49].mxu0 }
0x2560   :  { %v4391_v27 = vpop.xlane.xlu0 %4390 }
0x2561   :  { %5707 = vrcp.f32 %v4391_v27 }
0x2564   :  { %v4395_v43 = vpop.permute.xlu0 %4394 }
0x2565   :  { %5489 = vmatpush3.msra.mxu0 %v4395_v43 }
0x2566   :  { %5580 = vmatprep.subr.bf16.mxu0 %v5579_v63 }
0x256b   :  { %v5708_v29 = vpop.eup %5707 }
0x256c   :  { %v4393_v30 = vmul.f32 %v5708_v29, %v5706_v19 }
0x256e   :  { %5491 = vmatmul.mubr.msk.f32.vlgmr.msra.gmra.mrb[50].mxu0 %vm334_vm3, %v4393_v30 }
0x256f   :  { %5582 = vmatpush3.bf16.msra.mxu0 %v5579_v63 }
0x2570   :  { %5584 = vmatprep.subr.bf16.mxu0 %v5583_v7 }
0x2573   :  { %5586 = vmatpush3.bf16.msra.mxu0 %v5583_v7  ;;  %v5603_v7 = vpack.c.bf16 %v4833_v51, %v4832_v0 }
0x2575   :  { %5604 = vmatprep.subr.bf16.mxu0 %v5603_v7 }
0x2641   :  { %v4466_v31 = vpop.f32.mrb[50].mxu0 }
0x2642   :  { %v5492_v32 = vpop.f32.mrb[51].mxu0  ;;  %5496 = vmatmul.mubr.msk.f32.vlgmr.msra.gmra.mrb[50].mxu1 %vm334_vm3, %v4466_v31 }
0x2715   :  { %v4539_v36 = vpop.f32.mrb[50].mxu1 }
0x2716   :  { %v4543_v37 = vadd.f32 %v4539_v36, %v4304_v24  ;;  %v5497_v49 = vpop.f32.mrb[51].mxu1 }
0x2718   :  { %v4549_v39 = vadd.f32 %v5046_v12, %v4543_v37  ;;  %v5587_v12 = vpack.c.bf16 %v4597_v35, %v4596_v11 }
0x271a   :  { %v4551_v40 = vadd.f32 %v4549_v39, %v6416_v46  ;;  %v5047_v46 = vld [vmem:[#allocation13 + $0xa] ss:$0 sm:$0xff]  ;;  %5588 = vmatprep.subr.bf16.mxu1 %v5587_v12 }
0x271b   :  { %5590 = vmatpush3.bf16.msra.mxu1 %v5587_v12 }
0x271c   :  { %v4555_v28 = vsel %vm245_vm1, %v4551_v40, 0.0  ;;  %5592 = vmatprep.subr.bf16.mxu1 %v5591_v16 }
0x271d   :  { %4556 = vadd.xlane.f32.xlu1 %v4555_v28 }
0x271f   :  { %5594 = vmatpush3.bf16.msra.mxu1 %v5591_v16  ;;  %v5056_v16 = vld [vmem:[#allocation13 + $0xd] ss:$0 sm:$0xff] }
0x2720   :  { %5596 = vmatprep.subr.bf16.mxu1 %v5595_v18 }
0x2721   :  { %4565 = vadd.xlane.f32.xlu1 %v4564_v42 }
0x2723   :  { %5598 = vmatpush3.bf16.msra.mxu1 %v5595_v18 }
0x2724   :  { %5600 = vmatprep.subr.bf16.mxu1 %v5599_v3 }
0x2727   :  { %5602 = vmatpush3.bf16.msra.mxu1 %v5599_v3 }
0x27aa   :  { %v4557_v4 = vpop.xlane.xlu1 %4556 }
0x27ab   :  { %v4559_v6 = vmul.f32 0.03125, %v4557_v4 }
0x27ad   :  { %v4561_v45 = vsub.f32 %v4551_v40, %v4559_v6 }
0x27ae   :  { %v4566_v47 = vpop.xlane.xlu1 %4565 }
0x27af   :  { %v4570_v48 = vmul.f32 0.03125, %v4566_v47  ;;  %v4563_v44 = vmul.f32 %v4561_v45, %v4561_v45 }
0x27b1   :  { %v4572_v52 = vadd.f32 1e-12, %v4570_v48  ;;  %v4567_v21 = vsel %vm245_vm1, %v4563_v44, 0.0 }
0x27b2   :  { %4568 = vadd.xlane.f32.xlu1 %v4567_v21 }
0x27b3   :  { %5709 = vrsqrt.f32 %v4572_v52 }
0x27bd   :  { %v5710_v53 = vpop.eup %5709 }
0x27be   :  { %v4576_v54 = vmul.f32 %v5710_v53, %v4560_v38 }
0x27c0   :  { %v4582_v58 = vmul.f32 %v5047_v46, %v4576_v54 }
0x27c2   :  { %v6619_v60 = vadd.f32 %v5048_v57, %v4582_v58 }
0x27c4   :  { %5506 = vmatprep.mubr.msk.f32.mxu0 %vm245_vm1, %v6619_v60 }
0x283f   :  { %v4569_v1 = vpop.xlane.xlu1 %4568 }
0x2840   :  { %v4571_v50 = vmul.f32 0.03125, %v4569_v1  ;;  %v4834_v1 = vld [vmem:[%s6663_s9 + $0x10] sm:$0xff] }
0x2842   :  { %v4573_v2 = vadd.f32 1e-12, %v4571_v50  ;;  %v4835_v50 = vld [vmem:[%s6663_s9 + $0x18] sm:$0xff] }
0x2844   :  { %5711 = vrsqrt.f32 %v4573_v2  ;;  %v5607_v2 = vpack.c.bf16 %v4835_v50, %v4834_v1 }
0x284e   :  { %v5712_v5 = vpop.eup %5711 }
0x284f   :  { %v4577_v8 = vmul.f32 %v5712_v5, %v4561_v45 }
0x2851   :  { %v4583_v9 = vmul.f32 %v5047_v46, %v4577_v8 }
0x2853   :  { %v4589_v10 = vadd.f32 %v5048_v57, %v4583_v9 }
0x2855   :  { %5507 = vmatmul.mubr.msk.f32.vlgmr.msra.gmra.mrb[52].mxu0 %vm245_vm1, %v4589_v10 }
0x2856   :  { %5606 = vmatpush3.bf16.msra.mxu0 %v5603_v7 }
0x2857   :  { %5608 = vmatprep.subr.bf16.mxu0 %v5607_v2 }
0x285a   :  { %5610 = vmatpush3.bf16.msra.mxu0 %v5607_v2 }
0x2928   :  { %v5508_v22 = vpop.f32.mrb[52].mxu0 }
0x2929   :  { %v4686_v23 = vadd.f32 %v5508_v22, %v5049_v20  ;;  %v4680_v19 = vpop.f32.mrb[53].mxu0 }
0x292a   :  { %v4681_v56 = vadd.f32 %v5049_v20, %v4680_v19  ;;  %v5057_v20 = vld [vmem:[%s6664_s10] ss:$0 sm:$0xff] }
0x292b   :  { %v4690_v26 = vmul.f32 %v4686_v23, %v4686_v23 }
0x292c   :  { %v4689_v24 = vmul.f32 %v4681_v56, %v4681_v56 }
0x292d   :  { %v4692_v25 = vmul.f32 %v4690_v26, %v4686_v23 }
0x292e   :  { %v4691_v27 = vmul.f32 %v4689_v24, %v4681_v56 }
0x292f   :  { %v4694_v43 = vmul.f32 0.044715, %v4692_v25 }
0x2930   :  { %v4693_v29 = vmul.f32 0.044715, %v4691_v27 }
0x2931   :  { %v4696_v30 = vadd.f32 %v4694_v43, %v4686_v23 }
0x2932   :  { %v4695_v31 = vadd.f32 %v4693_v29, %v4681_v56 }
0x2933   :  { %v4698_v32 = vmul.f32 0.7978846, %v4696_v30 }
0x2934   :  { %v4697_v33 = vmul.f32 0.7978846, %v4695_v31 }
0x2935   :  { %5713 = vtanh.f32 %v4698_v32 }
0x2936   :  { %5715 = vtanh.f32 %v4697_v33 }
0x293f   :  { %v5714_v34 = vpop.eup %5713 }
0x2940   :  { %v5716_v36 = vpop.eup %5715  ;;  %v4702_v37 = vadd.f32 1.0, %v5714_v34 }
0x2941   :  { %v4701_v49 = vadd.f32 1.0, %v5716_v36 }
0x2942   :  { %v4704_v38 = vmul.f32 0.5, %v4702_v37 }
0x2943   :  { %v4703_v39 = vmul.f32 0.5, %v4701_v49 }
0x2944   :  { %v4706_v28 = vmul.f32 %v4704_v38, %v4686_v23 }
0x2945   :  { %v4705_v40 = vmul.f32 %v4703_v39, %v4681_v56 }
0x2947   :  { %5525 = vmatprep.mubr.msk.f32.mxu1 %vm2412_vm4, %v4705_v40 }
0x2948   :  { %5526 = vmatmul.mubr.msk.f32.vlgmr.msra.gmra.mrb[52].mxu1 %vm2412_vm4, %v4706_v28 }
0x2a1b   :  { %v5527_v42 = vpop.f32.mrb[52].mxu1 }
0x2a1c   :  { %v4783_v4 = vpop.f32.mrb[53].mxu1  ;;  %v4789_v6 = vadd.f32 %v5527_v42, %v5052_v41 }
0x2a1d   :  { %v4784_v45 = vadd.f32 %v5052_v41, %v4783_v4 }
0x2a1e   :  { %v4793_v44 = vadd.f32 %v4789_v6, %v4589_v10 }
0x2a1f   :  { %v4792_v47 = vadd.f32 %v4784_v45, %v6619_v60 }
0x2a20   :  { %v4797_v52 = vsel %vm245_vm1, %v4793_v44, 0.0 }
0x2a21   :  { %v4794_v48 = vsel %vm245_vm1, %v4792_v47, 0.0 }
0x2a22   :  { %4795 = vadd.xlane.f32.xlu1 %v4794_v48 }
0x2a26   :  { %4798 = vadd.xlane.f32.xlu1 %v4797_v52 }
0x2aaf   :  { %v4796_v21 = vpop.xlane.xlu1 %4795 }
0x2ab0   :  { %v4800_v53 = vmul.f32 0.03125, %v4796_v21 }
0x2ab2   :  { %v4802_v46 = vsub.f32 %v4792_v47, %v4800_v53 }
0x2ab3   :  { %v4799_v54 = vpop.xlane.xlu1 %4798 }
0x2ab4   :  { %v4801_v57 = vmul.f32 0.03125, %v4799_v54  ;;  %v4804_v58 = vmul.f32 %v4802_v46, %v4802_v46 }
0x2ab6   :  { %v4803_v59 = vsub.f32 %v4793_v44, %v4801_v57  ;;  %v4806_v62 = vsel %vm245_vm1, %v4804_v58, 0.0 }
0x2ab7   :  { %4807 = vadd.xlane.f32.xlu0 %v4806_v62 }
0x2ab8   :  { %v4805_v63 = vmul.f32 %v4803_v59, %v4803_v59 }
0x2aba   :  { %v4809_v60 = vsel %vm245_vm1, %v4805_v63, 0.0 }
0x2abb   :  { %4810 = vadd.xlane.f32.xlu1 %v4809_v60 }
0x2b44   :  { %v4808_v5 = vpop.xlane.xlu0 %4807 }
0x2b45   :  { %v4812_v8 = vmul.f32 0.03125, %v4808_v5 }
0x2b47   :  { %v4814_v9 = vadd.f32 1e-12, %v4812_v8 }
0x2b48   :  { %v4811_v10 = vpop.xlane.xlu1 %4810 }
0x2b49   :  { %5717 = vrsqrt.f32 %v4814_v9  ;;  %v4813_v11 = vmul.f32 0.03125, %v4811_v10 }
0x2b4b   :  { %v4815_v35 = vadd.f32 1e-12, %v4813_v11 }
0x2b4d   :  { %5719 = vrsqrt.f32 %v4815_v35 }
0x2b53   :  { %v5718_v12 = vpop.eup %5717 }
0x2b54   :  { %v4818_v55 = vmul.f32 %v5718_v12, %v4802_v46 }
0x2b56   :  { %v4824_v15 = vmul.f32 %v5055_v14, %v4818_v55 }
0x2b57   :  { %v5720_v17 = vpop.eup %5719 }
0x2b58   :  { %v4819_v18 = vmul.f32 %v5720_v17, %v4803_v59  ;;  %v4830_v61 = vadd.f32 %v5056_v16, %v4824_v15 }
0x2b5a   :  { %v4825_v13 = vmul.f32 %v5055_v14, %v4819_v18  ;;  %5536 = vmatprep.mubr.msk.f32.mxu0 %vm245_vm1, %v4830_v61 }
0x2b5c   :  { %v4831_v3 = vadd.f32 %v5056_v16, %v4825_v13 }
0x2b5e   :  { %5537 = vmatmul.mubr.msk.f32.vlgmr.msra.gmra.mrb[54].mxu0 %vm245_vm1, %v4831_v3 }
0x2c31   :  { %v5538_v22 = vpop.f32.mrb[54].mxu0 }
0x2c32   :  { %v4921_v23 = vadd.f32 %v5538_v22, %v5057_v20  ;;  %v4915_v19 = vpop.f32.mrb[55].mxu0 }
0x2c33   :  { %v4916_v56 = vadd.f32 %v5057_v20, %v4915_v19 }
0x2c34   :  { %4925 = vst [vmem:[%s6665_s11 + $0x8] sm:$0xff] %v4921_v23 }
0x2c35   :  { %4924 = vst [vmem:[%s6665_s11] sm:$0xff] %v4916_v56 }
0x2c36   :  { %4930 = vsyncpa [#allocation6], 1 }
0x2c37   :  { %4931 = vsyncpa [#allocation8], 1 }
0x2c38   :  { %4932 = vsyncpa [#allocation11], 1 }
0x2c39   :  { %4933 = vsyncpa [#allocation14], 1 }

</bundles_post_ra>
